<compile_context>
chip_gen: v5e
topology: v5e:2x2
jax: 0.10.0
libtpu: 0.0.40
codegen_flags: <defaults>
</compile_context>

<pallas_src>
import functools

import jax
import jax.numpy as jnp
from jax import lax
from jax.experimental import pallas as pl
from jax.experimental.pallas import tpu as pltpu
import numpy as np

LEAKY_SLOPE = 0.25
VMEM_LIMIT_BYTES = 32 * 1024 * 1024  # stay within the v7x-safe scoped default


# --------------------------------------------------------------------------
# Pallas kernel: fused 3x3 / stride-2 conv + bias + LeakyReLU on a
# space-to-depth packed input.  One grid step == one batch element.
# --------------------------------------------------------------------------
def _conv3x3_s2_kernel(x_ref, w_ref, b_ref, o_ref, *, Ho, Wo, cin_p, slope):
    """Refs (batch dim squeezed away by the BlockSpec):
       x_ref: (Ho+1, Wo+1, 4*cin_p) bf16 -- padded pixel (2a+r, 2b+s, c) lives
                                            at [a, b, (r*2+s)*cin_p + c]
       w_ref: (9*cin_p, Cout)       bf16 -- tap-major (t = ky*3 + kx)
       b_ref: (1, Cout)             f32
       o_ref: (Ho, Wo, Cout)        f32 or bf16
    """
    cout = o_ref.shape[-1]
    bias = b_ref[...]                                   # hoisted (1, Cout) f32

    def row_body(i):
        # Two packed input rows cover all 9 taps of output row i.
        x0 = x_ref[i]                                   # padded rows 2i, 2i+1
        x1 = x_ref[i + 1]                               # padded rows 2i+2, 2i+3
        acc = jnp.zeros((Wo, cout), jnp.float32)
        for ky in range(3):
            xrow = x0 if ky < 2 else x1
            for kx in range(3):
                dx = kx // 2
                g = (ky % 2) * 2 + (kx % 2)
                t = ky * 3 + kx
                tap = xrow[dx:dx + Wo, g * cin_p:(g + 1) * cin_p]   # (Wo, cin_p)
                wt = w_ref[t * cin_p:(t + 1) * cin_p, :]            # (cin_p, Cout)
                acc = acc + jnp.dot(tap, wt,
                                    preferred_element_type=jnp.float32)
        y = acc + bias
        y = jnp.maximum(y, slope * y)                   # LeakyReLU on f32 acc
        o_ref[i] = y.astype(o_ref.dtype)

    if Ho <= 16:                                        # small images: unroll
        for i in range(Ho):
            row_body(i)
    else:                                               # large images: rolled
        def body(i, carry):
            row_body(i)
            return carry
        lax.fori_loop(0, Ho, body, 0)


def _space_to_depth_s2(x_nhwc, cin_p):
    """pad=1 / stride-2 space-to-depth packing (plain-JAX layout glue only).

    (N, H, W, Cin) -> (N, H//2+1, W//2+1, 4*cin_p); channel (r*2+s)*cin_p + c
    holds padded pixel (2a + r, 2b + s, c).
    """
    N, H, W, Cin = x_nhwc.shape
    assert H % 2 == 0 and W % 2 == 0
    Ho, Wo = H // 2, W // 2
    x = x_nhwc
    if cin_p > Cin:
        x = jnp.pad(x, ((0, 0), (0, 0), (0, 0), (0, cin_p - Cin)))
    xp = jnp.pad(x, ((0, 0), (1, 1), (1, 1), (0, 0)))
    xs = xp.reshape(N, Ho + 1, 2, Wo + 1, 2, cin_p)
    xs = xs.transpose(0, 1, 3, 2, 4, 5)
    return xs.reshape(N, Ho + 1, Wo + 1, 4 * cin_p)


def conv3x3_s2_lrelu(x_nhwc, w_taps, bias2d, out_dtype):
    """x_nhwc: (N, H, W, Cin); w_taps: (9*cin_p, Cout) bf16; bias2d: (1, Cout)."""
    N, H, W, _ = x_nhwc.shape
    Ho, Wo = H // 2, W // 2
    cin_p = w_taps.shape[0] // 9
    cout = w_taps.shape[1]
    xs = _space_to_depth_s2(x_nhwc.astype(jnp.bfloat16), cin_p)

    kernel = functools.partial(_conv3x3_s2_kernel, Ho=Ho, Wo=Wo,
                               cin_p=cin_p, slope=LEAKY_SLOPE)
    return pl.pallas_call(
        kernel,
        out_shape=jax.ShapeDtypeStruct((N, Ho, Wo, cout), out_dtype),
        grid=(N,),
        in_specs=[
            pl.BlockSpec((None, Ho + 1, Wo + 1, 4 * cin_p),
                         lambda n: (n, 0, 0, 0)),
            pl.BlockSpec((9 * cin_p, cout), lambda n: (0, 0)),
            pl.BlockSpec((1, cout), lambda n: (0, 0)),
        ],
        out_specs=pl.BlockSpec((None, Ho, Wo, cout), lambda n: (n, 0, 0, 0)),
        compiler_params=pltpu.CompilerParams(
            dimension_semantics=("parallel",),
            vmem_limit_bytes=VMEM_LIMIT_BYTES),
    )(xs, w_taps, bias2d)


# --------------------------------------------------------------------------
# Pallas kernel: fused adv + ac heads (single matmul, bias fused).
# --------------------------------------------------------------------------
def _heads_kernel(a_ref, w_ref, b_ref, o_ref):
    y = jnp.dot(a_ref[...], w_ref[...], preferred_element_type=jnp.float32)
    o_ref[...] = (y + b_ref[...]).astype(o_ref.dtype)


def fused_heads(h_flat_nhwc, w_heads, b_heads):
    """h_flat_nhwc: (B, feat) f32 (NHWC flatten order); w_heads: (feat, n_out)."""
    B, K = h_flat_nhwc.shape
    n_out = w_heads.shape[1]
    tm = B if B <= 256 else 256
    a = h_flat_nhwc.astype(jnp.bfloat16)
    return pl.pallas_call(
        _heads_kernel,
        out_shape=jax.ShapeDtypeStruct((B, n_out), jnp.float32),
        grid=(pl.cdiv(B, tm),),
        in_specs=[
            pl.BlockSpec((tm, K), lambda m: (m, 0)),
            pl.BlockSpec((K, n_out), lambda m: (0, 0)),
            pl.BlockSpec((1, n_out), lambda m: (0, 0)),
        ],
        out_specs=pl.BlockSpec((tm, n_out), lambda m: (m, 0)),
        compiler_params=pltpu.CompilerParams(
            dimension_semantics=("parallel",),
            vmem_limit_bytes=VMEM_LIMIT_BYTES),
    )(a, w_heads, b_heads)


# --------------------------------------------------------------------------
# Parameters: synthetic PyTorch-layout params + kernel-ready preparation
# --------------------------------------------------------------------------
def make_params(num_classes, img_size, in_channels=3):
    key = jax.random.PRNGKey(0)
    chans = [in_channels, 16, 32, 64, 128]
    conv_params = []
    for i in range(4):
        key, kw, kb = jax.random.split(key, 3)
        cin, cout = chans[i], chans[i + 1]
        w = jax.random.normal(kw, (cout, cin, 3, 3), jnp.float32) * 0.05
        b = jax.random.normal(kb, (cout,), jnp.float32) * 0.05
        conv_params.append((w, b))

    ds = img_size // 2 ** 4
    feat = 128 * ds * ds
    key, k1, k2, k3, k4 = jax.random.split(key, 5)
    adv_w = jax.random.normal(k1, (1, feat), jnp.float32) * 0.05        # (out, in)
    adv_b = jax.random.normal(k2, (1,), jnp.float32) * 0.05
    ac_w = jax.random.normal(k3, (num_classes * 2, feat), jnp.float32) * 0.05
    ac_b = jax.random.normal(k4, (num_classes * 2,), jnp.float32) * 0.05
    return {"conv": conv_params, "adv": (adv_w, adv_b), "ac": (ac_w, ac_b)}


def _round_up(x, m):
    return (x + m - 1) // m * m


def prepare_params(params, img_size):
    """Convert PyTorch-layout params to kernel-ready form (bf16 MXU feed)."""
    conv = []
    for (w, b) in params["conv"]:
        cout, cin = w.shape[0], w.shape[1]
        cin_p = _round_up(cin, 8)                       # pad ragged K (3 -> 8)
        wt = jnp.transpose(w, (2, 3, 1, 0))             # (ky, kx, ci, co)
        wt = jnp.pad(wt, ((0, 0), (0, 0), (0, cin_p - cin), (0, 0)))
        wt = wt.reshape(9 * cin_p, cout).astype(jnp.bfloat16)
        conv.append((wt, b.reshape(1, cout).astype(jnp.float32)))

    adv_w, adv_b = params["adv"]
    ac_w, ac_b = params["ac"]
    ds = img_size // 2 ** 4
    n_out = adv_w.shape[0] + ac_w.shape[0]
    # Fuse heads and permute rows from NCHW-flatten (c, y, x) order to
    # NHWC-flatten (y, x, c) order so they consume the conv output directly.
    w_all = jnp.concatenate([adv_w, ac_w], axis=0).T                 # (feat, n_out)
    w_all = w_all.reshape(128, ds, ds, n_out).transpose(1, 2, 0, 3)
    w_all = w_all.reshape(128 * ds * ds, n_out).astype(jnp.bfloat16)
    b_all = jnp.concatenate([adv_b, ac_b], axis=0).reshape(1, n_out)
    return {"conv": conv, "heads": (w_all, b_all.astype(jnp.float32))}


# --------------------------------------------------------------------------
# Forward pass (matches PyTorch Discriminator.forward semantics)
# --------------------------------------------------------------------------
def discriminator_forward(prep, x_nchw, label, adc_fake=False):
    # Input arrives NCHW (PyTorch convention); the conv stack runs NHWC.
    h = jnp.transpose(x_nchw, (0, 2, 3, 1))
    n_layers = len(prep["conv"])
    for idx, (w_taps, bias2d) in enumerate(prep["conv"]):
        out_dtype = jnp.float32 if idx == n_layers - 1 else jnp.bfloat16
        h = conv3x3_s2_lrelu(h, w_taps, bias2d, out_dtype)

    B = h.shape[0]
    heads_out = fused_heads(h.reshape(B, -1), *prep["heads"])
    adv_output = heads_out[:, :1]
    cls_output = heads_out[:, 1:]

    # Returned `h` must match PyTorch's NCHW-contiguous flatten order.
    h_flat = jnp.transpose(h, (0, 3, 1, 2)).reshape(B, -1)

    if adc_fake:
        label_out = label * 2 + 1
    else:
        label_out = label * 2
    return {"h": h_flat, "adv_output": adv_output,
            "cls_output": cls_output, "label": label_out}


# --------------------------------------------------------------------------
# Pure-JAX reference (same bf16-operand / f32-accumulate numerics)
# --------------------------------------------------------------------------
def reference_forward(params, x_nchw, label, adc_fake=False):
    h = x_nchw.astype(jnp.float32)
    for (w, b) in params["conv"]:
        h = lax.conv_general_dilated(
            h.astype(jnp.bfloat16), w.astype(jnp.bfloat16),
            window_strides=(2, 2), padding=((1, 1), (1, 1)),
            dimension_numbers=("NCHW", "OIHW", "NCHW"),
            preferred_element_type=jnp.float32)
        h = h + b[None, :, None, None]
        h = jnp.maximum(h, LEAKY_SLOPE * h)
    h_flat = h.reshape(h.shape[0], -1)
    adv_w, adv_b = params["adv"]
    ac_w, ac_b = params["ac"]
    a16 = h_flat.astype(jnp.bfloat16)
    adv = jnp.dot(a16, adv_w.T.astype(jnp.bfloat16),
                  preferred_element_type=jnp.float32) + adv_b
    cls = jnp.dot(a16, ac_w.T.astype(jnp.bfloat16),
                  preferred_element_type=jnp.float32) + ac_b
    lbl = label * 2 + 1 if adc_fake else label * 2
    return {"h": h_flat, "adv_output": adv, "cls_output": cls, "label": lbl}


if __name__ == "__main__":
    num_classes = 4
    img_size = 16
    in_channels = 3
    batch = 2

    params = make_params(num_classes, img_size, in_channels)
    prep = prepare_params(params, img_size)

    key = jax.random.PRNGKey(0)
    kx, kl = jax.random.split(key)
    x = jax.random.normal(kx, (batch, in_channels, img_size, img_size),
                          jnp.float32)
    label = jax.random.randint(kl, (batch,), 0, num_classes, jnp.int32)

    forward = jax.jit(discriminator_forward, static_argnames=("adc_fake",))
    out = forward(prep, x, label, adc_fake=False)
    out = jax.tree_util.tree_map(jax.block_until_ready, out)

    ref = reference_forward(params, x, label, adc_fake=False)
    np.testing.assert_allclose(np.asarray(out["h"]), np.asarray(ref["h"]),
                               rtol=2e-3, atol=2e-3)
    np.testing.assert_allclose(np.asarray(out["adv_output"]),
                               np.asarray(ref["adv_output"]),
                               rtol=2e-3, atol=2e-3)
    np.testing.assert_allclose(np.asarray(out["cls_output"]),
                               np.asarray(ref["cls_output"]),
                               rtol=2e-3, atol=2e-3)
    np.testing.assert_array_equal(np.asarray(out["label"]),
                                  np.asarray(ref["label"]))

    assert out["h"].shape == (batch, 128 * (img_size // 16) ** 2)
    assert out["adv_output"].shape == (batch, 1)
    assert out["cls_output"].shape == (batch, num_classes * 2)

    print("KERNEL_OK")
</pallas_src>

<mosaic_0001>
module attributes {stable_mosaic.version = 11 : i64} {
  func.func @_conv3x3_s2_kernel(%arg0: i32, %arg1: memref<1x9x9x32xbf16, #tpu.memory_space<vmem>>, %arg2: memref<72x16xbf16, #tpu.memory_space<vmem>>, %arg3: memref<1x16xf32, #tpu.memory_space<vmem>>, %arg4: memref<1x8x8x16xbf16, #tpu.memory_space<vmem>>) attributes {dimension_semantics = [#tpu.dimension_semantics<parallel>], iteration_bounds = array<i64: 2>, scalar_prefetch = 0 : i64, scratch_operands = 0 : i64, tpu.core_type = #tpu.core_type<tc>, window_params = [{transform_indices = @transform_0, window_bounds = array<i64: 1, 9, 9, 32>}, {pipeline_mode = #tpu.pipeline_mode<synchronous>, transform_indices = @transform_1, window_bounds = array<i64: 72, 16>}, {pipeline_mode = #tpu.pipeline_mode<synchronous>, transform_indices = @transform_2, window_bounds = array<i64: 1, 16>}, {transform_indices = @transform_3, window_bounds = array<i64: 1, 8, 8, 16>}]} {
    %c0 = arith.constant 0 : index
    %c0_0 = arith.constant 0 : index
    %0 = vector.load %arg3[%c0, %c0_0] : memref<1x16xf32, #tpu.memory_space<vmem>>, vector<1x16xf32>
    %c0_1 = arith.constant 0 : index
    %c0_2 = arith.constant 0 : index
    %c0_3 = arith.constant 0 : index
    %c0_4 = arith.constant 0 : index
    %1 = vector.load %arg1[%c0_1, %c0_2, %c0_3, %c0_4] : memref<1x9x9x32xbf16, #tpu.memory_space<vmem>>, vector<1x1x9x32xbf16>
    %2 = vector.shape_cast %1 : vector<1x1x9x32xbf16> to vector<9x32xbf16>
    %c0_5 = arith.constant 0 : index
    %c1 = arith.constant 1 : index
    %c0_6 = arith.constant 0 : index
    %c0_7 = arith.constant 0 : index
    %3 = vector.load %arg1[%c0_5, %c1, %c0_6, %c0_7] : memref<1x9x9x32xbf16, #tpu.memory_space<vmem>>, vector<1x1x9x32xbf16>
    %4 = vector.shape_cast %3 : vector<1x1x9x32xbf16> to vector<9x32xbf16>
    %cst = arith.constant 0.000000e+00 : f32
    %5 = vector.broadcast %cst : f32 to vector<8x16xf32>
    %6 = vector.extract_strided_slice %2 {offsets = [0, 0], sizes = [8, 8], strides = [1, 1]} : vector<9x32xbf16> to vector<8x8xbf16>
    %c0_8 = arith.constant 0 : index
    %c0_9 = arith.constant 0 : index
    %7 = vector.load %arg2[%c0_8, %c0_9] : memref<72x16xbf16, #tpu.memory_space<vmem>>, vector<8x16xbf16>
    %cst_10 = arith.constant dense<0.000000e+00> : vector<8x16xf32>
    %8 = tpu.matmul %6, %7, %cst_10 {dimension_numbers = #tpu.dot_dimension_numbers<[1], [0], [0], [1], [0, 0, 1, 1], [], []>} : vector<8x8xbf16>, vector<8x16xbf16>, vector<8x16xf32> -> vector<8x16xf32>
    %9 = arith.addf %5, %8 : vector<8x16xf32>
    %10 = vector.extract_strided_slice %2 {offsets = [0, 8], sizes = [8, 8], strides = [1, 1]} : vector<9x32xbf16> to vector<8x8xbf16>
    %c8 = arith.constant 8 : index
    %c0_11 = arith.constant 0 : index
    %11 = vector.load %arg2[%c8, %c0_11] : memref<72x16xbf16, #tpu.memory_space<vmem>>, vector<8x16xbf16>
    %cst_12 = arith.constant dense<0.000000e+00> : vector<8x16xf32>
    %12 = tpu.matmul %10, %11, %cst_12 {dimension_numbers = #tpu.dot_dimension_numbers<[1], [0], [0], [1], [0, 0, 1, 1], [], []>} : vector<8x8xbf16>, vector<8x16xbf16>, vector<8x16xf32> -> vector<8x16xf32>
    %13 = arith.addf %9, %12 : vector<8x16xf32>
    %14 = vector.extract_strided_slice %2 {offsets = [1, 0], sizes = [8, 8], strides = [1, 1]} : vector<9x32xbf16> to vector<8x8xbf16>
    %c16 = arith.constant 16 : index
    %c0_13 = arith.constant 0 : index
    %15 = vector.load %arg2[%c16, %c0_13] : memref<72x16xbf16, #tpu.memory_space<vmem>>, vector<8x16xbf16>
    %cst_14 = arith.constant dense<0.000000e+00> : vector<8x16xf32>
    %16 = tpu.matmul %14, %15, %cst_14 {dimension_numbers = #tpu.dot_dimension_numbers<[1], [0], [0], [1], [0, 0, 1, 1], [], []>} : vector<8x8xbf16>, vector<8x16xbf16>, vector<8x16xf32> -> vector<8x16xf32>
    %17 = arith.addf %13, %16 : vector<8x16xf32>
    %18 = vector.extract_strided_slice %2 {offsets = [0, 16], sizes = [8, 8], strides = [1, 1]} : vector<9x32xbf16> to vector<8x8xbf16>
    %c24 = arith.constant 24 : index
    %c0_15 = arith.constant 0 : index
    %19 = vector.load %arg2[%c24, %c0_15] : memref<72x16xbf16, #tpu.memory_space<vmem>>, vector<8x16xbf16>
    %cst_16 = arith.constant dense<0.000000e+00> : vector<8x16xf32>
    %20 = tpu.matmul %18, %19, %cst_16 {dimension_numbers = #tpu.dot_dimension_numbers<[1], [0], [0], [1], [0, 0, 1, 1], [], []>} : vector<8x8xbf16>, vector<8x16xbf16>, vector<8x16xf32> -> vector<8x16xf32>
    %21 = arith.addf %17, %20 : vector<8x16xf32>
    %22 = vector.extract_strided_slice %2 {offsets = [0, 24], sizes = [8, 8], strides = [1, 1]} : vector<9x32xbf16> to vector<8x8xbf16>
    %c32 = arith.constant 32 : index
    %c0_17 = arith.constant 0 : index
    %23 = vector.load %arg2[%c32, %c0_17] : memref<72x16xbf16, #tpu.memory_space<vmem>>, vector<8x16xbf16>
    %cst_18 = arith.constant dense<0.000000e+00> : vector<8x16xf32>
    %24 = tpu.matmul %22, %23, %cst_18 {dimension_numbers = #tpu.dot_dimension_numbers<[1], [0], [0], [1], [0, 0, 1, 1], [], []>} : vector<8x8xbf16>, vector<8x16xbf16>, vector<8x16xf32> -> vector<8x16xf32>
    %25 = arith.addf %21, %24 : vector<8x16xf32>
    %26 = vector.extract_strided_slice %2 {offsets = [1, 16], sizes = [8, 8], strides = [1, 1]} : vector<9x32xbf16> to vector<8x8xbf16>
    %c40 = arith.constant 40 : index
    %c0_19 = arith.constant 0 : index
    %27 = vector.load %arg2[%c40, %c0_19] : memref<72x16xbf16, #tpu.memory_space<vmem>>, vector<8x16xbf16>
    %cst_20 = arith.constant dense<0.000000e+00> : vector<8x16xf32>
    %28 = tpu.matmul %26, %27, %cst_20 {dimension_numbers = #tpu.dot_dimension_numbers<[1], [0], [0], [1], [0, 0, 1, 1], [], []>} : vector<8x8xbf16>, vector<8x16xbf16>, vector<8x16xf32> -> vector<8x16xf32>
    %29 = arith.addf %25, %28 : vector<8x16xf32>
    %30 = vector.extract_strided_slice %4 {offsets = [0, 0], sizes = [8, 8], strides = [1, 1]} : vector<9x32xbf16> to vector<8x8xbf16>
    %c48 = arith.constant 48 : index
    %c0_21 = arith.constant 0 : index
    %31 = vector.load %arg2[%c48, %c0_21] : memref<72x16xbf16, #tpu.memory_space<vmem>>, vector<8x16xbf16>
    %cst_22 = arith.constant dense<0.000000e+00> : vector<8x16xf32>
    %32 = tpu.matmul %30, %31, %cst_22 {dimension_numbers = #tpu.dot_dimension_numbers<[1], [0], [0], [1], [0, 0, 1, 1], [], []>} : vector<8x8xbf16>, vector<8x16xbf16>, vector<8x16xf32> -> vector<8x16xf32>
    %33 = arith.addf %29, %32 : vector<8x16xf32>
    %34 = vector.extract_strided_slice %4 {offsets = [0, 8], sizes = [8, 8], strides = [1, 1]} : vector<9x32xbf16> to vector<8x8xbf16>
    %c56 = arith.constant 56 : index
    %c0_23 = arith.constant 0 : index
    %35 = vector.load %arg2[%c56, %c0_23] : memref<72x16xbf16, #tpu.memory_space<vmem>>, vector<8x16xbf16>
    %cst_24 = arith.constant dense<0.000000e+00> : vector<8x16xf32>
    %36 = tpu.matmul %34, %35, %cst_24 {dimension_numbers = #tpu.dot_dimension_numbers<[1], [0], [0], [1], [0, 0, 1, 1], [], []>} : vector<8x8xbf16>, vector<8x16xbf16>, vector<8x16xf32> -> vector<8x16xf32>
    %37 = arith.addf %33, %36 : vector<8x16xf32>
    %38 = vector.extract_strided_slice %4 {offsets = [1, 0], sizes = [8, 8], strides = [1, 1]} : vector<9x32xbf16> to vector<8x8xbf16>
    %c64 = arith.constant 64 : index
    %c0_25 = arith.constant 0 : index
    %39 = vector.load %arg2[%c64, %c0_25] : memref<72x16xbf16, #tpu.memory_space<vmem>>, vector<8x16xbf16>
    %cst_26 = arith.constant dense<0.000000e+00> : vector<8x16xf32>
    %40 = tpu.matmul %38, %39, %cst_26 {dimension_numbers = #tpu.dot_dimension_numbers<[1], [0], [0], [1], [0, 0, 1, 1], [], []>} : vector<8x8xbf16>, vector<8x16xbf16>, vector<8x16xf32> -> vector<8x16xf32>
    %41 = arith.addf %37, %40 : vector<8x16xf32>
    %42 = vector.broadcast %0 : vector<1x16xf32> to vector<8x16xf32>
    %43 = arith.addf %41, %42 : vector<8x16xf32>
    %cst_27 = arith.constant 2.500000e-01 : f32
    %44 = vector.broadcast %cst_27 : f32 to vector<8x16xf32>
    %45 = arith.mulf %44, %43 : vector<8x16xf32>
    %46 = arith.maximumf %43, %45 : vector<8x16xf32>
    %47 = arith.truncf %46 : vector<8x16xf32> to vector<8x16xbf16>
    %c0_28 = arith.constant 0 : index
    %c0_29 = arith.constant 0 : index
    %c0_30 = arith.constant 0 : index
    %c0_31 = arith.constant 0 : index
    %48 = vector.load %arg4[%c0_28, %c0_29, %c0_30, %c0_31] : memref<1x8x8x16xbf16, #tpu.memory_space<vmem>>, vector<1x1x8x16xbf16>
    %49 = vector.shape_cast %48 : vector<1x1x8x16xbf16> to vector<8x16xbf16>
    %50 = vector.shape_cast %47 : vector<8x16xbf16> to vector<1x1x8x16xbf16>
    tpu.vector_store %arg4[%c0_28, %c0_29, %c0_30, %c0_31], %50 {strides = array<i32>} : memref<1x8x8x16xbf16, #tpu.memory_space<vmem>>, vector<1x1x8x16xbf16>,
    %c0_32 = arith.constant 0 : index
    %c1_33 = arith.constant 1 : index
    %c0_34 = arith.constant 0 : index
    %c0_35 = arith.constant 0 : index
    %51 = vector.load %arg1[%c0_32, %c1_33, %c0_34, %c0_35] : memref<1x9x9x32xbf16, #tpu.memory_space<vmem>>, vector<1x1x9x32xbf16>
    %52 = vector.shape_cast %51 : vector<1x1x9x32xbf16> to vector<9x32xbf16>
    %c0_36 = arith.constant 0 : index
    %c2 = arith.constant 2 : index
    %c0_37 = arith.constant 0 : index
    %c0_38 = arith.constant 0 : index
    %53 = vector.load %arg1[%c0_36, %c2, %c0_37, %c0_38] : memref<1x9x9x32xbf16, #tpu.memory_space<vmem>>, vector<1x1x9x32xbf16>
    %54 = vector.shape_cast %53 : vector<1x1x9x32xbf16> to vector<9x32xbf16>
    %cst_39 = arith.constant 0.000000e+00 : f32
    %55 = vector.broadcast %cst_39 : f32 to vector<8x16xf32>
    %56 = vector.extract_strided_slice %52 {offsets = [0, 0], sizes = [8, 8], strides = [1, 1]} : vector<9x32xbf16> to vector<8x8xbf16>
    %c0_40 = arith.constant 0 : index
    %c0_41 = arith.constant 0 : index
    %57 = vector.load %arg2[%c0_40, %c0_41] : memref<72x16xbf16, #tpu.memory_space<vmem>>, vector<8x16xbf16>
    %cst_42 = arith.constant dense<0.000000e+00> : vector<8x16xf32>
    %58 = tpu.matmul %56, %57, %cst_42 {dimension_numbers = #tpu.dot_dimension_numbers<[1], [0], [0], [1], [0, 0, 1, 1], [], []>} : vector<8x8xbf16>, vector<8x16xbf16>, vector<8x16xf32> -> vector<8x16xf32>
    %59 = arith.addf %55, %58 : vector<8x16xf32>
    %60 = vector.extract_strided_slice %52 {offsets = [0, 8], sizes = [8, 8], strides = [1, 1]} : vector<9x32xbf16> to vector<8x8xbf16>
    %c8_43 = arith.constant 8 : index
    %c0_44 = arith.constant 0 : index
    %61 = vector.load %arg2[%c8_43, %c0_44] : memref<72x16xbf16, #tpu.memory_space<vmem>>, vector<8x16xbf16>
    %cst_45 = arith.constant dense<0.000000e+00> : vector<8x16xf32>
    %62 = tpu.matmul %60, %61, %cst_45 {dimension_numbers = #tpu.dot_dimension_numbers<[1], [0], [0], [1], [0, 0, 1, 1], [], []>} : vector<8x8xbf16>, vector<8x16xbf16>, vector<8x16xf32> -> vector<8x16xf32>
    %63 = arith.addf %59, %62 : vector<8x16xf32>
    %64 = vector.extract_strided_slice %52 {offsets = [1, 0], sizes = [8, 8], strides = [1, 1]} : vector<9x32xbf16> to vector<8x8xbf16>
    %c16_46 = arith.constant 16 : index
    %c0_47 = arith.constant 0 : index
    %65 = vector.load %arg2[%c16_46, %c0_47] : memref<72x16xbf16, #tpu.memory_space<vmem>>, vector<8x16xbf16>
    %cst_48 = arith.constant dense<0.000000e+00> : vector<8x16xf32>
    %66 = tpu.matmul %64, %65, %cst_48 {dimension_numbers = #tpu.dot_dimension_numbers<[1], [0], [0], [1], [0, 0, 1, 1], [], []>} : vector<8x8xbf16>, vector<8x16xbf16>, vector<8x16xf32> -> vector<8x16xf32>
    %67 = arith.addf %63, %66 : vector<8x16xf32>
    %68 = vector.extract_strided_slice %52 {offsets = [0, 16], sizes = [8, 8], strides = [1, 1]} : vector<9x32xbf16> to vector<8x8xbf16>
    %c24_49 = arith.constant 24 : index
    %c0_50 = arith.constant 0 : index
    %69 = vector.load %arg2[%c24_49, %c0_50] : memref<72x16xbf16, #tpu.memory_space<vmem>>, vector<8x16xbf16>
    %cst_51 = arith.constant dense<0.000000e+00> : vector<8x16xf32>
    %70 = tpu.matmul %68, %69, %cst_51 {dimension_numbers = #tpu.dot_dimension_numbers<[1], [0], [0], [1], [0, 0, 1, 1], [], []>} : vector<8x8xbf16>, vector<8x16xbf16>, vector<8x16xf32> -> vector<8x16xf32>
    %71 = arith.addf %67, %70 : vector<8x16xf32>
    %72 = vector.extract_strided_slice %52 {offsets = [0, 24], sizes = [8, 8], strides = [1, 1]} : vector<9x32xbf16> to vector<8x8xbf16>
    %c32_52 = arith.constant 32 : index
    %c0_53 = arith.constant 0 : index
    %73 = vector.load %arg2[%c32_52, %c0_53] : memref<72x16xbf16, #tpu.memory_space<vmem>>, vector<8x16xbf16>
    %cst_54 = arith.constant dense<0.000000e+00> : vector<8x16xf32>
    %74 = tpu.matmul %72, %73, %cst_54 {dimension_numbers = #tpu.dot_dimension_numbers<[1], [0], [0], [1], [0, 0, 1, 1], [], []>} : vector<8x8xbf16>, vector<8x16xbf16>, vector<8x16xf32> -> vector<8x16xf32>
    %75 = arith.addf %71, %74 : vector<8x16xf32>
    %76 = vector.extract_strided_slice %52 {offsets = [1, 16], sizes = [8, 8], strides = [1, 1]} : vector<9x32xbf16> to vector<8x8xbf16>
    %c40_55 = arith.constant 40 : index
    %c0_56 = arith.constant 0 : index
    %77 = vector.load %arg2[%c40_55, %c0_56] : memref<72x16xbf16, #tpu.memory_space<vmem>>, vector<8x16xbf16>
    %cst_57 = arith.constant dense<0.000000e+00> : vector<8x16xf32>
    %78 = tpu.matmul %76, %77, %cst_57 {dimension_numbers = #tpu.dot_dimension_numbers<[1], [0], [0], [1], [0, 0, 1, 1], [], []>} : vector<8x8xbf16>, vector<8x16xbf16>, vector<8x16xf32> -> vector<8x16xf32>
    %79 = arith.addf %75, %78 : vector<8x16xf32>
    %80 = vector.extract_strided_slice %54 {offsets = [0, 0], sizes = [8, 8], strides = [1, 1]} : vector<9x32xbf16> to vector<8x8xbf16>
    %c48_58 = arith.constant 48 : index
    %c0_59 = arith.constant 0 : index
    %81 = vector.load %arg2[%c48_58, %c0_59] : memref<72x16xbf16, #tpu.memory_space<vmem>>, vector<8x16xbf16>
    %cst_60 = arith.constant dense<0.000000e+00> : vector<8x16xf32>
    %82 = tpu.matmul %80, %81, %cst_60 {dimension_numbers = #tpu.dot_dimension_numbers<[1], [0], [0], [1], [0, 0, 1, 1], [], []>} : vector<8x8xbf16>, vector<8x16xbf16>, vector<8x16xf32> -> vector<8x16xf32>
    %83 = arith.addf %79, %82 : vector<8x16xf32>
    %84 = vector.extract_strided_slice %54 {offsets = [0, 8], sizes = [8, 8], strides = [1, 1]} : vector<9x32xbf16> to vector<8x8xbf16>
    %c56_61 = arith.constant 56 : index
    %c0_62 = arith.constant 0 : index
    %85 = vector.load %arg2[%c56_61, %c0_62] : memref<72x16xbf16, #tpu.memory_space<vmem>>, vector<8x16xbf16>
    %cst_63 = arith.constant dense<0.000000e+00> : vector<8x16xf32>
    %86 = tpu.matmul %84, %85, %cst_63 {dimension_numbers = #tpu.dot_dimension_numbers<[1], [0], [0], [1], [0, 0, 1, 1], [], []>} : vector<8x8xbf16>, vector<8x16xbf16>, vector<8x16xf32> -> vector<8x16xf32>
    %87 = arith.addf %83, %86 : vector<8x16xf32>
    %88 = vector.extract_strided_slice %54 {offsets = [1, 0], sizes = [8, 8], strides = [1, 1]} : vector<9x32xbf16> to vector<8x8xbf16>
    %c64_64 = arith.constant 64 : index
    %c0_65 = arith.constant 0 : index
    %89 = vector.load %arg2[%c64_64, %c0_65] : memref<72x16xbf16, #tpu.memory_space<vmem>>, vector<8x16xbf16>
    %cst_66 = arith.constant dense<0.000000e+00> : vector<8x16xf32>
    %90 = tpu.matmul %88, %89, %cst_66 {dimension_numbers = #tpu.dot_dimension_numbers<[1], [0], [0], [1], [0, 0, 1, 1], [], []>} : vector<8x8xbf16>, vector<8x16xbf16>, vector<8x16xf32> -> vector<8x16xf32>
    %91 = arith.addf %87, %90 : vector<8x16xf32>
    %92 = vector.broadcast %0 : vector<1x16xf32> to vector<8x16xf32>
    %93 = arith.addf %91, %92 : vector<8x16xf32>
    %cst_67 = arith.constant 2.500000e-01 : f32
    %94 = vector.broadcast %cst_67 : f32 to vector<8x16xf32>
    %95 = arith.mulf %94, %93 : vector<8x16xf32>
    %96 = arith.maximumf %93, %95 : vector<8x16xf32>
    %97 = arith.truncf %96 : vector<8x16xf32> to vector<8x16xbf16>
    %c0_68 = arith.constant 0 : index
    %c1_69 = arith.constant 1 : index
    %c0_70 = arith.constant 0 : index
    %c0_71 = arith.constant 0 : index
    %98 = vector.load %arg4[%c0_68, %c1_69, %c0_70, %c0_71] : memref<1x8x8x16xbf16, #tpu.memory_space<vmem>>, vector<1x1x8x16xbf16>
    %99 = vector.shape_cast %98 : vector<1x1x8x16xbf16> to vector<8x16xbf16>
    %100 = vector.shape_cast %97 : vector<8x16xbf16> to vector<1x1x8x16xbf16>
    tpu.vector_store %arg4[%c0_68, %c1_69, %c0_70, %c0_71], %100 {strides = array<i32>} : memref<1x8x8x16xbf16, #tpu.memory_space<vmem>>, vector<1x1x8x16xbf16>,
    %c0_72 = arith.constant 0 : index
    %c2_73 = arith.constant 2 : index
    %c0_74 = arith.constant 0 : index
    %c0_75 = arith.constant 0 : index
    %101 = vector.load %arg1[%c0_72, %c2_73, %c0_74, %c0_75] : memref<1x9x9x32xbf16, #tpu.memory_space<vmem>>, vector<1x1x9x32xbf16>
    %102 = vector.shape_cast %101 : vector<1x1x9x32xbf16> to vector<9x32xbf16>
    %c0_76 = arith.constant 0 : index
    %c3 = arith.constant 3 : index
    %c0_77 = arith.constant 0 : index
    %c0_78 = arith.constant 0 : index
    %103 = vector.load %arg1[%c0_76, %c3, %c0_77, %c0_78] : memref<1x9x9x32xbf16, #tpu.memory_space<vmem>>, vector<1x1x9x32xbf16>
    %104 = vector.shape_cast %103 : vector<1x1x9x32xbf16> to vector<9x32xbf16>
    %cst_79 = arith.constant 0.000000e+00 : f32
    %105 = vector.broadcast %cst_79 : f32 to vector<8x16xf32>
    %106 = vector.extract_strided_slice %102 {offsets = [0, 0], sizes = [8, 8], strides = [1, 1]} : vector<9x32xbf16> to vector<8x8xbf16>
    %c0_80 = arith.constant 0 : index
    %c0_81 = arith.constant 0 : index
    %107 = vector.load %arg2[%c0_80, %c0_81] : memref<72x16xbf16, #tpu.memory_space<vmem>>, vector<8x16xbf16>
    %cst_82 = arith.constant dense<0.000000e+00> : vector<8x16xf32>
    %108 = tpu.matmul %106, %107, %cst_82 {dimension_numbers = #tpu.dot_dimension_numbers<[1], [0], [0], [1], [0, 0, 1, 1], [], []>} : vector<8x8xbf16>, vector<8x16xbf16>, vector<8x16xf32> -> vector<8x16xf32>
    %109 = arith.addf %105, %108 : vector<8x16xf32>
    %110 = vector.extract_strided_slice %102 {offsets = [0, 8], sizes = [8, 8], strides = [1, 1]} : vector<9x32xbf16> to vector<8x8xbf16>
    %c8_83 = arith.constant 8 : index
    %c0_84 = arith.constant 0 : index
    %111 = vector.load %arg2[%c8_83, %c0_84] : memref<72x16xbf16, #tpu.memory_space<vmem>>, vector<8x16xbf16>
    %cst_85 = arith.constant dense<0.000000e+00> : vector<8x16xf32>
    %112 = tpu.matmul %110, %111, %cst_85 {dimension_numbers = #tpu.dot_dimension_numbers<[1], [0], [0], [1], [0, 0, 1, 1], [], []>} : vector<8x8xbf16>, vector<8x16xbf16>, vector<8x16xf32> -> vector<8x16xf32>
    %113 = arith.addf %109, %112 : vector<8x16xf32>
    %114 = vector.extract_strided_slice %102 {offsets = [1, 0], sizes = [8, 8], strides = [1, 1]} : vector<9x32xbf16> to vector<8x8xbf16>
    %c16_86 = arith.constant 16 : index
    %c0_87 = arith.constant 0 : index
    %115 = vector.load %arg2[%c16_86, %c0_87] : memref<72x16xbf16, #tpu.memory_space<vmem>>, vector<8x16xbf16>
    %cst_88 = arith.constant dense<0.000000e+00> : vector<8x16xf32>
    %116 = tpu.matmul %114, %115, %cst_88 {dimension_numbers = #tpu.dot_dimension_numbers<[1], [0], [0], [1], [0, 0, 1, 1], [], []>} : vector<8x8xbf16>, vector<8x16xbf16>, vector<8x16xf32> -> vector<8x16xf32>
    %117 = arith.addf %113, %116 : vector<8x16xf32>
    %118 = vector.extract_strided_slice %102 {offsets = [0, 16], sizes = [8, 8], strides = [1, 1]} : vector<9x32xbf16> to vector<8x8xbf16>
    %c24_89 = arith.constant 24 : index
    %c0_90 = arith.constant 0 : index
    %119 = vector.load %arg2[%c24_89, %c0_90] : memref<72x16xbf16, #tpu.memory_space<vmem>>, vector<8x16xbf16>
    %cst_91 = arith.constant dense<0.000000e+00> : vector<8x16xf32>
    %120 = tpu.matmul %118, %119, %cst_91 {dimension_numbers = #tpu.dot_dimension_numbers<[1], [0], [0], [1], [0, 0, 1, 1], [], []>} : vector<8x8xbf16>, vector<8x16xbf16>, vector<8x16xf32> -> vector<8x16xf32>
    %121 = arith.addf %117, %120 : vector<8x16xf32>
    %122 = vector.extract_strided_slice %102 {offsets = [0, 24], sizes = [8, 8], strides = [1, 1]} : vector<9x32xbf16> to vector<8x8xbf16>
    %c32_92 = arith.constant 32 : index
    %c0_93 = arith.constant 0 : index
    %123 = vector.load %arg2[%c32_92, %c0_93] : memref<72x16xbf16, #tpu.memory_space<vmem>>, vector<8x16xbf16>
    %cst_94 = arith.constant dense<0.000000e+00> : vector<8x16xf32>
    %124 = tpu.matmul %122, %123, %cst_94 {dimension_numbers = #tpu.dot_dimension_numbers<[1], [0], [0], [1], [0, 0, 1, 1], [], []>} : vector<8x8xbf16>, vector<8x16xbf16>, vector<8x16xf32> -> vector<8x16xf32>
    %125 = arith.addf %121, %124 : vector<8x16xf32>
    %126 = vector.extract_strided_slice %102 {offsets = [1, 16], sizes = [8, 8], strides = [1, 1]} : vector<9x32xbf16> to vector<8x8xbf16>
    %c40_95 = arith.constant 40 : index
    %c0_96 = arith.constant 0 : index
    %127 = vector.load %arg2[%c40_95, %c0_96] : memref<72x16xbf16, #tpu.memory_space<vmem>>, vector<8x16xbf16>
    %cst_97 = arith.constant dense<0.000000e+00> : vector<8x16xf32>
    %128 = tpu.matmul %126, %127, %cst_97 {dimension_numbers = #tpu.dot_dimension_numbers<[1], [0], [0], [1], [0, 0, 1, 1], [], []>} : vector<8x8xbf16>, vector<8x16xbf16>, vector<8x16xf32> -> vector<8x16xf32>
    %129 = arith.addf %125, %128 : vector<8x16xf32>
    %130 = vector.extract_strided_slice %104 {offsets = [0, 0], sizes = [8, 8], strides = [1, 1]} : vector<9x32xbf16> to vector<8x8xbf16>
    %c48_98 = arith.constant 48 : index
    %c0_99 = arith.constant 0 : index
    %131 = vector.load %arg2[%c48_98, %c0_99] : memref<72x16xbf16, #tpu.memory_space<vmem>>, vector<8x16xbf16>
    %cst_100 = arith.constant dense<0.000000e+00> : vector<8x16xf32>
    %132 = tpu.matmul %130, %131, %cst_100 {dimension_numbers = #tpu.dot_dimension_numbers<[1], [0], [0], [1], [0, 0, 1, 1], [], []>} : vector<8x8xbf16>, vector<8x16xbf16>, vector<8x16xf32> -> vector<8x16xf32>
    %133 = arith.addf %129, %132 : vector<8x16xf32>
    %134 = vector.extract_strided_slice %104 {offsets = [0, 8], sizes = [8, 8], strides = [1, 1]} : vector<9x32xbf16> to vector<8x8xbf16>
    %c56_101 = arith.constant 56 : index
    %c0_102 = arith.constant 0 : index
    %135 = vector.load %arg2[%c56_101, %c0_102] : memref<72x16xbf16, #tpu.memory_space<vmem>>, vector<8x16xbf16>
    %cst_103 = arith.constant dense<0.000000e+00> : vector<8x16xf32>
    %136 = tpu.matmul %134, %135, %cst_103 {dimension_numbers = #tpu.dot_dimension_numbers<[1], [0], [0], [1], [0, 0, 1, 1], [], []>} : vector<8x8xbf16>, vector<8x16xbf16>, vector<8x16xf32> -> vector<8x16xf32>
    %137 = arith.addf %133, %136 : vector<8x16xf32>
    %138 = vector.extract_strided_slice %104 {offsets = [1, 0], sizes = [8, 8], strides = [1, 1]} : vector<9x32xbf16> to vector<8x8xbf16>
    %c64_104 = arith.constant 64 : index
    %c0_105 = arith.constant 0 : index
    %139 = vector.load %arg2[%c64_104, %c0_105] : memref<72x16xbf16, #tpu.memory_space<vmem>>, vector<8x16xbf16>
    %cst_106 = arith.constant dense<0.000000e+00> : vector<8x16xf32>
    %140 = tpu.matmul %138, %139, %cst_106 {dimension_numbers = #tpu.dot_dimension_numbers<[1], [0], [0], [1], [0, 0, 1, 1], [], []>} : vector<8x8xbf16>, vector<8x16xbf16>, vector<8x16xf32> -> vector<8x16xf32>
    %141 = arith.addf %137, %140 : vector<8x16xf32>
    %142 = vector.broadcast %0 : vector<1x16xf32> to vector<8x16xf32>
    %143 = arith.addf %141, %142 : vector<8x16xf32>
    %cst_107 = arith.constant 2.500000e-01 : f32
    %144 = vector.broadcast %cst_107 : f32 to vector<8x16xf32>
    %145 = arith.mulf %144, %143 : vector<8x16xf32>
    %146 = arith.maximumf %143, %145 : vector<8x16xf32>
    %147 = arith.truncf %146 : vector<8x16xf32> to vector<8x16xbf16>
    %c0_108 = arith.constant 0 : index
    %c2_109 = arith.constant 2 : index
    %c0_110 = arith.constant 0 : index
    %c0_111 = arith.constant 0 : index
    %148 = vector.load %arg4[%c0_108, %c2_109, %c0_110, %c0_111] : memref<1x8x8x16xbf16, #tpu.memory_space<vmem>>, vector<1x1x8x16xbf16>
    %149 = vector.shape_cast %148 : vector<1x1x8x16xbf16> to vector<8x16xbf16>
    %150 = vector.shape_cast %147 : vector<8x16xbf16> to vector<1x1x8x16xbf16>
    tpu.vector_store %arg4[%c0_108, %c2_109, %c0_110, %c0_111], %150 {strides = array<i32>} : memref<1x8x8x16xbf16, #tpu.memory_space<vmem>>, vector<1x1x8x16xbf16>,
    %c0_112 = arith.constant 0 : index
    %c3_113 = arith.constant 3 : index
    %c0_114 = arith.constant 0 : index
    %c0_115 = arith.constant 0 : index
    %151 = vector.load %arg1[%c0_112, %c3_113, %c0_114, %c0_115] : memref<1x9x9x32xbf16, #tpu.memory_space<vmem>>, vector<1x1x9x32xbf16>
    %152 = vector.shape_cast %151 : vector<1x1x9x32xbf16> to vector<9x32xbf16>
    %c0_116 = arith.constant 0 : index
    %c4 = arith.constant 4 : index
    %c0_117 = arith.constant 0 : index
    %c0_118 = arith.constant 0 : index
    %153 = vector.load %arg1[%c0_116, %c4, %c0_117, %c0_118] : memref<1x9x9x32xbf16, #tpu.memory_space<vmem>>, vector<1x1x9x32xbf16>
    %154 = vector.shape_cast %153 : vector<1x1x9x32xbf16> to vector<9x32xbf16>
    %cst_119 = arith.constant 0.000000e+00 : f32
    %155 = vector.broadcast %cst_119 : f32 to vector<8x16xf32>
    %156 = vector.extract_strided_slice %152 {offsets = [0, 0], sizes = [8, 8], strides = [1, 1]} : vector<9x32xbf16> to vector<8x8xbf16>
    %c0_120 = arith.constant 0 : index
    %c0_121 = arith.constant 0 : index
    %157 = vector.load %arg2[%c0_120, %c0_121] : memref<72x16xbf16, #tpu.memory_space<vmem>>, vector<8x16xbf16>
    %cst_122 = arith.constant dense<0.000000e+00> : vector<8x16xf32>
    %158 = tpu.matmul %156, %157, %cst_122 {dimension_numbers = #tpu.dot_dimension_numbers<[1], [0], [0], [1], [0, 0, 1, 1], [], []>} : vector<8x8xbf16>, vector<8x16xbf16>, vector<8x16xf32> -> vector<8x16xf32>
    %159 = arith.addf %155, %158 : vector<8x16xf32>
    %160 = vector.extract_strided_slice %152 {offsets = [0, 8], sizes = [8, 8], strides = [1, 1]} : vector<9x32xbf16> to vector<8x8xbf16>
    %c8_123 = arith.constant 8 : index
    %c0_124 = arith.constant 0 : index
    %161 = vector.load %arg2[%c8_123, %c0_124] : memref<72x16xbf16, #tpu.memory_space<vmem>>, vector<8x16xbf16>
    %cst_125 = arith.constant dense<0.000000e+00> : vector<8x16xf32>
    %162 = tpu.matmul %160, %161, %cst_125 {dimension_numbers = #tpu.dot_dimension_numbers<[1], [0], [0], [1], [0, 0, 1, 1], [], []>} : vector<8x8xbf16>, vector<8x16xbf16>, vector<8x16xf32> -> vector<8x16xf32>
    %163 = arith.addf %159, %162 : vector<8x16xf32>
    %164 = vector.extract_strided_slice %152 {offsets = [1, 0], sizes = [8, 8], strides = [1, 1]} : vector<9x32xbf16> to vector<8x8xbf16>
    %c16_126 = arith.constant 16 : index
    %c0_127 = arith.constant 0 : index
    %165 = vector.load %arg2[%c16_126, %c0_127] : memref<72x16xbf16, #tpu.memory_space<vmem>>, vector<8x16xbf16>
    %cst_128 = arith.constant dense<0.000000e+00> : vector<8x16xf32>
    %166 = tpu.matmul %164, %165, %cst_128 {dimension_numbers = #tpu.dot_dimension_numbers<[1], [0], [0], [1], [0, 0, 1, 1], [], []>} : vector<8x8xbf16>, vector<8x16xbf16>, vector<8x16xf32> -> vector<8x16xf32>
    %167 = arith.addf %163, %166 : vector<8x16xf32>
    %168 = vector.extract_strided_slice %152 {offsets = [0, 16], sizes = [8, 8], strides = [1, 1]} : vector<9x32xbf16> to vector<8x8xbf16>
    %c24_129 = arith.constant 24 : index
    %c0_130 = arith.constant 0 : index
    %169 = vector.load %arg2[%c24_129, %c0_130] : memref<72x16xbf16, #tpu.memory_space<vmem>>, vector<8x16xbf16>
    %cst_131 = arith.constant dense<0.000000e+00> : vector<8x16xf32>
    %170 = tpu.matmul %168, %169, %cst_131 {dimension_numbers = #tpu.dot_dimension_numbers<[1], [0], [0], [1], [0, 0, 1, 1], [], []>} : vector<8x8xbf16>, vector<8x16xbf16>, vector<8x16xf32> -> vector<8x16xf32>
    %171 = arith.addf %167, %170 : vector<8x16xf32>
    %172 = vector.extract_strided_slice %152 {offsets = [0, 24], sizes = [8, 8], strides = [1, 1]} : vector<9x32xbf16> to vector<8x8xbf16>
    %c32_132 = arith.constant 32 : index
    %c0_133 = arith.constant 0 : index
    %173 = vector.load %arg2[%c32_132, %c0_133] : memref<72x16xbf16, #tpu.memory_space<vmem>>, vector<8x16xbf16>
    %cst_134 = arith.constant dense<0.000000e+00> : vector<8x16xf32>
    %174 = tpu.matmul %172, %173, %cst_134 {dimension_numbers = #tpu.dot_dimension_numbers<[1], [0], [0], [1], [0, 0, 1, 1], [], []>} : vector<8x8xbf16>, vector<8x16xbf16>, vector<8x16xf32> -> vector<8x16xf32>
    %175 = arith.addf %171, %174 : vector<8x16xf32>
    %176 = vector.extract_strided_slice %152 {offsets = [1, 16], sizes = [8, 8], strides = [1, 1]} : vector<9x32xbf16> to vector<8x8xbf16>
    %c40_135 = arith.constant 40 : index
    %c0_136 = arith.constant 0 : index
    %177 = vector.load %arg2[%c40_135, %c0_136] : memref<72x16xbf16, #tpu.memory_space<vmem>>, vector<8x16xbf16>
    %cst_137 = arith.constant dense<0.000000e+00> : vector<8x16xf32>
    %178 = tpu.matmul %176, %177, %cst_137 {dimension_numbers = #tpu.dot_dimension_numbers<[1], [0], [0], [1], [0, 0, 1, 1], [], []>} : vector<8x8xbf16>, vector<8x16xbf16>, vector<8x16xf32> -> vector<8x16xf32>
    %179 = arith.addf %175, %178 : vector<8x16xf32>
    %180 = vector.extract_strided_slice %154 {offsets = [0, 0], sizes = [8, 8], strides = [1, 1]} : vector<9x32xbf16> to vector<8x8xbf16>
    %c48_138 = arith.constant 48 : index
    %c0_139 = arith.constant 0 : index
    %181 = vector.load %arg2[%c48_138, %c0_139] : memref<72x16xbf16, #tpu.memory_space<vmem>>, vector<8x16xbf16>
    %cst_140 = arith.constant dense<0.000000e+00> : vector<8x16xf32>
    %182 = tpu.matmul %180, %181, %cst_140 {dimension_numbers = #tpu.dot_dimension_numbers<[1], [0], [0], [1], [0, 0, 1, 1], [], []>} : vector<8x8xbf16>, vector<8x16xbf16>, vector<8x16xf32> -> vector<8x16xf32>
    %183 = arith.addf %179, %182 : vector<8x16xf32>
    %184 = vector.extract_strided_slice %154 {offsets = [0, 8], sizes = [8, 8], strides = [1, 1]} : vector<9x32xbf16> to vector<8x8xbf16>
    %c56_141 = arith.constant 56 : index
    %c0_142 = arith.constant 0 : index
    %185 = vector.load %arg2[%c56_141, %c0_142] : memref<72x16xbf16, #tpu.memory_space<vmem>>, vector<8x16xbf16>
    %cst_143 = arith.constant dense<0.000000e+00> : vector<8x16xf32>
    %186 = tpu.matmul %184, %185, %cst_143 {dimension_numbers = #tpu.dot_dimension_numbers<[1], [0], [0], [1], [0, 0, 1, 1], [], []>} : vector<8x8xbf16>, vector<8x16xbf16>, vector<8x16xf32> -> vector<8x16xf32>
    %187 = arith.addf %183, %186 : vector<8x16xf32>
    %188 = vector.extract_strided_slice %154 {offsets = [1, 0], sizes = [8, 8], strides = [1, 1]} : vector<9x32xbf16> to vector<8x8xbf16>
    %c64_144 = arith.constant 64 : index
    %c0_145 = arith.constant 0 : index
    %189 = vector.load %arg2[%c64_144, %c0_145] : memref<72x16xbf16, #tpu.memory_space<vmem>>, vector<8x16xbf16>
    %cst_146 = arith.constant dense<0.000000e+00> : vector<8x16xf32>
    %190 = tpu.matmul %188, %189, %cst_146 {dimension_numbers = #tpu.dot_dimension_numbers<[1], [0], [0], [1], [0, 0, 1, 1], [], []>} : vector<8x8xbf16>, vector<8x16xbf16>, vector<8x16xf32> -> vector<8x16xf32>
    %191 = arith.addf %187, %190 : vector<8x16xf32>
    %192 = vector.broadcast %0 : vector<1x16xf32> to vector<8x16xf32>
    %193 = arith.addf %191, %192 : vector<8x16xf32>
    %cst_147 = arith.constant 2.500000e-01 : f32
    %194 = vector.broadcast %cst_147 : f32 to vector<8x16xf32>
    %195 = arith.mulf %194, %193 : vector<8x16xf32>
    %196 = arith.maximumf %193, %195 : vector<8x16xf32>
    %197 = arith.truncf %196 : vector<8x16xf32> to vector<8x16xbf16>
    %c0_148 = arith.constant 0 : index
    %c3_149 = arith.constant 3 : index
    %c0_150 = arith.constant 0 : index
    %c0_151 = arith.constant 0 : index
    %198 = vector.load %arg4[%c0_148, %c3_149, %c0_150, %c0_151] : memref<1x8x8x16xbf16, #tpu.memory_space<vmem>>, vector<1x1x8x16xbf16>
    %199 = vector.shape_cast %198 : vector<1x1x8x16xbf16> to vector<8x16xbf16>
    %200 = vector.shape_cast %197 : vector<8x16xbf16> to vector<1x1x8x16xbf16>
    tpu.vector_store %arg4[%c0_148, %c3_149, %c0_150, %c0_151], %200 {strides = array<i32>} : memref<1x8x8x16xbf16, #tpu.memory_space<vmem>>, vector<1x1x8x16xbf16>,
    %c0_152 = arith.constant 0 : index
    %c4_153 = arith.constant 4 : index
    %c0_154 = arith.constant 0 : index
    %c0_155 = arith.constant 0 : index
    %201 = vector.load %arg1[%c0_152, %c4_153, %c0_154, %c0_155] : memref<1x9x9x32xbf16, #tpu.memory_space<vmem>>, vector<1x1x9x32xbf16>
    %202 = vector.shape_cast %201 : vector<1x1x9x32xbf16> to vector<9x32xbf16>
    %c0_156 = arith.constant 0 : index
    %c5 = arith.constant 5 : index
    %c0_157 = arith.constant 0 : index
    %c0_158 = arith.constant 0 : index
    %203 = vector.load %arg1[%c0_156, %c5, %c0_157, %c0_158] : memref<1x9x9x32xbf16, #tpu.memory_space<vmem>>, vector<1x1x9x32xbf16>
    %204 = vector.shape_cast %203 : vector<1x1x9x32xbf16> to vector<9x32xbf16>
    %cst_159 = arith.constant 0.000000e+00 : f32
    %205 = vector.broadcast %cst_159 : f32 to vector<8x16xf32>
    %206 = vector.extract_strided_slice %202 {offsets = [0, 0], sizes = [8, 8], strides = [1, 1]} : vector<9x32xbf16> to vector<8x8xbf16>
    %c0_160 = arith.constant 0 : index
    %c0_161 = arith.constant 0 : index
    %207 = vector.load %arg2[%c0_160, %c0_161] : memref<72x16xbf16, #tpu.memory_space<vmem>>, vector<8x16xbf16>
    %cst_162 = arith.constant dense<0.000000e+00> : vector<8x16xf32>
    %208 = tpu.matmul %206, %207, %cst_162 {dimension_numbers = #tpu.dot_dimension_numbers<[1], [0], [0], [1], [0, 0, 1, 1], [], []>} : vector<8x8xbf16>, vector<8x16xbf16>, vector<8x16xf32> -> vector<8x16xf32>
    %209 = arith.addf %205, %208 : vector<8x16xf32>
    %210 = vector.extract_strided_slice %202 {offsets = [0, 8], sizes = [8, 8], strides = [1, 1]} : vector<9x32xbf16> to vector<8x8xbf16>
    %c8_163 = arith.constant 8 : index
    %c0_164 = arith.constant 0 : index
    %211 = vector.load %arg2[%c8_163, %c0_164] : memref<72x16xbf16, #tpu.memory_space<vmem>>, vector<8x16xbf16>
    %cst_165 = arith.constant dense<0.000000e+00> : vector<8x16xf32>
    %212 = tpu.matmul %210, %211, %cst_165 {dimension_numbers = #tpu.dot_dimension_numbers<[1], [0], [0], [1], [0, 0, 1, 1], [], []>} : vector<8x8xbf16>, vector<8x16xbf16>, vector<8x16xf32> -> vector<8x16xf32>
    %213 = arith.addf %209, %212 : vector<8x16xf32>
    %214 = vector.extract_strided_slice %202 {offsets = [1, 0], sizes = [8, 8], strides = [1, 1]} : vector<9x32xbf16> to vector<8x8xbf16>
    %c16_166 = arith.constant 16 : index
    %c0_167 = arith.constant 0 : index
    %215 = vector.load %arg2[%c16_166, %c0_167] : memref<72x16xbf16, #tpu.memory_space<vmem>>, vector<8x16xbf16>
    %cst_168 = arith.constant dense<0.000000e+00> : vector<8x16xf32>
    %216 = tpu.matmul %214, %215, %cst_168 {dimension_numbers = #tpu.dot_dimension_numbers<[1], [0], [0], [1], [0, 0, 1, 1], [], []>} : vector<8x8xbf16>, vector<8x16xbf16>, vector<8x16xf32> -> vector<8x16xf32>
    %217 = arith.addf %213, %216 : vector<8x16xf32>
    %218 = vector.extract_strided_slice %202 {offsets = [0, 16], sizes = [8, 8], strides = [1, 1]} : vector<9x32xbf16> to vector<8x8xbf16>
    %c24_169 = arith.constant 24 : index
    %c0_170 = arith.constant 0 : index
    %219 = vector.load %arg2[%c24_169, %c0_170] : memref<72x16xbf16, #tpu.memory_space<vmem>>, vector<8x16xbf16>
    %cst_171 = arith.constant dense<0.000000e+00> : vector<8x16xf32>
    %220 = tpu.matmul %218, %219, %cst_171 {dimension_numbers = #tpu.dot_dimension_numbers<[1], [0], [0], [1], [0, 0, 1, 1], [], []>} : vector<8x8xbf16>, vector<8x16xbf16>, vector<8x16xf32> -> vector<8x16xf32>
    %221 = arith.addf %217, %220 : vector<8x16xf32>
    %222 = vector.extract_strided_slice %202 {offsets = [0, 24], sizes = [8, 8], strides = [1, 1]} : vector<9x32xbf16> to vector<8x8xbf16>
    %c32_172 = arith.constant 32 : index
    %c0_173 = arith.constant 0 : index
    %223 = vector.load %arg2[%c32_172, %c0_173] : memref<72x16xbf16, #tpu.memory_space<vmem>>, vector<8x16xbf16>
    %cst_174 = arith.constant dense<0.000000e+00> : vector<8x16xf32>
    %224 = tpu.matmul %222, %223, %cst_174 {dimension_numbers = #tpu.dot_dimension_numbers<[1], [0], [0], [1], [0, 0, 1, 1], [], []>} : vector<8x8xbf16>, vector<8x16xbf16>, vector<8x16xf32> -> vector<8x16xf32>
    %225 = arith.addf %221, %224 : vector<8x16xf32>
    %226 = vector.extract_strided_slice %202 {offsets = [1, 16], sizes = [8, 8], strides = [1, 1]} : vector<9x32xbf16> to vector<8x8xbf16>
    %c40_175 = arith.constant 40 : index
    %c0_176 = arith.constant 0 : index
    %227 = vector.load %arg2[%c40_175, %c0_176] : memref<72x16xbf16, #tpu.memory_space<vmem>>, vector<8x16xbf16>
    %cst_177 = arith.constant dense<0.000000e+00> : vector<8x16xf32>
    %228 = tpu.matmul %226, %227, %cst_177 {dimension_numbers = #tpu.dot_dimension_numbers<[1], [0], [0], [1], [0, 0, 1, 1], [], []>} : vector<8x8xbf16>, vector<8x16xbf16>, vector<8x16xf32> -> vector<8x16xf32>
    %229 = arith.addf %225, %228 : vector<8x16xf32>
    %230 = vector.extract_strided_slice %204 {offsets = [0, 0], sizes = [8, 8], strides = [1, 1]} : vector<9x32xbf16> to vector<8x8xbf16>
    %c48_178 = arith.constant 48 : index
    %c0_179 = arith.constant 0 : index
    %231 = vector.load %arg2[%c48_178, %c0_179] : memref<72x16xbf16, #tpu.memory_space<vmem>>, vector<8x16xbf16>
    %cst_180 = arith.constant dense<0.000000e+00> : vector<8x16xf32>
    %232 = tpu.matmul %230, %231, %cst_180 {dimension_numbers = #tpu.dot_dimension_numbers<[1], [0], [0], [1], [0, 0, 1, 1], [], []>} : vector<8x8xbf16>, vector<8x16xbf16>, vector<8x16xf32> -> vector<8x16xf32>
    %233 = arith.addf %229, %232 : vector<8x16xf32>
    %234 = vector.extract_strided_slice %204 {offsets = [0, 8], sizes = [8, 8], strides = [1, 1]} : vector<9x32xbf16> to vector<8x8xbf16>
    %c56_181 = arith.constant 56 : index
    %c0_182 = arith.constant 0 : index
    %235 = vector.load %arg2[%c56_181, %c0_182] : memref<72x16xbf16, #tpu.memory_space<vmem>>, vector<8x16xbf16>
    %cst_183 = arith.constant dense<0.000000e+00> : vector<8x16xf32>
    %236 = tpu.matmul %234, %235, %cst_183 {dimension_numbers = #tpu.dot_dimension_numbers<[1], [0], [0], [1], [0, 0, 1, 1], [], []>} : vector<8x8xbf16>, vector<8x16xbf16>, vector<8x16xf32> -> vector<8x16xf32>
    %237 = arith.addf %233, %236 : vector<8x16xf32>
    %238 = vector.extract_strided_slice %204 {offsets = [1, 0], sizes = [8, 8], strides = [1, 1]} : vector<9x32xbf16> to vector<8x8xbf16>
    %c64_184 = arith.constant 64 : index
    %c0_185 = arith.constant 0 : index
    %239 = vector.load %arg2[%c64_184, %c0_185] : memref<72x16xbf16, #tpu.memory_space<vmem>>, vector<8x16xbf16>
    %cst_186 = arith.constant dense<0.000000e+00> : vector<8x16xf32>
    %240 = tpu.matmul %238, %239, %cst_186 {dimension_numbers = #tpu.dot_dimension_numbers<[1], [0], [0], [1], [0, 0, 1, 1], [], []>} : vector<8x8xbf16>, vector<8x16xbf16>, vector<8x16xf32> -> vector<8x16xf32>
    %241 = arith.addf %237, %240 : vector<8x16xf32>
    %242 = vector.broadcast %0 : vector<1x16xf32> to vector<8x16xf32>
    %243 = arith.addf %241, %242 : vector<8x16xf32>
    %cst_187 = arith.constant 2.500000e-01 : f32
    %244 = vector.broadcast %cst_187 : f32 to vector<8x16xf32>
    %245 = arith.mulf %244, %243 : vector<8x16xf32>
    %246 = arith.maximumf %243, %245 : vector<8x16xf32>
    %247 = arith.truncf %246 : vector<8x16xf32> to vector<8x16xbf16>
    %c0_188 = arith.constant 0 : index
    %c4_189 = arith.constant 4 : index
    %c0_190 = arith.constant 0 : index
    %c0_191 = arith.constant 0 : index
    %248 = vector.load %arg4[%c0_188, %c4_189, %c0_190, %c0_191] : memref<1x8x8x16xbf16, #tpu.memory_space<vmem>>, vector<1x1x8x16xbf16>
    %249 = vector.shape_cast %248 : vector<1x1x8x16xbf16> to vector<8x16xbf16>
    %250 = vector.shape_cast %247 : vector<8x16xbf16> to vector<1x1x8x16xbf16>
    tpu.vector_store %arg4[%c0_188, %c4_189, %c0_190, %c0_191], %250 {strides = array<i32>} : memref<1x8x8x16xbf16, #tpu.memory_space<vmem>>, vector<1x1x8x16xbf16>,
    %c0_192 = arith.constant 0 : index
    %c5_193 = arith.constant 5 : index
    %c0_194 = arith.constant 0 : index
    %c0_195 = arith.constant 0 : index
    %251 = vector.load %arg1[%c0_192, %c5_193, %c0_194, %c0_195] : memref<1x9x9x32xbf16, #tpu.memory_space<vmem>>, vector<1x1x9x32xbf16>
    %252 = vector.shape_cast %251 : vector<1x1x9x32xbf16> to vector<9x32xbf16>
    %c0_196 = arith.constant 0 : index
    %c6 = arith.constant 6 : index
    %c0_197 = arith.constant 0 : index
    %c0_198 = arith.constant 0 : index
    %253 = vector.load %arg1[%c0_196, %c6, %c0_197, %c0_198] : memref<1x9x9x32xbf16, #tpu.memory_space<vmem>>, vector<1x1x9x32xbf16>
    %254 = vector.shape_cast %253 : vector<1x1x9x32xbf16> to vector<9x32xbf16>
    %cst_199 = arith.constant 0.000000e+00 : f32
    %255 = vector.broadcast %cst_199 : f32 to vector<8x16xf32>
    %256 = vector.extract_strided_slice %252 {offsets = [0, 0], sizes = [8, 8], strides = [1, 1]} : vector<9x32xbf16> to vector<8x8xbf16>
    %c0_200 = arith.constant 0 : index
    %c0_201 = arith.constant 0 : index
    %257 = vector.load %arg2[%c0_200, %c0_201] : memref<72x16xbf16, #tpu.memory_space<vmem>>, vector<8x16xbf16>
    %cst_202 = arith.constant dense<0.000000e+00> : vector<8x16xf32>
    %258 = tpu.matmul %256, %257, %cst_202 {dimension_numbers = #tpu.dot_dimension_numbers<[1], [0], [0], [1], [0, 0, 1, 1], [], []>} : vector<8x8xbf16>, vector<8x16xbf16>, vector<8x16xf32> -> vector<8x16xf32>
    %259 = arith.addf %255, %258 : vector<8x16xf32>
    %260 = vector.extract_strided_slice %252 {offsets = [0, 8], sizes = [8, 8], strides = [1, 1]} : vector<9x32xbf16> to vector<8x8xbf16>
    %c8_203 = arith.constant 8 : index
    %c0_204 = arith.constant 0 : index
    %261 = vector.load %arg2[%c8_203, %c0_204] : memref<72x16xbf16, #tpu.memory_space<vmem>>, vector<8x16xbf16>
    %cst_205 = arith.constant dense<0.000000e+00> : vector<8x16xf32>
    %262 = tpu.matmul %260, %261, %cst_205 {dimension_numbers = #tpu.dot_dimension_numbers<[1], [0], [0], [1], [0, 0, 1, 1], [], []>} : vector<8x8xbf16>, vector<8x16xbf16>, vector<8x16xf32> -> vector<8x16xf32>
    %263 = arith.addf %259, %262 : vector<8x16xf32>
    %264 = vector.extract_strided_slice %252 {offsets = [1, 0], sizes = [8, 8], strides = [1, 1]} : vector<9x32xbf16> to vector<8x8xbf16>
    %c16_206 = arith.constant 16 : index
    %c0_207 = arith.constant 0 : index
    %265 = vector.load %arg2[%c16_206, %c0_207] : memref<72x16xbf16, #tpu.memory_space<vmem>>, vector<8x16xbf16>
    %cst_208 = arith.constant dense<0.000000e+00> : vector<8x16xf32>
    %266 = tpu.matmul %264, %265, %cst_208 {dimension_numbers = #tpu.dot_dimension_numbers<[1], [0], [0], [1], [0, 0, 1, 1], [], []>} : vector<8x8xbf16>, vector<8x16xbf16>, vector<8x16xf32> -> vector<8x16xf32>
    %267 = arith.addf %263, %266 : vector<8x16xf32>
    %268 = vector.extract_strided_slice %252 {offsets = [0, 16], sizes = [8, 8], strides = [1, 1]} : vector<9x32xbf16> to vector<8x8xbf16>
    %c24_209 = arith.constant 24 : index
    %c0_210 = arith.constant 0 : index
    %269 = vector.load %arg2[%c24_209, %c0_210] : memref<72x16xbf16, #tpu.memory_space<vmem>>, vector<8x16xbf16>
    %cst_211 = arith.constant dense<0.000000e+00> : vector<8x16xf32>
    %270 = tpu.matmul %268, %269, %cst_211 {dimension_numbers = #tpu.dot_dimension_numbers<[1], [0], [0], [1], [0, 0, 1, 1], [], []>} : vector<8x8xbf16>, vector<8x16xbf16>, vector<8x16xf32> -> vector<8x16xf32>
    %271 = arith.addf %267, %270 : vector<8x16xf32>
    %272 = vector.extract_strided_slice %252 {offsets = [0, 24], sizes = [8, 8], strides = [1, 1]} : vector<9x32xbf16> to vector<8x8xbf16>
    %c32_212 = arith.constant 32 : index
    %c0_213 = arith.constant 0 : index
    %273 = vector.load %arg2[%c32_212, %c0_213] : memref<72x16xbf16, #tpu.memory_space<vmem>>, vector<8x16xbf16>
    %cst_214 = arith.constant dense<0.000000e+00> : vector<8x16xf32>
    %274 = tpu.matmul %272, %273, %cst_214 {dimension_numbers = #tpu.dot_dimension_numbers<[1], [0], [0], [1], [0, 0, 1, 1], [], []>} : vector<8x8xbf16>, vector<8x16xbf16>, vector<8x16xf32> -> vector<8x16xf32>
    %275 = arith.addf %271, %274 : vector<8x16xf32>
    %276 = vector.extract_strided_slice %252 {offsets = [1, 16], sizes = [8, 8], strides = [1, 1]} : vector<9x32xbf16> to vector<8x8xbf16>
    %c40_215 = arith.constant 40 : index
    %c0_216 = arith.constant 0 : index
    %277 = vector.load %arg2[%c40_215, %c0_216] : memref<72x16xbf16, #tpu.memory_space<vmem>>, vector<8x16xbf16>
    %cst_217 = arith.constant dense<0.000000e+00> : vector<8x16xf32>
    %278 = tpu.matmul %276, %277, %cst_217 {dimension_numbers = #tpu.dot_dimension_numbers<[1], [0], [0], [1], [0, 0, 1, 1], [], []>} : vector<8x8xbf16>, vector<8x16xbf16>, vector<8x16xf32> -> vector<8x16xf32>
    %279 = arith.addf %275, %278 : vector<8x16xf32>
    %280 = vector.extract_strided_slice %254 {offsets = [0, 0], sizes = [8, 8], strides = [1, 1]} : vector<9x32xbf16> to vector<8x8xbf16>
    %c48_218 = arith.constant 48 : index
    %c0_219 = arith.constant 0 : index
    %281 = vector.load %arg2[%c48_218, %c0_219] : memref<72x16xbf16, #tpu.memory_space<vmem>>, vector<8x16xbf16>
    %cst_220 = arith.constant dense<0.000000e+00> : vector<8x16xf32>
    %282 = tpu.matmul %280, %281, %cst_220 {dimension_numbers = #tpu.dot_dimension_numbers<[1], [0], [0], [1], [0, 0, 1, 1], [], []>} : vector<8x8xbf16>, vector<8x16xbf16>, vector<8x16xf32> -> vector<8x16xf32>
    %283 = arith.addf %279, %282 : vector<8x16xf32>
    %284 = vector.extract_strided_slice %254 {offsets = [0, 8], sizes = [8, 8], strides = [1, 1]} : vector<9x32xbf16> to vector<8x8xbf16>
    %c56_221 = arith.constant 56 : index
    %c0_222 = arith.constant 0 : index
    %285 = vector.load %arg2[%c56_221, %c0_222] : memref<72x16xbf16, #tpu.memory_space<vmem>>, vector<8x16xbf16>
    %cst_223 = arith.constant dense<0.000000e+00> : vector<8x16xf32>
    %286 = tpu.matmul %284, %285, %cst_223 {dimension_numbers = #tpu.dot_dimension_numbers<[1], [0], [0], [1], [0, 0, 1, 1], [], []>} : vector<8x8xbf16>, vector<8x16xbf16>, vector<8x16xf32> -> vector<8x16xf32>
    %287 = arith.addf %283, %286 : vector<8x16xf32>
    %288 = vector.extract_strided_slice %254 {offsets = [1, 0], sizes = [8, 8], strides = [1, 1]} : vector<9x32xbf16> to vector<8x8xbf16>
    %c64_224 = arith.constant 64 : index
    %c0_225 = arith.constant 0 : index
    %289 = vector.load %arg2[%c64_224, %c0_225] : memref<72x16xbf16, #tpu.memory_space<vmem>>, vector<8x16xbf16>
    %cst_226 = arith.constant dense<0.000000e+00> : vector<8x16xf32>
    %290 = tpu.matmul %288, %289, %cst_226 {dimension_numbers = #tpu.dot_dimension_numbers<[1], [0], [0], [1], [0, 0, 1, 1], [], []>} : vector<8x8xbf16>, vector<8x16xbf16>, vector<8x16xf32> -> vector<8x16xf32>
    %291 = arith.addf %287, %290 : vector<8x16xf32>
    %292 = vector.broadcast %0 : vector<1x16xf32> to vector<8x16xf32>
    %293 = arith.addf %291, %292 : vector<8x16xf32>
    %cst_227 = arith.constant 2.500000e-01 : f32
    %294 = vector.broadcast %cst_227 : f32 to vector<8x16xf32>
    %295 = arith.mulf %294, %293 : vector<8x16xf32>
    %296 = arith.maximumf %293, %295 : vector<8x16xf32>
    %297 = arith.truncf %296 : vector<8x16xf32> to vector<8x16xbf16>
    %c0_228 = arith.constant 0 : index
    %c5_229 = arith.constant 5 : index
    %c0_230 = arith.constant 0 : index
    %c0_231 = arith.constant 0 : index
    %298 = vector.load %arg4[%c0_228, %c5_229, %c0_230, %c0_231] : memref<1x8x8x16xbf16, #tpu.memory_space<vmem>>, vector<1x1x8x16xbf16>
    %299 = vector.shape_cast %298 : vector<1x1x8x16xbf16> to vector<8x16xbf16>
    %300 = vector.shape_cast %297 : vector<8x16xbf16> to vector<1x1x8x16xbf16>
    tpu.vector_store %arg4[%c0_228, %c5_229, %c0_230, %c0_231], %300 {strides = array<i32>} : memref<1x8x8x16xbf16, #tpu.memory_space<vmem>>, vector<1x1x8x16xbf16>,
    %c0_232 = arith.constant 0 : index
    %c6_233 = arith.constant 6 : index
    %c0_234 = arith.constant 0 : index
    %c0_235 = arith.constant 0 : index
    %301 = vector.load %arg1[%c0_232, %c6_233, %c0_234, %c0_235] : memref<1x9x9x32xbf16, #tpu.memory_space<vmem>>, vector<1x1x9x32xbf16>
    %302 = vector.shape_cast %301 : vector<1x1x9x32xbf16> to vector<9x32xbf16>
    %c0_236 = arith.constant 0 : index
    %c7 = arith.constant 7 : index
    %c0_237 = arith.constant 0 : index
    %c0_238 = arith.constant 0 : index
    %303 = vector.load %arg1[%c0_236, %c7, %c0_237, %c0_238] : memref<1x9x9x32xbf16, #tpu.memory_space<vmem>>, vector<1x1x9x32xbf16>
    %304 = vector.shape_cast %303 : vector<1x1x9x32xbf16> to vector<9x32xbf16>
    %cst_239 = arith.constant 0.000000e+00 : f32
    %305 = vector.broadcast %cst_239 : f32 to vector<8x16xf32>
    %306 = vector.extract_strided_slice %302 {offsets = [0, 0], sizes = [8, 8], strides = [1, 1]} : vector<9x32xbf16> to vector<8x8xbf16>
    %c0_240 = arith.constant 0 : index
    %c0_241 = arith.constant 0 : index
    %307 = vector.load %arg2[%c0_240, %c0_241] : memref<72x16xbf16, #tpu.memory_space<vmem>>, vector<8x16xbf16>
    %cst_242 = arith.constant dense<0.000000e+00> : vector<8x16xf32>
    %308 = tpu.matmul %306, %307, %cst_242 {dimension_numbers = #tpu.dot_dimension_numbers<[1], [0], [0], [1], [0, 0, 1, 1], [], []>} : vector<8x8xbf16>, vector<8x16xbf16>, vector<8x16xf32> -> vector<8x16xf32>
    %309 = arith.addf %305, %308 : vector<8x16xf32>
    %310 = vector.extract_strided_slice %302 {offsets = [0, 8], sizes = [8, 8], strides = [1, 1]} : vector<9x32xbf16> to vector<8x8xbf16>
    %c8_243 = arith.constant 8 : index
    %c0_244 = arith.constant 0 : index
    %311 = vector.load %arg2[%c8_243, %c0_244] : memref<72x16xbf16, #tpu.memory_space<vmem>>, vector<8x16xbf16>
    %cst_245 = arith.constant dense<0.000000e+00> : vector<8x16xf32>
    %312 = tpu.matmul %310, %311, %cst_245 {dimension_numbers = #tpu.dot_dimension_numbers<[1], [0], [0], [1], [0, 0, 1, 1], [], []>} : vector<8x8xbf16>, vector<8x16xbf16>, vector<8x16xf32> -> vector<8x16xf32>
    %313 = arith.addf %309, %312 : vector<8x16xf32>
    %314 = vector.extract_strided_slice %302 {offsets = [1, 0], sizes = [8, 8], strides = [1, 1]} : vector<9x32xbf16> to vector<8x8xbf16>
    %c16_246 = arith.constant 16 : index
    %c0_247 = arith.constant 0 : index
    %315 = vector.load %arg2[%c16_246, %c0_247] : memref<72x16xbf16, #tpu.memory_space<vmem>>, vector<8x16xbf16>
    %cst_248 = arith.constant dense<0.000000e+00> : vector<8x16xf32>
    %316 = tpu.matmul %314, %315, %cst_248 {dimension_numbers = #tpu.dot_dimension_numbers<[1], [0], [0], [1], [0, 0, 1, 1], [], []>} : vector<8x8xbf16>, vector<8x16xbf16>, vector<8x16xf32> -> vector<8x16xf32>
    %317 = arith.addf %313, %316 : vector<8x16xf32>
    %318 = vector.extract_strided_slice %302 {offsets = [0, 16], sizes = [8, 8], strides = [1, 1]} : vector<9x32xbf16> to vector<8x8xbf16>
    %c24_249 = arith.constant 24 : index
    %c0_250 = arith.constant 0 : index
    %319 = vector.load %arg2[%c24_249, %c0_250] : memref<72x16xbf16, #tpu.memory_space<vmem>>, vector<8x16xbf16>
    %cst_251 = arith.constant dense<0.000000e+00> : vector<8x16xf32>
    %320 = tpu.matmul %318, %319, %cst_251 {dimension_numbers = #tpu.dot_dimension_numbers<[1], [0], [0], [1], [0, 0, 1, 1], [], []>} : vector<8x8xbf16>, vector<8x16xbf16>, vector<8x16xf32> -> vector<8x16xf32>
    %321 = arith.addf %317, %320 : vector<8x16xf32>
    %322 = vector.extract_strided_slice %302 {offsets = [0, 24], sizes = [8, 8], strides = [1, 1]} : vector<9x32xbf16> to vector<8x8xbf16>
    %c32_252 = arith.constant 32 : index
    %c0_253 = arith.constant 0 : index
    %323 = vector.load %arg2[%c32_252, %c0_253] : memref<72x16xbf16, #tpu.memory_space<vmem>>, vector<8x16xbf16>
    %cst_254 = arith.constant dense<0.000000e+00> : vector<8x16xf32>
    %324 = tpu.matmul %322, %323, %cst_254 {dimension_numbers = #tpu.dot_dimension_numbers<[1], [0], [0], [1], [0, 0, 1, 1], [], []>} : vector<8x8xbf16>, vector<8x16xbf16>, vector<8x16xf32> -> vector<8x16xf32>
    %325 = arith.addf %321, %324 : vector<8x16xf32>
    %326 = vector.extract_strided_slice %302 {offsets = [1, 16], sizes = [8, 8], strides = [1, 1]} : vector<9x32xbf16> to vector<8x8xbf16>
    %c40_255 = arith.constant 40 : index
    %c0_256 = arith.constant 0 : index
    %327 = vector.load %arg2[%c40_255, %c0_256] : memref<72x16xbf16, #tpu.memory_space<vmem>>, vector<8x16xbf16>
    %cst_257 = arith.constant dense<0.000000e+00> : vector<8x16xf32>
    %328 = tpu.matmul %326, %327, %cst_257 {dimension_numbers = #tpu.dot_dimension_numbers<[1], [0], [0], [1], [0, 0, 1, 1], [], []>} : vector<8x8xbf16>, vector<8x16xbf16>, vector<8x16xf32> -> vector<8x16xf32>
    %329 = arith.addf %325, %328 : vector<8x16xf32>
    %330 = vector.extract_strided_slice %304 {offsets = [0, 0], sizes = [8, 8], strides = [1, 1]} : vector<9x32xbf16> to vector<8x8xbf16>
    %c48_258 = arith.constant 48 : index
    %c0_259 = arith.constant 0 : index
    %331 = vector.load %arg2[%c48_258, %c0_259] : memref<72x16xbf16, #tpu.memory_space<vmem>>, vector<8x16xbf16>
    %cst_260 = arith.constant dense<0.000000e+00> : vector<8x16xf32>
    %332 = tpu.matmul %330, %331, %cst_260 {dimension_numbers = #tpu.dot_dimension_numbers<[1], [0], [0], [1], [0, 0, 1, 1], [], []>} : vector<8x8xbf16>, vector<8x16xbf16>, vector<8x16xf32> -> vector<8x16xf32>
    %333 = arith.addf %329, %332 : vector<8x16xf32>
    %334 = vector.extract_strided_slice %304 {offsets = [0, 8], sizes = [8, 8], strides = [1, 1]} : vector<9x32xbf16> to vector<8x8xbf16>
    %c56_261 = arith.constant 56 : index
    %c0_262 = arith.constant 0 : index
    %335 = vector.load %arg2[%c56_261, %c0_262] : memref<72x16xbf16, #tpu.memory_space<vmem>>, vector<8x16xbf16>
    %cst_263 = arith.constant dense<0.000000e+00> : vector<8x16xf32>
    %336 = tpu.matmul %334, %335, %cst_263 {dimension_numbers = #tpu.dot_dimension_numbers<[1], [0], [0], [1], [0, 0, 1, 1], [], []>} : vector<8x8xbf16>, vector<8x16xbf16>, vector<8x16xf32> -> vector<8x16xf32>
    %337 = arith.addf %333, %336 : vector<8x16xf32>
    %338 = vector.extract_strided_slice %304 {offsets = [1, 0], sizes = [8, 8], strides = [1, 1]} : vector<9x32xbf16> to vector<8x8xbf16>
    %c64_264 = arith.constant 64 : index
    %c0_265 = arith.constant 0 : index
    %339 = vector.load %arg2[%c64_264, %c0_265] : memref<72x16xbf16, #tpu.memory_space<vmem>>, vector<8x16xbf16>
    %cst_266 = arith.constant dense<0.000000e+00> : vector<8x16xf32>
    %340 = tpu.matmul %338, %339, %cst_266 {dimension_numbers = #tpu.dot_dimension_numbers<[1], [0], [0], [1], [0, 0, 1, 1], [], []>} : vector<8x8xbf16>, vector<8x16xbf16>, vector<8x16xf32> -> vector<8x16xf32>
    %341 = arith.addf %337, %340 : vector<8x16xf32>
    %342 = vector.broadcast %0 : vector<1x16xf32> to vector<8x16xf32>
    %343 = arith.addf %341, %342 : vector<8x16xf32>
    %cst_267 = arith.constant 2.500000e-01 : f32
    %344 = vector.broadcast %cst_267 : f32 to vector<8x16xf32>
    %345 = arith.mulf %344, %343 : vector<8x16xf32>
    %346 = arith.maximumf %343, %345 : vector<8x16xf32>
    %347 = arith.truncf %346 : vector<8x16xf32> to vector<8x16xbf16>
    %c0_268 = arith.constant 0 : index
    %c6_269 = arith.constant 6 : index
    %c0_270 = arith.constant 0 : index
    %c0_271 = arith.constant 0 : index
    %348 = vector.load %arg4[%c0_268, %c6_269, %c0_270, %c0_271] : memref<1x8x8x16xbf16, #tpu.memory_space<vmem>>, vector<1x1x8x16xbf16>
    %349 = vector.shape_cast %348 : vector<1x1x8x16xbf16> to vector<8x16xbf16>
    %350 = vector.shape_cast %347 : vector<8x16xbf16> to vector<1x1x8x16xbf16>
    tpu.vector_store %arg4[%c0_268, %c6_269, %c0_270, %c0_271], %350 {strides = array<i32>} : memref<1x8x8x16xbf16, #tpu.memory_space<vmem>>, vector<1x1x8x16xbf16>,
    %c0_272 = arith.constant 0 : index
    %c7_273 = arith.constant 7 : index
    %c0_274 = arith.constant 0 : index
    %c0_275 = arith.constant 0 : index
    %351 = vector.load %arg1[%c0_272, %c7_273, %c0_274, %c0_275] : memref<1x9x9x32xbf16, #tpu.memory_space<vmem>>, vector<1x1x9x32xbf16>
    %352 = vector.shape_cast %351 : vector<1x1x9x32xbf16> to vector<9x32xbf16>
    %c0_276 = arith.constant 0 : index
    %c8_277 = arith.constant 8 : index
    %c0_278 = arith.constant 0 : index
    %c0_279 = arith.constant 0 : index
    %353 = vector.load %arg1[%c0_276, %c8_277, %c0_278, %c0_279] : memref<1x9x9x32xbf16, #tpu.memory_space<vmem>>, vector<1x1x9x32xbf16>
    %354 = vector.shape_cast %353 : vector<1x1x9x32xbf16> to vector<9x32xbf16>
    %cst_280 = arith.constant 0.000000e+00 : f32
    %355 = vector.broadcast %cst_280 : f32 to vector<8x16xf32>
    %356 = vector.extract_strided_slice %352 {offsets = [0, 0], sizes = [8, 8], strides = [1, 1]} : vector<9x32xbf16> to vector<8x8xbf16>
    %c0_281 = arith.constant 0 : index
    %c0_282 = arith.constant 0 : index
    %357 = vector.load %arg2[%c0_281, %c0_282] : memref<72x16xbf16, #tpu.memory_space<vmem>>, vector<8x16xbf16>
    %cst_283 = arith.constant dense<0.000000e+00> : vector<8x16xf32>
    %358 = tpu.matmul %356, %357, %cst_283 {dimension_numbers = #tpu.dot_dimension_numbers<[1], [0], [0], [1], [0, 0, 1, 1], [], []>} : vector<8x8xbf16>, vector<8x16xbf16>, vector<8x16xf32> -> vector<8x16xf32>
    %359 = arith.addf %355, %358 : vector<8x16xf32>
    %360 = vector.extract_strided_slice %352 {offsets = [0, 8], sizes = [8, 8], strides = [1, 1]} : vector<9x32xbf16> to vector<8x8xbf16>
    %c8_284 = arith.constant 8 : index
    %c0_285 = arith.constant 0 : index
    %361 = vector.load %arg2[%c8_284, %c0_285] : memref<72x16xbf16, #tpu.memory_space<vmem>>, vector<8x16xbf16>
    %cst_286 = arith.constant dense<0.000000e+00> : vector<8x16xf32>
    %362 = tpu.matmul %360, %361, %cst_286 {dimension_numbers = #tpu.dot_dimension_numbers<[1], [0], [0], [1], [0, 0, 1, 1], [], []>} : vector<8x8xbf16>, vector<8x16xbf16>, vector<8x16xf32> -> vector<8x16xf32>
    %363 = arith.addf %359, %362 : vector<8x16xf32>
    %364 = vector.extract_strided_slice %352 {offsets = [1, 0], sizes = [8, 8], strides = [1, 1]} : vector<9x32xbf16> to vector<8x8xbf16>
    %c16_287 = arith.constant 16 : index
    %c0_288 = arith.constant 0 : index
    %365 = vector.load %arg2[%c16_287, %c0_288] : memref<72x16xbf16, #tpu.memory_space<vmem>>, vector<8x16xbf16>
    %cst_289 = arith.constant dense<0.000000e+00> : vector<8x16xf32>
    %366 = tpu.matmul %364, %365, %cst_289 {dimension_numbers = #tpu.dot_dimension_numbers<[1], [0], [0], [1], [0, 0, 1, 1], [], []>} : vector<8x8xbf16>, vector<8x16xbf16>, vector<8x16xf32> -> vector<8x16xf32>
    %367 = arith.addf %363, %366 : vector<8x16xf32>
    %368 = vector.extract_strided_slice %352 {offsets = [0, 16], sizes = [8, 8], strides = [1, 1]} : vector<9x32xbf16> to vector<8x8xbf16>
    %c24_290 = arith.constant 24 : index
    %c0_291 = arith.constant 0 : index
    %369 = vector.load %arg2[%c24_290, %c0_291] : memref<72x16xbf16, #tpu.memory_space<vmem>>, vector<8x16xbf16>
    %cst_292 = arith.constant dense<0.000000e+00> : vector<8x16xf32>
    %370 = tpu.matmul %368, %369, %cst_292 {dimension_numbers = #tpu.dot_dimension_numbers<[1], [0], [0], [1], [0, 0, 1, 1], [], []>} : vector<8x8xbf16>, vector<8x16xbf16>, vector<8x16xf32> -> vector<8x16xf32>
    %371 = arith.addf %367, %370 : vector<8x16xf32>
    %372 = vector.extract_strided_slice %352 {offsets = [0, 24], sizes = [8, 8], strides = [1, 1]} : vector<9x32xbf16> to vector<8x8xbf16>
    %c32_293 = arith.constant 32 : index
    %c0_294 = arith.constant 0 : index
    %373 = vector.load %arg2[%c32_293, %c0_294] : memref<72x16xbf16, #tpu.memory_space<vmem>>, vector<8x16xbf16>
    %cst_295 = arith.constant dense<0.000000e+00> : vector<8x16xf32>
    %374 = tpu.matmul %372, %373, %cst_295 {dimension_numbers = #tpu.dot_dimension_numbers<[1], [0], [0], [1], [0, 0, 1, 1], [], []>} : vector<8x8xbf16>, vector<8x16xbf16>, vector<8x16xf32> -> vector<8x16xf32>
    %375 = arith.addf %371, %374 : vector<8x16xf32>
    %376 = vector.extract_strided_slice %352 {offsets = [1, 16], sizes = [8, 8], strides = [1, 1]} : vector<9x32xbf16> to vector<8x8xbf16>
    %c40_296 = arith.constant 40 : index
    %c0_297 = arith.constant 0 : index
    %377 = vector.load %arg2[%c40_296, %c0_297] : memref<72x16xbf16, #tpu.memory_space<vmem>>, vector<8x16xbf16>
    %cst_298 = arith.constant dense<0.000000e+00> : vector<8x16xf32>
    %378 = tpu.matmul %376, %377, %cst_298 {dimension_numbers = #tpu.dot_dimension_numbers<[1], [0], [0], [1], [0, 0, 1, 1], [], []>} : vector<8x8xbf16>, vector<8x16xbf16>, vector<8x16xf32> -> vector<8x16xf32>
    %379 = arith.addf %375, %378 : vector<8x16xf32>
    %380 = vector.extract_strided_slice %354 {offsets = [0, 0], sizes = [8, 8], strides = [1, 1]} : vector<9x32xbf16> to vector<8x8xbf16>
    %c48_299 = arith.constant 48 : index
    %c0_300 = arith.constant 0 : index
    %381 = vector.load %arg2[%c48_299, %c0_300] : memref<72x16xbf16, #tpu.memory_space<vmem>>, vector<8x16xbf16>
    %cst_301 = arith.constant dense<0.000000e+00> : vector<8x16xf32>
    %382 = tpu.matmul %380, %381, %cst_301 {dimension_numbers = #tpu.dot_dimension_numbers<[1], [0], [0], [1], [0, 0, 1, 1], [], []>} : vector<8x8xbf16>, vector<8x16xbf16>, vector<8x16xf32> -> vector<8x16xf32>
    %383 = arith.addf %379, %382 : vector<8x16xf32>
    %384 = vector.extract_strided_slice %354 {offsets = [0, 8], sizes = [8, 8], strides = [1, 1]} : vector<9x32xbf16> to vector<8x8xbf16>
    %c56_302 = arith.constant 56 : index
    %c0_303 = arith.constant 0 : index
    %385 = vector.load %arg2[%c56_302, %c0_303] : memref<72x16xbf16, #tpu.memory_space<vmem>>, vector<8x16xbf16>
    %cst_304 = arith.constant dense<0.000000e+00> : vector<8x16xf32>
    %386 = tpu.matmul %384, %385, %cst_304 {dimension_numbers = #tpu.dot_dimension_numbers<[1], [0], [0], [1], [0, 0, 1, 1], [], []>} : vector<8x8xbf16>, vector<8x16xbf16>, vector<8x16xf32> -> vector<8x16xf32>
    %387 = arith.addf %383, %386 : vector<8x16xf32>
    %388 = vector.extract_strided_slice %354 {offsets = [1, 0], sizes = [8, 8], strides = [1, 1]} : vector<9x32xbf16> to vector<8x8xbf16>
    %c64_305 = arith.constant 64 : index
    %c0_306 = arith.constant 0 : index
    %389 = vector.load %arg2[%c64_305, %c0_306] : memref<72x16xbf16, #tpu.memory_space<vmem>>, vector<8x16xbf16>
    %cst_307 = arith.constant dense<0.000000e+00> : vector<8x16xf32>
    %390 = tpu.matmul %388, %389, %cst_307 {dimension_numbers = #tpu.dot_dimension_numbers<[1], [0], [0], [1], [0, 0, 1, 1], [], []>} : vector<8x8xbf16>, vector<8x16xbf16>, vector<8x16xf32> -> vector<8x16xf32>
    %391 = arith.addf %387, %390 : vector<8x16xf32>
    %392 = vector.broadcast %0 : vector<1x16xf32> to vector<8x16xf32>
    %393 = arith.addf %391, %392 : vector<8x16xf32>
    %cst_308 = arith.constant 2.500000e-01 : f32
    %394 = vector.broadcast %cst_308 : f32 to vector<8x16xf32>
    %395 = arith.mulf %394, %393 : vector<8x16xf32>
    %396 = arith.maximumf %393, %395 : vector<8x16xf32>
    %397 = arith.truncf %396 : vector<8x16xf32> to vector<8x16xbf16>
    %c0_309 = arith.constant 0 : index
    %c7_310 = arith.constant 7 : index
    %c0_311 = arith.constant 0 : index
    %c0_312 = arith.constant 0 : index
    %398 = vector.load %arg4[%c0_309, %c7_310, %c0_311, %c0_312] : memref<1x8x8x16xbf16, #tpu.memory_space<vmem>>, vector<1x1x8x16xbf16>
    %399 = vector.shape_cast %398 : vector<1x1x8x16xbf16> to vector<8x16xbf16>
    %400 = vector.shape_cast %397 : vector<8x16xbf16> to vector<1x1x8x16xbf16>
    tpu.vector_store %arg4[%c0_309, %c7_310, %c0_311, %c0_312], %400 {strides = array<i32>} : memref<1x8x8x16xbf16, #tpu.memory_space<vmem>>, vector<1x1x8x16xbf16>,
    return
  }
  func.func @transform_0(%arg0: i32) -> (i32, i32, i32, i32) {
    %c0_i32 = arith.constant 0 : i32
    %c0_i32_0 = arith.constant 0 : i32
    %c0_i32_1 = arith.constant 0 : i32
    %c0_i32_2 = arith.constant 0 : i32
    return %arg0, %c0_i32, %c0_i32_0, %c0_i32_1 : i32, i32, i32, i32
  }
  func.func @transform_1(%arg0: i32) -> (i32, i32) {
    %c0_i32 = arith.constant 0 : i32
    %c0_i32_0 = arith.constant 0 : i32
    %c0_i32_1 = arith.constant 0 : i32
    return %c0_i32, %c0_i32_0 : i32, i32
  }
  func.func @transform_2(%arg0: i32) -> (i32, i32) {
    %c0_i32 = arith.constant 0 : i32
    %c0_i32_0 = arith.constant 0 : i32
    %c0_i32_1 = arith.constant 0 : i32
    return %c0_i32, %c0_i32_0 : i32, i32
  }
  func.func @transform_3(%arg0: i32) -> (i32, i32, i32, i32) {
    %c0_i32 = arith.constant 0 : i32
    %c0_i32_0 = arith.constant 0 : i32
    %c0_i32_1 = arith.constant 0 : i32
    %c0_i32_2 = arith.constant 0 : i32
    return %arg0, %c0_i32, %c0_i32_0, %c0_i32_1 : i32, i32, i32, i32
  }
}

module attributes {stable_mosaic.version = 11 : i64} {
  func.func @_conv3x3_s2_kernel(%arg0: i32, %arg1: memref<1x5x5x64xbf16, #tpu.memory_space<vmem>>, %arg2: memref<144x32xbf16, #tpu.memory_space<vmem>>, %arg3: memref<1x32xf32, #tpu.memory_space<vmem>>, %arg4: memref<1x4x4x32xbf16, #tpu.memory_space<vmem>>) attributes {dimension_semantics = [#tpu.dimension_semantics<parallel>], iteration_bounds = array<i64: 2>, scalar_prefetch = 0 : i64, scratch_operands = 0 : i64, tpu.core_type = #tpu.core_type<tc>, window_params = [{transform_indices = @transform_0, window_bounds = array<i64: 1, 5, 5, 64>}, {pipeline_mode = #tpu.pipeline_mode<synchronous>, transform_indices = @transform_1, window_bounds = array<i64: 144, 32>}, {pipeline_mode = #tpu.pipeline_mode<synchronous>, transform_indices = @transform_2, window_bounds = array<i64: 1, 32>}, {transform_indices = @transform_3, window_bounds = array<i64: 1, 4, 4, 32>}]} {
    %c0 = arith.constant 0 : index
    %c0_0 = arith.constant 0 : index
    %0 = vector.load %arg3[%c0, %c0_0] : memref<1x32xf32, #tpu.memory_space<vmem>>, vector<1x32xf32>
    %c0_1 = arith.constant 0 : index
    %c0_2 = arith.constant 0 : index
    %c0_3 = arith.constant 0 : index
    %c0_4 = arith.constant 0 : index
    %1 = vector.load %arg1[%c0_1, %c0_2, %c0_3, %c0_4] : memref<1x5x5x64xbf16, #tpu.memory_space<vmem>>, vector<1x1x5x64xbf16>
    %2 = vector.shape_cast %1 : vector<1x1x5x64xbf16> to vector<5x64xbf16>
    %c0_5 = arith.constant 0 : index
    %c1 = arith.constant 1 : index
    %c0_6 = arith.constant 0 : index
    %c0_7 = arith.constant 0 : index
    %3 = vector.load %arg1[%c0_5, %c1, %c0_6, %c0_7] : memref<1x5x5x64xbf16, #tpu.memory_space<vmem>>, vector<1x1x5x64xbf16>
    %4 = vector.shape_cast %3 : vector<1x1x5x64xbf16> to vector<5x64xbf16>
    %cst = arith.constant 0.000000e+00 : f32
    %5 = vector.broadcast %cst : f32 to vector<4x32xf32>
    %6 = vector.extract_strided_slice %2 {offsets = [0, 0], sizes = [4, 16], strides = [1, 1]} : vector<5x64xbf16> to vector<4x16xbf16>
    %c0_8 = arith.constant 0 : index
    %c0_9 = arith.constant 0 : index
    %7 = vector.load %arg2[%c0_8, %c0_9] : memref<144x32xbf16, #tpu.memory_space<vmem>>, vector<16x32xbf16>
    %cst_10 = arith.constant dense<0.000000e+00> : vector<4x32xf32>
    %8 = tpu.matmul %6, %7, %cst_10 {dimension_numbers = #tpu.dot_dimension_numbers<[1], [0], [0], [1], [0, 0, 1, 1], [], []>} : vector<4x16xbf16>, vector<16x32xbf16>, vector<4x32xf32> -> vector<4x32xf32>
    %9 = arith.addf %5, %8 : vector<4x32xf32>
    %10 = vector.extract_strided_slice %2 {offsets = [0, 16], sizes = [4, 16], strides = [1, 1]} : vector<5x64xbf16> to vector<4x16xbf16>
    %c16 = arith.constant 16 : index
    %c0_11 = arith.constant 0 : index
    %11 = vector.load %arg2[%c16, %c0_11] : memref<144x32xbf16, #tpu.memory_space<vmem>>, vector<16x32xbf16>
    %cst_12 = arith.constant dense<0.000000e+00> : vector<4x32xf32>
    %12 = tpu.matmul %10, %11, %cst_12 {dimension_numbers = #tpu.dot_dimension_numbers<[1], [0], [0], [1], [0, 0, 1, 1], [], []>} : vector<4x16xbf16>, vector<16x32xbf16>, vector<4x32xf32> -> vector<4x32xf32>
    %13 = arith.addf %9, %12 : vector<4x32xf32>
    %14 = vector.extract_strided_slice %2 {offsets = [1, 0], sizes = [4, 16], strides = [1, 1]} : vector<5x64xbf16> to vector<4x16xbf16>
    %c32 = arith.constant 32 : index
    %c0_13 = arith.constant 0 : index
    %15 = vector.load %arg2[%c32, %c0_13] : memref<144x32xbf16, #tpu.memory_space<vmem>>, vector<16x32xbf16>
    %cst_14 = arith.constant dense<0.000000e+00> : vector<4x32xf32>
    %16 = tpu.matmul %14, %15, %cst_14 {dimension_numbers = #tpu.dot_dimension_numbers<[1], [0], [0], [1], [0, 0, 1, 1], [], []>} : vector<4x16xbf16>, vector<16x32xbf16>, vector<4x32xf32> -> vector<4x32xf32>
    %17 = arith.addf %13, %16 : vector<4x32xf32>
    %18 = vector.extract_strided_slice %2 {offsets = [0, 32], sizes = [4, 16], strides = [1, 1]} : vector<5x64xbf16> to vector<4x16xbf16>
    %c48 = arith.constant 48 : index
    %c0_15 = arith.constant 0 : index
    %19 = vector.load %arg2[%c48, %c0_15] : memref<144x32xbf16, #tpu.memory_space<vmem>>, vector<16x32xbf16>
    %cst_16 = arith.constant dense<0.000000e+00> : vector<4x32xf32>
    %20 = tpu.matmul %18, %19, %cst_16 {dimension_numbers = #tpu.dot_dimension_numbers<[1], [0], [0], [1], [0, 0, 1, 1], [], []>} : vector<4x16xbf16>, vector<16x32xbf16>, vector<4x32xf32> -> vector<4x32xf32>
    %21 = arith.addf %17, %20 : vector<4x32xf32>
    %22 = vector.extract_strided_slice %2 {offsets = [0, 48], sizes = [4, 16], strides = [1, 1]} : vector<5x64xbf16> to vector<4x16xbf16>
    %c64 = arith.constant 64 : index
    %c0_17 = arith.constant 0 : index
    %23 = vector.load %arg2[%c64, %c0_17] : memref<144x32xbf16, #tpu.memory_space<vmem>>, vector<16x32xbf16>
    %cst_18 = arith.constant dense<0.000000e+00> : vector<4x32xf32>
    %24 = tpu.matmul %22, %23, %cst_18 {dimension_numbers = #tpu.dot_dimension_numbers<[1], [0], [0], [1], [0, 0, 1, 1], [], []>} : vector<4x16xbf16>, vector<16x32xbf16>, vector<4x32xf32> -> vector<4x32xf32>
    %25 = arith.addf %21, %24 : vector<4x32xf32>
    %26 = vector.extract_strided_slice %2 {offsets = [1, 32], sizes = [4, 16], strides = [1, 1]} : vector<5x64xbf16> to vector<4x16xbf16>
    %c80 = arith.constant 80 : index
    %c0_19 = arith.constant 0 : index
    %27 = vector.load %arg2[%c80, %c0_19] : memref<144x32xbf16, #tpu.memory_space<vmem>>, vector<16x32xbf16>
    %cst_20 = arith.constant dense<0.000000e+00> : vector<4x32xf32>
    %28 = tpu.matmul %26, %27, %cst_20 {dimension_numbers = #tpu.dot_dimension_numbers<[1], [0], [0], [1], [0, 0, 1, 1], [], []>} : vector<4x16xbf16>, vector<16x32xbf16>, vector<4x32xf32> -> vector<4x32xf32>
    %29 = arith.addf %25, %28 : vector<4x32xf32>
    %30 = vector.extract_strided_slice %4 {offsets = [0, 0], sizes = [4, 16], strides = [1, 1]} : vector<5x64xbf16> to vector<4x16xbf16>
    %c96 = arith.constant 96 : index
    %c0_21 = arith.constant 0 : index
    %31 = vector.load %arg2[%c96, %c0_21] : memref<144x32xbf16, #tpu.memory_space<vmem>>, vector<16x32xbf16>
    %cst_22 = arith.constant dense<0.000000e+00> : vector<4x32xf32>
    %32 = tpu.matmul %30, %31, %cst_22 {dimension_numbers = #tpu.dot_dimension_numbers<[1], [0], [0], [1], [0, 0, 1, 1], [], []>} : vector<4x16xbf16>, vector<16x32xbf16>, vector<4x32xf32> -> vector<4x32xf32>
    %33 = arith.addf %29, %32 : vector<4x32xf32>
    %34 = vector.extract_strided_slice %4 {offsets = [0, 16], sizes = [4, 16], strides = [1, 1]} : vector<5x64xbf16> to vector<4x16xbf16>
    %c112 = arith.constant 112 : index
    %c0_23 = arith.constant 0 : index
    %35 = vector.load %arg2[%c112, %c0_23] : memref<144x32xbf16, #tpu.memory_space<vmem>>, vector<16x32xbf16>
    %cst_24 = arith.constant dense<0.000000e+00> : vector<4x32xf32>
    %36 = tpu.matmul %34, %35, %cst_24 {dimension_numbers = #tpu.dot_dimension_numbers<[1], [0], [0], [1], [0, 0, 1, 1], [], []>} : vector<4x16xbf16>, vector<16x32xbf16>, vector<4x32xf32> -> vector<4x32xf32>
    %37 = arith.addf %33, %36 : vector<4x32xf32>
    %38 = vector.extract_strided_slice %4 {offsets = [1, 0], sizes = [4, 16], strides = [1, 1]} : vector<5x64xbf16> to vector<4x16xbf16>
    %c128 = arith.constant 128 : index
    %c0_25 = arith.constant 0 : index
    %39 = vector.load %arg2[%c128, %c0_25] : memref<144x32xbf16, #tpu.memory_space<vmem>>, vector<16x32xbf16>
    %cst_26 = arith.constant dense<0.000000e+00> : vector<4x32xf32>
    %40 = tpu.matmul %38, %39, %cst_26 {dimension_numbers = #tpu.dot_dimension_numbers<[1], [0], [0], [1], [0, 0, 1, 1], [], []>} : vector<4x16xbf16>, vector<16x32xbf16>, vector<4x32xf32> -> vector<4x32xf32>
    %41 = arith.addf %37, %40 : vector<4x32xf32>
    %42 = vector.broadcast %0 : vector<1x32xf32> to vector<4x32xf32>
    %43 = arith.addf %41, %42 : vector<4x32xf32>
    %cst_27 = arith.constant 2.500000e-01 : f32
    %44 = vector.broadcast %cst_27 : f32 to vector<4x32xf32>
    %45 = arith.mulf %44, %43 : vector<4x32xf32>
    %46 = arith.maximumf %43, %45 : vector<4x32xf32>
    %47 = arith.truncf %46 : vector<4x32xf32> to vector<4x32xbf16>
    %c0_28 = arith.constant 0 : index
    %c0_29 = arith.constant 0 : index
    %c0_30 = arith.constant 0 : index
    %c0_31 = arith.constant 0 : index
    %48 = vector.load %arg4[%c0_28, %c0_29, %c0_30, %c0_31] : memref<1x4x4x32xbf16, #tpu.memory_space<vmem>>, vector<1x1x4x32xbf16>
    %49 = vector.shape_cast %48 : vector<1x1x4x32xbf16> to vector<4x32xbf16>
    %50 = vector.shape_cast %47 : vector<4x32xbf16> to vector<1x1x4x32xbf16>
    tpu.vector_store %arg4[%c0_28, %c0_29, %c0_30, %c0_31], %50 {strides = array<i32>} : memref<1x4x4x32xbf16, #tpu.memory_space<vmem>>, vector<1x1x4x32xbf16>,
    %c0_32 = arith.constant 0 : index
    %c1_33 = arith.constant 1 : index
    %c0_34 = arith.constant 0 : index
    %c0_35 = arith.constant 0 : index
    %51 = vector.load %arg1[%c0_32, %c1_33, %c0_34, %c0_35] : memref<1x5x5x64xbf16, #tpu.memory_space<vmem>>, vector<1x1x5x64xbf16>
    %52 = vector.shape_cast %51 : vector<1x1x5x64xbf16> to vector<5x64xbf16>
    %c0_36 = arith.constant 0 : index
    %c2 = arith.constant 2 : index
    %c0_37 = arith.constant 0 : index
    %c0_38 = arith.constant 0 : index
    %53 = vector.load %arg1[%c0_36, %c2, %c0_37, %c0_38] : memref<1x5x5x64xbf16, #tpu.memory_space<vmem>>, vector<1x1x5x64xbf16>
    %54 = vector.shape_cast %53 : vector<1x1x5x64xbf16> to vector<5x64xbf16>
    %cst_39 = arith.constant 0.000000e+00 : f32
    %55 = vector.broadcast %cst_39 : f32 to vector<4x32xf32>
    %56 = vector.extract_strided_slice %52 {offsets = [0, 0], sizes = [4, 16], strides = [1, 1]} : vector<5x64xbf16> to vector<4x16xbf16>
    %c0_40 = arith.constant 0 : index
    %c0_41 = arith.constant 0 : index
    %57 = vector.load %arg2[%c0_40, %c0_41] : memref<144x32xbf16, #tpu.memory_space<vmem>>, vector<16x32xbf16>
    %cst_42 = arith.constant dense<0.000000e+00> : vector<4x32xf32>
    %58 = tpu.matmul %56, %57, %cst_42 {dimension_numbers = #tpu.dot_dimension_numbers<[1], [0], [0], [1], [0, 0, 1, 1], [], []>} : vector<4x16xbf16>, vector<16x32xbf16>, vector<4x32xf32> -> vector<4x32xf32>
    %59 = arith.addf %55, %58 : vector<4x32xf32>
    %60 = vector.extract_strided_slice %52 {offsets = [0, 16], sizes = [4, 16], strides = [1, 1]} : vector<5x64xbf16> to vector<4x16xbf16>
    %c16_43 = arith.constant 16 : index
    %c0_44 = arith.constant 0 : index
    %61 = vector.load %arg2[%c16_43, %c0_44] : memref<144x32xbf16, #tpu.memory_space<vmem>>, vector<16x32xbf16>
    %cst_45 = arith.constant dense<0.000000e+00> : vector<4x32xf32>
    %62 = tpu.matmul %60, %61, %cst_45 {dimension_numbers = #tpu.dot_dimension_numbers<[1], [0], [0], [1], [0, 0, 1, 1], [], []>} : vector<4x16xbf16>, vector<16x32xbf16>, vector<4x32xf32> -> vector<4x32xf32>
    %63 = arith.addf %59, %62 : vector<4x32xf32>
    %64 = vector.extract_strided_slice %52 {offsets = [1, 0], sizes = [4, 16], strides = [1, 1]} : vector<5x64xbf16> to vector<4x16xbf16>
    %c32_46 = arith.constant 32 : index
    %c0_47 = arith.constant 0 : index
    %65 = vector.load %arg2[%c32_46, %c0_47] : memref<144x32xbf16, #tpu.memory_space<vmem>>, vector<16x32xbf16>
    %cst_48 = arith.constant dense<0.000000e+00> : vector<4x32xf32>
    %66 = tpu.matmul %64, %65, %cst_48 {dimension_numbers = #tpu.dot_dimension_numbers<[1], [0], [0], [1], [0, 0, 1, 1], [], []>} : vector<4x16xbf16>, vector<16x32xbf16>, vector<4x32xf32> -> vector<4x32xf32>
    %67 = arith.addf %63, %66 : vector<4x32xf32>
    %68 = vector.extract_strided_slice %52 {offsets = [0, 32], sizes = [4, 16], strides = [1, 1]} : vector<5x64xbf16> to vector<4x16xbf16>
    %c48_49 = arith.constant 48 : index
    %c0_50 = arith.constant 0 : index
    %69 = vector.load %arg2[%c48_49, %c0_50] : memref<144x32xbf16, #tpu.memory_space<vmem>>, vector<16x32xbf16>
    %cst_51 = arith.constant dense<0.000000e+00> : vector<4x32xf32>
    %70 = tpu.matmul %68, %69, %cst_51 {dimension_numbers = #tpu.dot_dimension_numbers<[1], [0], [0], [1], [0, 0, 1, 1], [], []>} : vector<4x16xbf16>, vector<16x32xbf16>, vector<4x32xf32> -> vector<4x32xf32>
    %71 = arith.addf %67, %70 : vector<4x32xf32>
    %72 = vector.extract_strided_slice %52 {offsets = [0, 48], sizes = [4, 16], strides = [1, 1]} : vector<5x64xbf16> to vector<4x16xbf16>
    %c64_52 = arith.constant 64 : index
    %c0_53 = arith.constant 0 : index
    %73 = vector.load %arg2[%c64_52, %c0_53] : memref<144x32xbf16, #tpu.memory_space<vmem>>, vector<16x32xbf16>
    %cst_54 = arith.constant dense<0.000000e+00> : vector<4x32xf32>
    %74 = tpu.matmul %72, %73, %cst_54 {dimension_numbers = #tpu.dot_dimension_numbers<[1], [0], [0], [1], [0, 0, 1, 1], [], []>} : vector<4x16xbf16>, vector<16x32xbf16>, vector<4x32xf32> -> vector<4x32xf32>
    %75 = arith.addf %71, %74 : vector<4x32xf32>
    %76 = vector.extract_strided_slice %52 {offsets = [1, 32], sizes = [4, 16], strides = [1, 1]} : vector<5x64xbf16> to vector<4x16xbf16>
    %c80_55 = arith.constant 80 : index
    %c0_56 = arith.constant 0 : index
    %77 = vector.load %arg2[%c80_55, %c0_56] : memref<144x32xbf16, #tpu.memory_space<vmem>>, vector<16x32xbf16>
    %cst_57 = arith.constant dense<0.000000e+00> : vector<4x32xf32>
    %78 = tpu.matmul %76, %77, %cst_57 {dimension_numbers = #tpu.dot_dimension_numbers<[1], [0], [0], [1], [0, 0, 1, 1], [], []>} : vector<4x16xbf16>, vector<16x32xbf16>, vector<4x32xf32> -> vector<4x32xf32>
    %79 = arith.addf %75, %78 : vector<4x32xf32>
    %80 = vector.extract_strided_slice %54 {offsets = [0, 0], sizes = [4, 16], strides = [1, 1]} : vector<5x64xbf16> to vector<4x16xbf16>
    %c96_58 = arith.constant 96 : index
    %c0_59 = arith.constant 0 : index
    %81 = vector.load %arg2[%c96_58, %c0_59] : memref<144x32xbf16, #tpu.memory_space<vmem>>, vector<16x32xbf16>
    %cst_60 = arith.constant dense<0.000000e+00> : vector<4x32xf32>
    %82 = tpu.matmul %80, %81, %cst_60 {dimension_numbers = #tpu.dot_dimension_numbers<[1], [0], [0], [1], [0, 0, 1, 1], [], []>} : vector<4x16xbf16>, vector<16x32xbf16>, vector<4x32xf32> -> vector<4x32xf32>
    %83 = arith.addf %79, %82 : vector<4x32xf32>
    %84 = vector.extract_strided_slice %54 {offsets = [0, 16], sizes = [4, 16], strides = [1, 1]} : vector<5x64xbf16> to vector<4x16xbf16>
    %c112_61 = arith.constant 112 : index
    %c0_62 = arith.constant 0 : index
    %85 = vector.load %arg2[%c112_61, %c0_62] : memref<144x32xbf16, #tpu.memory_space<vmem>>, vector<16x32xbf16>
    %cst_63 = arith.constant dense<0.000000e+00> : vector<4x32xf32>
    %86 = tpu.matmul %84, %85, %cst_63 {dimension_numbers = #tpu.dot_dimension_numbers<[1], [0], [0], [1], [0, 0, 1, 1], [], []>} : vector<4x16xbf16>, vector<16x32xbf16>, vector<4x32xf32> -> vector<4x32xf32>
    %87 = arith.addf %83, %86 : vector<4x32xf32>
    %88 = vector.extract_strided_slice %54 {offsets = [1, 0], sizes = [4, 16], strides = [1, 1]} : vector<5x64xbf16> to vector<4x16xbf16>
    %c128_64 = arith.constant 128 : index
    %c0_65 = arith.constant 0 : index
    %89 = vector.load %arg2[%c128_64, %c0_65] : memref<144x32xbf16, #tpu.memory_space<vmem>>, vector<16x32xbf16>
    %cst_66 = arith.constant dense<0.000000e+00> : vector<4x32xf32>
    %90 = tpu.matmul %88, %89, %cst_66 {dimension_numbers = #tpu.dot_dimension_numbers<[1], [0], [0], [1], [0, 0, 1, 1], [], []>} : vector<4x16xbf16>, vector<16x32xbf16>, vector<4x32xf32> -> vector<4x32xf32>
    %91 = arith.addf %87, %90 : vector<4x32xf32>
    %92 = vector.broadcast %0 : vector<1x32xf32> to vector<4x32xf32>
    %93 = arith.addf %91, %92 : vector<4x32xf32>
    %cst_67 = arith.constant 2.500000e-01 : f32
    %94 = vector.broadcast %cst_67 : f32 to vector<4x32xf32>
    %95 = arith.mulf %94, %93 : vector<4x32xf32>
    %96 = arith.maximumf %93, %95 : vector<4x32xf32>
    %97 = arith.truncf %96 : vector<4x32xf32> to vector<4x32xbf16>
    %c0_68 = arith.constant 0 : index
    %c1_69 = arith.constant 1 : index
    %c0_70 = arith.constant 0 : index
    %c0_71 = arith.constant 0 : index
    %98 = vector.load %arg4[%c0_68, %c1_69, %c0_70, %c0_71] : memref<1x4x4x32xbf16, #tpu.memory_space<vmem>>, vector<1x1x4x32xbf16>
    %99 = vector.shape_cast %98 : vector<1x1x4x32xbf16> to vector<4x32xbf16>
    %100 = vector.shape_cast %97 : vector<4x32xbf16> to vector<1x1x4x32xbf16>
    tpu.vector_store %arg4[%c0_68, %c1_69, %c0_70, %c0_71], %100 {strides = array<i32>} : memref<1x4x4x32xbf16, #tpu.memory_space<vmem>>, vector<1x1x4x32xbf16>,
    %c0_72 = arith.constant 0 : index
    %c2_73 = arith.constant 2 : index
    %c0_74 = arith.constant 0 : index
    %c0_75 = arith.constant 0 : index
    %101 = vector.load %arg1[%c0_72, %c2_73, %c0_74, %c0_75] : memref<1x5x5x64xbf16, #tpu.memory_space<vmem>>, vector<1x1x5x64xbf16>
    %102 = vector.shape_cast %101 : vector<1x1x5x64xbf16> to vector<5x64xbf16>
    %c0_76 = arith.constant 0 : index
    %c3 = arith.constant 3 : index
    %c0_77 = arith.constant 0 : index
    %c0_78 = arith.constant 0 : index
    %103 = vector.load %arg1[%c0_76, %c3, %c0_77, %c0_78] : memref<1x5x5x64xbf16, #tpu.memory_space<vmem>>, vector<1x1x5x64xbf16>
    %104 = vector.shape_cast %103 : vector<1x1x5x64xbf16> to vector<5x64xbf16>
    %cst_79 = arith.constant 0.000000e+00 : f32
    %105 = vector.broadcast %cst_79 : f32 to vector<4x32xf32>
    %106 = vector.extract_strided_slice %102 {offsets = [0, 0], sizes = [4, 16], strides = [1, 1]} : vector<5x64xbf16> to vector<4x16xbf16>
    %c0_80 = arith.constant 0 : index
    %c0_81 = arith.constant 0 : index
    %107 = vector.load %arg2[%c0_80, %c0_81] : memref<144x32xbf16, #tpu.memory_space<vmem>>, vector<16x32xbf16>
    %cst_82 = arith.constant dense<0.000000e+00> : vector<4x32xf32>
    %108 = tpu.matmul %106, %107, %cst_82 {dimension_numbers = #tpu.dot_dimension_numbers<[1], [0], [0], [1], [0, 0, 1, 1], [], []>} : vector<4x16xbf16>, vector<16x32xbf16>, vector<4x32xf32> -> vector<4x32xf32>
    %109 = arith.addf %105, %108 : vector<4x32xf32>
    %110 = vector.extract_strided_slice %102 {offsets = [0, 16], sizes = [4, 16], strides = [1, 1]} : vector<5x64xbf16> to vector<4x16xbf16>
    %c16_83 = arith.constant 16 : index
    %c0_84 = arith.constant 0 : index
    %111 = vector.load %arg2[%c16_83, %c0_84] : memref<144x32xbf16, #tpu.memory_space<vmem>>, vector<16x32xbf16>
    %cst_85 = arith.constant dense<0.000000e+00> : vector<4x32xf32>
    %112 = tpu.matmul %110, %111, %cst_85 {dimension_numbers = #tpu.dot_dimension_numbers<[1], [0], [0], [1], [0, 0, 1, 1], [], []>} : vector<4x16xbf16>, vector<16x32xbf16>, vector<4x32xf32> -> vector<4x32xf32>
    %113 = arith.addf %109, %112 : vector<4x32xf32>
    %114 = vector.extract_strided_slice %102 {offsets = [1, 0], sizes = [4, 16], strides = [1, 1]} : vector<5x64xbf16> to vector<4x16xbf16>
    %c32_86 = arith.constant 32 : index
    %c0_87 = arith.constant 0 : index
    %115 = vector.load %arg2[%c32_86, %c0_87] : memref<144x32xbf16, #tpu.memory_space<vmem>>, vector<16x32xbf16>
    %cst_88 = arith.constant dense<0.000000e+00> : vector<4x32xf32>
    %116 = tpu.matmul %114, %115, %cst_88 {dimension_numbers = #tpu.dot_dimension_numbers<[1], [0], [0], [1], [0, 0, 1, 1], [], []>} : vector<4x16xbf16>, vector<16x32xbf16>, vector<4x32xf32> -> vector<4x32xf32>
    %117 = arith.addf %113, %116 : vector<4x32xf32>
    %118 = vector.extract_strided_slice %102 {offsets = [0, 32], sizes = [4, 16], strides = [1, 1]} : vector<5x64xbf16> to vector<4x16xbf16>
    %c48_89 = arith.constant 48 : index
    %c0_90 = arith.constant 0 : index
    %119 = vector.load %arg2[%c48_89, %c0_90] : memref<144x32xbf16, #tpu.memory_space<vmem>>, vector<16x32xbf16>
    %cst_91 = arith.constant dense<0.000000e+00> : vector<4x32xf32>
    %120 = tpu.matmul %118, %119, %cst_91 {dimension_numbers = #tpu.dot_dimension_numbers<[1], [0], [0], [1], [0, 0, 1, 1], [], []>} : vector<4x16xbf16>, vector<16x32xbf16>, vector<4x32xf32> -> vector<4x32xf32>
    %121 = arith.addf %117, %120 : vector<4x32xf32>
    %122 = vector.extract_strided_slice %102 {offsets = [0, 48], sizes = [4, 16], strides = [1, 1]} : vector<5x64xbf16> to vector<4x16xbf16>
    %c64_92 = arith.constant 64 : index
    %c0_93 = arith.constant 0 : index
    %123 = vector.load %arg2[%c64_92, %c0_93] : memref<144x32xbf16, #tpu.memory_space<vmem>>, vector<16x32xbf16>
    %cst_94 = arith.constant dense<0.000000e+00> : vector<4x32xf32>
    %124 = tpu.matmul %122, %123, %cst_94 {dimension_numbers = #tpu.dot_dimension_numbers<[1], [0], [0], [1], [0, 0, 1, 1], [], []>} : vector<4x16xbf16>, vector<16x32xbf16>, vector<4x32xf32> -> vector<4x32xf32>
    %125 = arith.addf %121, %124 : vector<4x32xf32>
    %126 = vector.extract_strided_slice %102 {offsets = [1, 32], sizes = [4, 16], strides = [1, 1]} : vector<5x64xbf16> to vector<4x16xbf16>
    %c80_95 = arith.constant 80 : index
    %c0_96 = arith.constant 0 : index
    %127 = vector.load %arg2[%c80_95, %c0_96] : memref<144x32xbf16, #tpu.memory_space<vmem>>, vector<16x32xbf16>
    %cst_97 = arith.constant dense<0.000000e+00> : vector<4x32xf32>
    %128 = tpu.matmul %126, %127, %cst_97 {dimension_numbers = #tpu.dot_dimension_numbers<[1], [0], [0], [1], [0, 0, 1, 1], [], []>} : vector<4x16xbf16>, vector<16x32xbf16>, vector<4x32xf32> -> vector<4x32xf32>
    %129 = arith.addf %125, %128 : vector<4x32xf32>
    %130 = vector.extract_strided_slice %104 {offsets = [0, 0], sizes = [4, 16], strides = [1, 1]} : vector<5x64xbf16> to vector<4x16xbf16>
    %c96_98 = arith.constant 96 : index
    %c0_99 = arith.constant 0 : index
    %131 = vector.load %arg2[%c96_98, %c0_99] : memref<144x32xbf16, #tpu.memory_space<vmem>>, vector<16x32xbf16>
    %cst_100 = arith.constant dense<0.000000e+00> : vector<4x32xf32>
    %132 = tpu.matmul %130, %131, %cst_100 {dimension_numbers = #tpu.dot_dimension_numbers<[1], [0], [0], [1], [0, 0, 1, 1], [], []>} : vector<4x16xbf16>, vector<16x32xbf16>, vector<4x32xf32> -> vector<4x32xf32>
    %133 = arith.addf %129, %132 : vector<4x32xf32>
    %134 = vector.extract_strided_slice %104 {offsets = [0, 16], sizes = [4, 16], strides = [1, 1]} : vector<5x64xbf16> to vector<4x16xbf16>
    %c112_101 = arith.constant 112 : index
    %c0_102 = arith.constant 0 : index
    %135 = vector.load %arg2[%c112_101, %c0_102] : memref<144x32xbf16, #tpu.memory_space<vmem>>, vector<16x32xbf16>
    %cst_103 = arith.constant dense<0.000000e+00> : vector<4x32xf32>
    %136 = tpu.matmul %134, %135, %cst_103 {dimension_numbers = #tpu.dot_dimension_numbers<[1], [0], [0], [1], [0, 0, 1, 1], [], []>} : vector<4x16xbf16>, vector<16x32xbf16>, vector<4x32xf32> -> vector<4x32xf32>
    %137 = arith.addf %133, %136 : vector<4x32xf32>
    %138 = vector.extract_strided_slice %104 {offsets = [1, 0], sizes = [4, 16], strides = [1, 1]} : vector<5x64xbf16> to vector<4x16xbf16>
    %c128_104 = arith.constant 128 : index
    %c0_105 = arith.constant 0 : index
    %139 = vector.load %arg2[%c128_104, %c0_105] : memref<144x32xbf16, #tpu.memory_space<vmem>>, vector<16x32xbf16>
    %cst_106 = arith.constant dense<0.000000e+00> : vector<4x32xf32>
    %140 = tpu.matmul %138, %139, %cst_106 {dimension_numbers = #tpu.dot_dimension_numbers<[1], [0], [0], [1], [0, 0, 1, 1], [], []>} : vector<4x16xbf16>, vector<16x32xbf16>, vector<4x32xf32> -> vector<4x32xf32>
    %141 = arith.addf %137, %140 : vector<4x32xf32>
    %142 = vector.broadcast %0 : vector<1x32xf32> to vector<4x32xf32>
    %143 = arith.addf %141, %142 : vector<4x32xf32>
    %cst_107 = arith.constant 2.500000e-01 : f32
    %144 = vector.broadcast %cst_107 : f32 to vector<4x32xf32>
    %145 = arith.mulf %144, %143 : vector<4x32xf32>
    %146 = arith.maximumf %143, %145 : vector<4x32xf32>
    %147 = arith.truncf %146 : vector<4x32xf32> to vector<4x32xbf16>
    %c0_108 = arith.constant 0 : index
    %c2_109 = arith.constant 2 : index
    %c0_110 = arith.constant 0 : index
    %c0_111 = arith.constant 0 : index
    %148 = vector.load %arg4[%c0_108, %c2_109, %c0_110, %c0_111] : memref<1x4x4x32xbf16, #tpu.memory_space<vmem>>, vector<1x1x4x32xbf16>
    %149 = vector.shape_cast %148 : vector<1x1x4x32xbf16> to vector<4x32xbf16>
    %150 = vector.shape_cast %147 : vector<4x32xbf16> to vector<1x1x4x32xbf16>
    tpu.vector_store %arg4[%c0_108, %c2_109, %c0_110, %c0_111], %150 {strides = array<i32>} : memref<1x4x4x32xbf16, #tpu.memory_space<vmem>>, vector<1x1x4x32xbf16>,
    %c0_112 = arith.constant 0 : index
    %c3_113 = arith.constant 3 : index
    %c0_114 = arith.constant 0 : index
    %c0_115 = arith.constant 0 : index
    %151 = vector.load %arg1[%c0_112, %c3_113, %c0_114, %c0_115] : memref<1x5x5x64xbf16, #tpu.memory_space<vmem>>, vector<1x1x5x64xbf16>
    %152 = vector.shape_cast %151 : vector<1x1x5x64xbf16> to vector<5x64xbf16>
    %c0_116 = arith.constant 0 : index
    %c4 = arith.constant 4 : index
    %c0_117 = arith.constant 0 : index
    %c0_118 = arith.constant 0 : index
    %153 = vector.load %arg1[%c0_116, %c4, %c0_117, %c0_118] : memref<1x5x5x64xbf16, #tpu.memory_space<vmem>>, vector<1x1x5x64xbf16>
    %154 = vector.shape_cast %153 : vector<1x1x5x64xbf16> to vector<5x64xbf16>
    %cst_119 = arith.constant 0.000000e+00 : f32
    %155 = vector.broadcast %cst_119 : f32 to vector<4x32xf32>
    %156 = vector.extract_strided_slice %152 {offsets = [0, 0], sizes = [4, 16], strides = [1, 1]} : vector<5x64xbf16> to vector<4x16xbf16>
    %c0_120 = arith.constant 0 : index
    %c0_121 = arith.constant 0 : index
    %157 = vector.load %arg2[%c0_120, %c0_121] : memref<144x32xbf16, #tpu.memory_space<vmem>>, vector<16x32xbf16>
    %cst_122 = arith.constant dense<0.000000e+00> : vector<4x32xf32>
    %158 = tpu.matmul %156, %157, %cst_122 {dimension_numbers = #tpu.dot_dimension_numbers<[1], [0], [0], [1], [0, 0, 1, 1], [], []>} : vector<4x16xbf16>, vector<16x32xbf16>, vector<4x32xf32> -> vector<4x32xf32>
    %159 = arith.addf %155, %158 : vector<4x32xf32>
    %160 = vector.extract_strided_slice %152 {offsets = [0, 16], sizes = [4, 16], strides = [1, 1]} : vector<5x64xbf16> to vector<4x16xbf16>
    %c16_123 = arith.constant 16 : index
    %c0_124 = arith.constant 0 : index
    %161 = vector.load %arg2[%c16_123, %c0_124] : memref<144x32xbf16, #tpu.memory_space<vmem>>, vector<16x32xbf16>
    %cst_125 = arith.constant dense<0.000000e+00> : vector<4x32xf32>
    %162 = tpu.matmul %160, %161, %cst_125 {dimension_numbers = #tpu.dot_dimension_numbers<[1], [0], [0], [1], [0, 0, 1, 1], [], []>} : vector<4x16xbf16>, vector<16x32xbf16>, vector<4x32xf32> -> vector<4x32xf32>
    %163 = arith.addf %159, %162 : vector<4x32xf32>
    %164 = vector.extract_strided_slice %152 {offsets = [1, 0], sizes = [4, 16], strides = [1, 1]} : vector<5x64xbf16> to vector<4x16xbf16>
    %c32_126 = arith.constant 32 : index
    %c0_127 = arith.constant 0 : index
    %165 = vector.load %arg2[%c32_126, %c0_127] : memref<144x32xbf16, #tpu.memory_space<vmem>>, vector<16x32xbf16>
    %cst_128 = arith.constant dense<0.000000e+00> : vector<4x32xf32>
    %166 = tpu.matmul %164, %165, %cst_128 {dimension_numbers = #tpu.dot_dimension_numbers<[1], [0], [0], [1], [0, 0, 1, 1], [], []>} : vector<4x16xbf16>, vector<16x32xbf16>, vector<4x32xf32> -> vector<4x32xf32>
    %167 = arith.addf %163, %166 : vector<4x32xf32>
    %168 = vector.extract_strided_slice %152 {offsets = [0, 32], sizes = [4, 16], strides = [1, 1]} : vector<5x64xbf16> to vector<4x16xbf16>
    %c48_129 = arith.constant 48 : index
    %c0_130 = arith.constant 0 : index
    %169 = vector.load %arg2[%c48_129, %c0_130] : memref<144x32xbf16, #tpu.memory_space<vmem>>, vector<16x32xbf16>
    %cst_131 = arith.constant dense<0.000000e+00> : vector<4x32xf32>
    %170 = tpu.matmul %168, %169, %cst_131 {dimension_numbers = #tpu.dot_dimension_numbers<[1], [0], [0], [1], [0, 0, 1, 1], [], []>} : vector<4x16xbf16>, vector<16x32xbf16>, vector<4x32xf32> -> vector<4x32xf32>
    %171 = arith.addf %167, %170 : vector<4x32xf32>
    %172 = vector.extract_strided_slice %152 {offsets = [0, 48], sizes = [4, 16], strides = [1, 1]} : vector<5x64xbf16> to vector<4x16xbf16>
    %c64_132 = arith.constant 64 : index
    %c0_133 = arith.constant 0 : index
    %173 = vector.load %arg2[%c64_132, %c0_133] : memref<144x32xbf16, #tpu.memory_space<vmem>>, vector<16x32xbf16>
    %cst_134 = arith.constant dense<0.000000e+00> : vector<4x32xf32>
    %174 = tpu.matmul %172, %173, %cst_134 {dimension_numbers = #tpu.dot_dimension_numbers<[1], [0], [0], [1], [0, 0, 1, 1], [], []>} : vector<4x16xbf16>, vector<16x32xbf16>, vector<4x32xf32> -> vector<4x32xf32>
    %175 = arith.addf %171, %174 : vector<4x32xf32>
    %176 = vector.extract_strided_slice %152 {offsets = [1, 32], sizes = [4, 16], strides = [1, 1]} : vector<5x64xbf16> to vector<4x16xbf16>
    %c80_135 = arith.constant 80 : index
    %c0_136 = arith.constant 0 : index
    %177 = vector.load %arg2[%c80_135, %c0_136] : memref<144x32xbf16, #tpu.memory_space<vmem>>, vector<16x32xbf16>
    %cst_137 = arith.constant dense<0.000000e+00> : vector<4x32xf32>
    %178 = tpu.matmul %176, %177, %cst_137 {dimension_numbers = #tpu.dot_dimension_numbers<[1], [0], [0], [1], [0, 0, 1, 1], [], []>} : vector<4x16xbf16>, vector<16x32xbf16>, vector<4x32xf32> -> vector<4x32xf32>
    %179 = arith.addf %175, %178 : vector<4x32xf32>
    %180 = vector.extract_strided_slice %154 {offsets = [0, 0], sizes = [4, 16], strides = [1, 1]} : vector<5x64xbf16> to vector<4x16xbf16>
    %c96_138 = arith.constant 96 : index
    %c0_139 = arith.constant 0 : index
    %181 = vector.load %arg2[%c96_138, %c0_139] : memref<144x32xbf16, #tpu.memory_space<vmem>>, vector<16x32xbf16>
    %cst_140 = arith.constant dense<0.000000e+00> : vector<4x32xf32>
    %182 = tpu.matmul %180, %181, %cst_140 {dimension_numbers = #tpu.dot_dimension_numbers<[1], [0], [0], [1], [0, 0, 1, 1], [], []>} : vector<4x16xbf16>, vector<16x32xbf16>, vector<4x32xf32> -> vector<4x32xf32>
    %183 = arith.addf %179, %182 : vector<4x32xf32>
    %184 = vector.extract_strided_slice %154 {offsets = [0, 16], sizes = [4, 16], strides = [1, 1]} : vector<5x64xbf16> to vector<4x16xbf16>
    %c112_141 = arith.constant 112 : index
    %c0_142 = arith.constant 0 : index
    %185 = vector.load %arg2[%c112_141, %c0_142] : memref<144x32xbf16, #tpu.memory_space<vmem>>, vector<16x32xbf16>
    %cst_143 = arith.constant dense<0.000000e+00> : vector<4x32xf32>
    %186 = tpu.matmul %184, %185, %cst_143 {dimension_numbers = #tpu.dot_dimension_numbers<[1], [0], [0], [1], [0, 0, 1, 1], [], []>} : vector<4x16xbf16>, vector<16x32xbf16>, vector<4x32xf32> -> vector<4x32xf32>
    %187 = arith.addf %183, %186 : vector<4x32xf32>
    %188 = vector.extract_strided_slice %154 {offsets = [1, 0], sizes = [4, 16], strides = [1, 1]} : vector<5x64xbf16> to vector<4x16xbf16>
    %c128_144 = arith.constant 128 : index
    %c0_145 = arith.constant 0 : index
    %189 = vector.load %arg2[%c128_144, %c0_145] : memref<144x32xbf16, #tpu.memory_space<vmem>>, vector<16x32xbf16>
    %cst_146 = arith.constant dense<0.000000e+00> : vector<4x32xf32>
    %190 = tpu.matmul %188, %189, %cst_146 {dimension_numbers = #tpu.dot_dimension_numbers<[1], [0], [0], [1], [0, 0, 1, 1], [], []>} : vector<4x16xbf16>, vector<16x32xbf16>, vector<4x32xf32> -> vector<4x32xf32>
    %191 = arith.addf %187, %190 : vector<4x32xf32>
    %192 = vector.broadcast %0 : vector<1x32xf32> to vector<4x32xf32>
    %193 = arith.addf %191, %192 : vector<4x32xf32>
    %cst_147 = arith.constant 2.500000e-01 : f32
    %194 = vector.broadcast %cst_147 : f32 to vector<4x32xf32>
    %195 = arith.mulf %194, %193 : vector<4x32xf32>
    %196 = arith.maximumf %193, %195 : vector<4x32xf32>
    %197 = arith.truncf %196 : vector<4x32xf32> to vector<4x32xbf16>
    %c0_148 = arith.constant 0 : index
    %c3_149 = arith.constant 3 : index
    %c0_150 = arith.constant 0 : index
    %c0_151 = arith.constant 0 : index
    %198 = vector.load %arg4[%c0_148, %c3_149, %c0_150, %c0_151] : memref<1x4x4x32xbf16, #tpu.memory_space<vmem>>, vector<1x1x4x32xbf16>
    %199 = vector.shape_cast %198 : vector<1x1x4x32xbf16> to vector<4x32xbf16>
    %200 = vector.shape_cast %197 : vector<4x32xbf16> to vector<1x1x4x32xbf16>
    tpu.vector_store %arg4[%c0_148, %c3_149, %c0_150, %c0_151], %200 {strides = array<i32>} : memref<1x4x4x32xbf16, #tpu.memory_space<vmem>>, vector<1x1x4x32xbf16>,
    return
  }
  func.func @transform_0(%arg0: i32) -> (i32, i32, i32, i32) {
    %c0_i32 = arith.constant 0 : i32
    %c0_i32_0 = arith.constant 0 : i32
    %c0_i32_1 = arith.constant 0 : i32
    %c0_i32_2 = arith.constant 0 : i32
    return %arg0, %c0_i32, %c0_i32_0, %c0_i32_1 : i32, i32, i32, i32
  }
  func.func @transform_1(%arg0: i32) -> (i32, i32) {
    %c0_i32 = arith.constant 0 : i32
    %c0_i32_0 = arith.constant 0 : i32
    %c0_i32_1 = arith.constant 0 : i32
    return %c0_i32, %c0_i32_0 : i32, i32
  }
  func.func @transform_2(%arg0: i32) -> (i32, i32) {
    %c0_i32 = arith.constant 0 : i32
    %c0_i32_0 = arith.constant 0 : i32
    %c0_i32_1 = arith.constant 0 : i32
    return %c0_i32, %c0_i32_0 : i32, i32
  }
  func.func @transform_3(%arg0: i32) -> (i32, i32, i32, i32) {
    %c0_i32 = arith.constant 0 : i32
    %c0_i32_0 = arith.constant 0 : i32
    %c0_i32_1 = arith.constant 0 : i32
    %c0_i32_2 = arith.constant 0 : i32
    return %arg0, %c0_i32, %c0_i32_0, %c0_i32_1 : i32, i32, i32, i32
  }
}

module attributes {stable_mosaic.version = 11 : i64} {
  func.func @_conv3x3_s2_kernel(%arg0: i32, %arg1: memref<1x3x3x128xbf16, #tpu.memory_space<vmem>>, %arg2: memref<288x64xbf16, #tpu.memory_space<vmem>>, %arg3: memref<1x64xf32, #tpu.memory_space<vmem>>, %arg4: memref<1x2x2x64xbf16, #tpu.memory_space<vmem>>) attributes {dimension_semantics = [#tpu.dimension_semantics<parallel>], iteration_bounds = array<i64: 2>, scalar_prefetch = 0 : i64, scratch_operands = 0 : i64, tpu.core_type = #tpu.core_type<tc>, window_params = [{transform_indices = @transform_0, window_bounds = array<i64: 1, 3, 3, 128>}, {pipeline_mode = #tpu.pipeline_mode<synchronous>, transform_indices = @transform_1, window_bounds = array<i64: 288, 64>}, {pipeline_mode = #tpu.pipeline_mode<synchronous>, transform_indices = @transform_2, window_bounds = array<i64: 1, 64>}, {transform_indices = @transform_3, window_bounds = array<i64: 1, 2, 2, 64>}]} {
    %c0 = arith.constant 0 : index
    %c0_0 = arith.constant 0 : index
    %0 = vector.load %arg3[%c0, %c0_0] : memref<1x64xf32, #tpu.memory_space<vmem>>, vector<1x64xf32>
    %c0_1 = arith.constant 0 : index
    %c0_2 = arith.constant 0 : index
    %c0_3 = arith.constant 0 : index
    %c0_4 = arith.constant 0 : index
    %1 = vector.load %arg1[%c0_1, %c0_2, %c0_3, %c0_4] : memref<1x3x3x128xbf16, #tpu.memory_space<vmem>>, vector<1x1x3x128xbf16>
    %2 = vector.shape_cast %1 : vector<1x1x3x128xbf16> to vector<3x128xbf16>
    %c0_5 = arith.constant 0 : index
    %c1 = arith.constant 1 : index
    %c0_6 = arith.constant 0 : index
    %c0_7 = arith.constant 0 : index
    %3 = vector.load %arg1[%c0_5, %c1, %c0_6, %c0_7] : memref<1x3x3x128xbf16, #tpu.memory_space<vmem>>, vector<1x1x3x128xbf16>
    %4 = vector.shape_cast %3 : vector<1x1x3x128xbf16> to vector<3x128xbf16>
    %cst = arith.constant 0.000000e+00 : f32
    %5 = vector.broadcast %cst : f32 to vector<2x64xf32>
    %6 = vector.extract_strided_slice %2 {offsets = [0, 0], sizes = [2, 32], strides = [1, 1]} : vector<3x128xbf16> to vector<2x32xbf16>
    %c0_8 = arith.constant 0 : index
    %c0_9 = arith.constant 0 : index
    %7 = vector.load %arg2[%c0_8, %c0_9] : memref<288x64xbf16, #tpu.memory_space<vmem>>, vector<32x64xbf16>
    %cst_10 = arith.constant dense<0.000000e+00> : vector<2x64xf32>
    %8 = tpu.matmul %6, %7, %cst_10 {dimension_numbers = #tpu.dot_dimension_numbers<[1], [0], [0], [1], [0, 0, 1, 1], [], []>} : vector<2x32xbf16>, vector<32x64xbf16>, vector<2x64xf32> -> vector<2x64xf32>
    %9 = arith.addf %5, %8 : vector<2x64xf32>
    %10 = vector.extract_strided_slice %2 {offsets = [0, 32], sizes = [2, 32], strides = [1, 1]} : vector<3x128xbf16> to vector<2x32xbf16>
    %c32 = arith.constant 32 : index
    %c0_11 = arith.constant 0 : index
    %11 = vector.load %arg2[%c32, %c0_11] : memref<288x64xbf16, #tpu.memory_space<vmem>>, vector<32x64xbf16>
    %cst_12 = arith.constant dense<0.000000e+00> : vector<2x64xf32>
    %12 = tpu.matmul %10, %11, %cst_12 {dimension_numbers = #tpu.dot_dimension_numbers<[1], [0], [0], [1], [0, 0, 1, 1], [], []>} : vector<2x32xbf16>, vector<32x64xbf16>, vector<2x64xf32> -> vector<2x64xf32>
    %13 = arith.addf %9, %12 : vector<2x64xf32>
    %14 = vector.extract_strided_slice %2 {offsets = [1, 0], sizes = [2, 32], strides = [1, 1]} : vector<3x128xbf16> to vector<2x32xbf16>
    %c64 = arith.constant 64 : index
    %c0_13 = arith.constant 0 : index
    %15 = vector.load %arg2[%c64, %c0_13] : memref<288x64xbf16, #tpu.memory_space<vmem>>, vector<32x64xbf16>
    %cst_14 = arith.constant dense<0.000000e+00> : vector<2x64xf32>
    %16 = tpu.matmul %14, %15, %cst_14 {dimension_numbers = #tpu.dot_dimension_numbers<[1], [0], [0], [1], [0, 0, 1, 1], [], []>} : vector<2x32xbf16>, vector<32x64xbf16>, vector<2x64xf32> -> vector<2x64xf32>
    %17 = arith.addf %13, %16 : vector<2x64xf32>
    %18 = vector.extract_strided_slice %2 {offsets = [0, 64], sizes = [2, 32], strides = [1, 1]} : vector<3x128xbf16> to vector<2x32xbf16>
    %c96 = arith.constant 96 : index
    %c0_15 = arith.constant 0 : index
    %19 = vector.load %arg2[%c96, %c0_15] : memref<288x64xbf16, #tpu.memory_space<vmem>>, vector<32x64xbf16>
    %cst_16 = arith.constant dense<0.000000e+00> : vector<2x64xf32>
    %20 = tpu.matmul %18, %19, %cst_16 {dimension_numbers = #tpu.dot_dimension_numbers<[1], [0], [0], [1], [0, 0, 1, 1], [], []>} : vector<2x32xbf16>, vector<32x64xbf16>, vector<2x64xf32> -> vector<2x64xf32>
    %21 = arith.addf %17, %20 : vector<2x64xf32>
    %22 = vector.extract_strided_slice %2 {offsets = [0, 96], sizes = [2, 32], strides = [1, 1]} : vector<3x128xbf16> to vector<2x32xbf16>
    %c128 = arith.constant 128 : index
    %c0_17 = arith.constant 0 : index
    %23 = vector.load %arg2[%c128, %c0_17] : memref<288x64xbf16, #tpu.memory_space<vmem>>, vector<32x64xbf16>
    %cst_18 = arith.constant dense<0.000000e+00> : vector<2x64xf32>
    %24 = tpu.matmul %22, %23, %cst_18 {dimension_numbers = #tpu.dot_dimension_numbers<[1], [0], [0], [1], [0, 0, 1, 1], [], []>} : vector<2x32xbf16>, vector<32x64xbf16>, vector<2x64xf32> -> vector<2x64xf32>
    %25 = arith.addf %21, %24 : vector<2x64xf32>
    %26 = vector.extract_strided_slice %2 {offsets = [1, 64], sizes = [2, 32], strides = [1, 1]} : vector<3x128xbf16> to vector<2x32xbf16>
    %c160 = arith.constant 160 : index
    %c0_19 = arith.constant 0 : index
    %27 = vector.load %arg2[%c160, %c0_19] : memref<288x64xbf16, #tpu.memory_space<vmem>>, vector<32x64xbf16>
    %cst_20 = arith.constant dense<0.000000e+00> : vector<2x64xf32>
    %28 = tpu.matmul %26, %27, %cst_20 {dimension_numbers = #tpu.dot_dimension_numbers<[1], [0], [0], [1], [0, 0, 1, 1], [], []>} : vector<2x32xbf16>, vector<32x64xbf16>, vector<2x64xf32> -> vector<2x64xf32>
    %29 = arith.addf %25, %28 : vector<2x64xf32>
    %30 = vector.extract_strided_slice %4 {offsets = [0, 0], sizes = [2, 32], strides = [1, 1]} : vector<3x128xbf16> to vector<2x32xbf16>
    %c192 = arith.constant 192 : index
    %c0_21 = arith.constant 0 : index
    %31 = vector.load %arg2[%c192, %c0_21] : memref<288x64xbf16, #tpu.memory_space<vmem>>, vector<32x64xbf16>
    %cst_22 = arith.constant dense<0.000000e+00> : vector<2x64xf32>
    %32 = tpu.matmul %30, %31, %cst_22 {dimension_numbers = #tpu.dot_dimension_numbers<[1], [0], [0], [1], [0, 0, 1, 1], [], []>} : vector<2x32xbf16>, vector<32x64xbf16>, vector<2x64xf32> -> vector<2x64xf32>
    %33 = arith.addf %29, %32 : vector<2x64xf32>
    %34 = vector.extract_strided_slice %4 {offsets = [0, 32], sizes = [2, 32], strides = [1, 1]} : vector<3x128xbf16> to vector<2x32xbf16>
    %c224 = arith.constant 224 : index
    %c0_23 = arith.constant 0 : index
    %35 = vector.load %arg2[%c224, %c0_23] : memref<288x64xbf16, #tpu.memory_space<vmem>>, vector<32x64xbf16>
    %cst_24 = arith.constant dense<0.000000e+00> : vector<2x64xf32>
    %36 = tpu.matmul %34, %35, %cst_24 {dimension_numbers = #tpu.dot_dimension_numbers<[1], [0], [0], [1], [0, 0, 1, 1], [], []>} : vector<2x32xbf16>, vector<32x64xbf16>, vector<2x64xf32> -> vector<2x64xf32>
    %37 = arith.addf %33, %36 : vector<2x64xf32>
    %38 = vector.extract_strided_slice %4 {offsets = [1, 0], sizes = [2, 32], strides = [1, 1]} : vector<3x128xbf16> to vector<2x32xbf16>
    %c256 = arith.constant 256 : index
    %c0_25 = arith.constant 0 : index
    %39 = vector.load %arg2[%c256, %c0_25] : memref<288x64xbf16, #tpu.memory_space<vmem>>, vector<32x64xbf16>
    %cst_26 = arith.constant dense<0.000000e+00> : vector<2x64xf32>
    %40 = tpu.matmul %38, %39, %cst_26 {dimension_numbers = #tpu.dot_dimension_numbers<[1], [0], [0], [1], [0, 0, 1, 1], [], []>} : vector<2x32xbf16>, vector<32x64xbf16>, vector<2x64xf32> -> vector<2x64xf32>
    %41 = arith.addf %37, %40 : vector<2x64xf32>
    %42 = vector.broadcast %0 : vector<1x64xf32> to vector<2x64xf32>
    %43 = arith.addf %41, %42 : vector<2x64xf32>
    %cst_27 = arith.constant 2.500000e-01 : f32
    %44 = vector.broadcast %cst_27 : f32 to vector<2x64xf32>
    %45 = arith.mulf %44, %43 : vector<2x64xf32>
    %46 = arith.maximumf %43, %45 : vector<2x64xf32>
    %47 = arith.truncf %46 : vector<2x64xf32> to vector<2x64xbf16>
    %c0_28 = arith.constant 0 : index
    %c0_29 = arith.constant 0 : index
    %c0_30 = arith.constant 0 : index
    %c0_31 = arith.constant 0 : index
    %48 = vector.load %arg4[%c0_28, %c0_29, %c0_30, %c0_31] : memref<1x2x2x64xbf16, #tpu.memory_space<vmem>>, vector<1x1x2x64xbf16>
    %49 = vector.shape_cast %48 : vector<1x1x2x64xbf16> to vector<2x64xbf16>
    %50 = vector.shape_cast %47 : vector<2x64xbf16> to vector<1x1x2x64xbf16>
    tpu.vector_store %arg4[%c0_28, %c0_29, %c0_30, %c0_31], %50 {strides = array<i32>} : memref<1x2x2x64xbf16, #tpu.memory_space<vmem>>, vector<1x1x2x64xbf16>,
    %c0_32 = arith.constant 0 : index
    %c1_33 = arith.constant 1 : index
    %c0_34 = arith.constant 0 : index
    %c0_35 = arith.constant 0 : index
    %51 = vector.load %arg1[%c0_32, %c1_33, %c0_34, %c0_35] : memref<1x3x3x128xbf16, #tpu.memory_space<vmem>>, vector<1x1x3x128xbf16>
    %52 = vector.shape_cast %51 : vector<1x1x3x128xbf16> to vector<3x128xbf16>
    %c0_36 = arith.constant 0 : index
    %c2 = arith.constant 2 : index
    %c0_37 = arith.constant 0 : index
    %c0_38 = arith.constant 0 : index
    %53 = vector.load %arg1[%c0_36, %c2, %c0_37, %c0_38] : memref<1x3x3x128xbf16, #tpu.memory_space<vmem>>, vector<1x1x3x128xbf16>
    %54 = vector.shape_cast %53 : vector<1x1x3x128xbf16> to vector<3x128xbf16>
    %cst_39 = arith.constant 0.000000e+00 : f32
    %55 = vector.broadcast %cst_39 : f32 to vector<2x64xf32>
    %56 = vector.extract_strided_slice %52 {offsets = [0, 0], sizes = [2, 32], strides = [1, 1]} : vector<3x128xbf16> to vector<2x32xbf16>
    %c0_40 = arith.constant 0 : index
    %c0_41 = arith.constant 0 : index
    %57 = vector.load %arg2[%c0_40, %c0_41] : memref<288x64xbf16, #tpu.memory_space<vmem>>, vector<32x64xbf16>
    %cst_42 = arith.constant dense<0.000000e+00> : vector<2x64xf32>
    %58 = tpu.matmul %56, %57, %cst_42 {dimension_numbers = #tpu.dot_dimension_numbers<[1], [0], [0], [1], [0, 0, 1, 1], [], []>} : vector<2x32xbf16>, vector<32x64xbf16>, vector<2x64xf32> -> vector<2x64xf32>
    %59 = arith.addf %55, %58 : vector<2x64xf32>
    %60 = vector.extract_strided_slice %52 {offsets = [0, 32], sizes = [2, 32], strides = [1, 1]} : vector<3x128xbf16> to vector<2x32xbf16>
    %c32_43 = arith.constant 32 : index
    %c0_44 = arith.constant 0 : index
    %61 = vector.load %arg2[%c32_43, %c0_44] : memref<288x64xbf16, #tpu.memory_space<vmem>>, vector<32x64xbf16>
    %cst_45 = arith.constant dense<0.000000e+00> : vector<2x64xf32>
    %62 = tpu.matmul %60, %61, %cst_45 {dimension_numbers = #tpu.dot_dimension_numbers<[1], [0], [0], [1], [0, 0, 1, 1], [], []>} : vector<2x32xbf16>, vector<32x64xbf16>, vector<2x64xf32> -> vector<2x64xf32>
    %63 = arith.addf %59, %62 : vector<2x64xf32>
    %64 = vector.extract_strided_slice %52 {offsets = [1, 0], sizes = [2, 32], strides = [1, 1]} : vector<3x128xbf16> to vector<2x32xbf16>
    %c64_46 = arith.constant 64 : index
    %c0_47 = arith.constant 0 : index
    %65 = vector.load %arg2[%c64_46, %c0_47] : memref<288x64xbf16, #tpu.memory_space<vmem>>, vector<32x64xbf16>
    %cst_48 = arith.constant dense<0.000000e+00> : vector<2x64xf32>
    %66 = tpu.matmul %64, %65, %cst_48 {dimension_numbers = #tpu.dot_dimension_numbers<[1], [0], [0], [1], [0, 0, 1, 1], [], []>} : vector<2x32xbf16>, vector<32x64xbf16>, vector<2x64xf32> -> vector<2x64xf32>
    %67 = arith.addf %63, %66 : vector<2x64xf32>
    %68 = vector.extract_strided_slice %52 {offsets = [0, 64], sizes = [2, 32], strides = [1, 1]} : vector<3x128xbf16> to vector<2x32xbf16>
    %c96_49 = arith.constant 96 : index
    %c0_50 = arith.constant 0 : index
    %69 = vector.load %arg2[%c96_49, %c0_50] : memref<288x64xbf16, #tpu.memory_space<vmem>>, vector<32x64xbf16>
    %cst_51 = arith.constant dense<0.000000e+00> : vector<2x64xf32>
    %70 = tpu.matmul %68, %69, %cst_51 {dimension_numbers = #tpu.dot_dimension_numbers<[1], [0], [0], [1], [0, 0, 1, 1], [], []>} : vector<2x32xbf16>, vector<32x64xbf16>, vector<2x64xf32> -> vector<2x64xf32>
    %71 = arith.addf %67, %70 : vector<2x64xf32>
    %72 = vector.extract_strided_slice %52 {offsets = [0, 96], sizes = [2, 32], strides = [1, 1]} : vector<3x128xbf16> to vector<2x32xbf16>
    %c128_52 = arith.constant 128 : index
    %c0_53 = arith.constant 0 : index
    %73 = vector.load %arg2[%c128_52, %c0_53] : memref<288x64xbf16, #tpu.memory_space<vmem>>, vector<32x64xbf16>
    %cst_54 = arith.constant dense<0.000000e+00> : vector<2x64xf32>
    %74 = tpu.matmul %72, %73, %cst_54 {dimension_numbers = #tpu.dot_dimension_numbers<[1], [0], [0], [1], [0, 0, 1, 1], [], []>} : vector<2x32xbf16>, vector<32x64xbf16>, vector<2x64xf32> -> vector<2x64xf32>
    %75 = arith.addf %71, %74 : vector<2x64xf32>
    %76 = vector.extract_strided_slice %52 {offsets = [1, 64], sizes = [2, 32], strides = [1, 1]} : vector<3x128xbf16> to vector<2x32xbf16>
    %c160_55 = arith.constant 160 : index
    %c0_56 = arith.constant 0 : index
    %77 = vector.load %arg2[%c160_55, %c0_56] : memref<288x64xbf16, #tpu.memory_space<vmem>>, vector<32x64xbf16>
    %cst_57 = arith.constant dense<0.000000e+00> : vector<2x64xf32>
    %78 = tpu.matmul %76, %77, %cst_57 {dimension_numbers = #tpu.dot_dimension_numbers<[1], [0], [0], [1], [0, 0, 1, 1], [], []>} : vector<2x32xbf16>, vector<32x64xbf16>, vector<2x64xf32> -> vector<2x64xf32>
    %79 = arith.addf %75, %78 : vector<2x64xf32>
    %80 = vector.extract_strided_slice %54 {offsets = [0, 0], sizes = [2, 32], strides = [1, 1]} : vector<3x128xbf16> to vector<2x32xbf16>
    %c192_58 = arith.constant 192 : index
    %c0_59 = arith.constant 0 : index
    %81 = vector.load %arg2[%c192_58, %c0_59] : memref<288x64xbf16, #tpu.memory_space<vmem>>, vector<32x64xbf16>
    %cst_60 = arith.constant dense<0.000000e+00> : vector<2x64xf32>
    %82 = tpu.matmul %80, %81, %cst_60 {dimension_numbers = #tpu.dot_dimension_numbers<[1], [0], [0], [1], [0, 0, 1, 1], [], []>} : vector<2x32xbf16>, vector<32x64xbf16>, vector<2x64xf32> -> vector<2x64xf32>
    %83 = arith.addf %79, %82 : vector<2x64xf32>
    %84 = vector.extract_strided_slice %54 {offsets = [0, 32], sizes = [2, 32], strides = [1, 1]} : vector<3x128xbf16> to vector<2x32xbf16>
    %c224_61 = arith.constant 224 : index
    %c0_62 = arith.constant 0 : index
    %85 = vector.load %arg2[%c224_61, %c0_62] : memref<288x64xbf16, #tpu.memory_space<vmem>>, vector<32x64xbf16>
    %cst_63 = arith.constant dense<0.000000e+00> : vector<2x64xf32>
    %86 = tpu.matmul %84, %85, %cst_63 {dimension_numbers = #tpu.dot_dimension_numbers<[1], [0], [0], [1], [0, 0, 1, 1], [], []>} : vector<2x32xbf16>, vector<32x64xbf16>, vector<2x64xf32> -> vector<2x64xf32>
    %87 = arith.addf %83, %86 : vector<2x64xf32>
    %88 = vector.extract_strided_slice %54 {offsets = [1, 0], sizes = [2, 32], strides = [1, 1]} : vector<3x128xbf16> to vector<2x32xbf16>
    %c256_64 = arith.constant 256 : index
    %c0_65 = arith.constant 0 : index
    %89 = vector.load %arg2[%c256_64, %c0_65] : memref<288x64xbf16, #tpu.memory_space<vmem>>, vector<32x64xbf16>
    %cst_66 = arith.constant dense<0.000000e+00> : vector<2x64xf32>
    %90 = tpu.matmul %88, %89, %cst_66 {dimension_numbers = #tpu.dot_dimension_numbers<[1], [0], [0], [1], [0, 0, 1, 1], [], []>} : vector<2x32xbf16>, vector<32x64xbf16>, vector<2x64xf32> -> vector<2x64xf32>
    %91 = arith.addf %87, %90 : vector<2x64xf32>
    %92 = vector.broadcast %0 : vector<1x64xf32> to vector<2x64xf32>
    %93 = arith.addf %91, %92 : vector<2x64xf32>
    %cst_67 = arith.constant 2.500000e-01 : f32
    %94 = vector.broadcast %cst_67 : f32 to vector<2x64xf32>
    %95 = arith.mulf %94, %93 : vector<2x64xf32>
    %96 = arith.maximumf %93, %95 : vector<2x64xf32>
    %97 = arith.truncf %96 : vector<2x64xf32> to vector<2x64xbf16>
    %c0_68 = arith.constant 0 : index
    %c1_69 = arith.constant 1 : index
    %c0_70 = arith.constant 0 : index
    %c0_71 = arith.constant 0 : index
    %98 = vector.load %arg4[%c0_68, %c1_69, %c0_70, %c0_71] : memref<1x2x2x64xbf16, #tpu.memory_space<vmem>>, vector<1x1x2x64xbf16>
    %99 = vector.shape_cast %98 : vector<1x1x2x64xbf16> to vector<2x64xbf16>
    %100 = vector.shape_cast %97 : vector<2x64xbf16> to vector<1x1x2x64xbf16>
    tpu.vector_store %arg4[%c0_68, %c1_69, %c0_70, %c0_71], %100 {strides = array<i32>} : memref<1x2x2x64xbf16, #tpu.memory_space<vmem>>, vector<1x1x2x64xbf16>,
    return
  }
  func.func @transform_0(%arg0: i32) -> (i32, i32, i32, i32) {
    %c0_i32 = arith.constant 0 : i32
    %c0_i32_0 = arith.constant 0 : i32
    %c0_i32_1 = arith.constant 0 : i32
    %c0_i32_2 = arith.constant 0 : i32
    return %arg0, %c0_i32, %c0_i32_0, %c0_i32_1 : i32, i32, i32, i32
  }
  func.func @transform_1(%arg0: i32) -> (i32, i32) {
    %c0_i32 = arith.constant 0 : i32
    %c0_i32_0 = arith.constant 0 : i32
    %c0_i32_1 = arith.constant 0 : i32
    return %c0_i32, %c0_i32_0 : i32, i32
  }
  func.func @transform_2(%arg0: i32) -> (i32, i32) {
    %c0_i32 = arith.constant 0 : i32
    %c0_i32_0 = arith.constant 0 : i32
    %c0_i32_1 = arith.constant 0 : i32
    return %c0_i32, %c0_i32_0 : i32, i32
  }
  func.func @transform_3(%arg0: i32) -> (i32, i32, i32, i32) {
    %c0_i32 = arith.constant 0 : i32
    %c0_i32_0 = arith.constant 0 : i32
    %c0_i32_1 = arith.constant 0 : i32
    %c0_i32_2 = arith.constant 0 : i32
    return %arg0, %c0_i32, %c0_i32_0, %c0_i32_1 : i32, i32, i32, i32
  }
}

module attributes {stable_mosaic.version = 11 : i64} {
  func.func @_conv3x3_s2_kernel(%arg0: i32, %arg1: memref<1x2x2x256xbf16, #tpu.memory_space<vmem>>, %arg2: memref<576x128xbf16, #tpu.memory_space<vmem>>, %arg3: memref<1x128xf32, #tpu.memory_space<vmem>>, %arg4: memref<1x1x1x128xf32, #tpu.memory_space<vmem>>) attributes {dimension_semantics = [#tpu.dimension_semantics<parallel>], iteration_bounds = array<i64: 2>, scalar_prefetch = 0 : i64, scratch_operands = 0 : i64, tpu.core_type = #tpu.core_type<tc>, window_params = [{transform_indices = @transform_0, window_bounds = array<i64: 1, 2, 2, 256>}, {pipeline_mode = #tpu.pipeline_mode<synchronous>, transform_indices = @transform_1, window_bounds = array<i64: 576, 128>}, {pipeline_mode = #tpu.pipeline_mode<synchronous>, transform_indices = @transform_2, window_bounds = array<i64: 1, 128>}, {transform_indices = @transform_3, window_bounds = array<i64: 1, 1, 1, 128>}]} {
    %c0 = arith.constant 0 : index
    %c0_0 = arith.constant 0 : index
    %0 = vector.load %arg3[%c0, %c0_0] : memref<1x128xf32, #tpu.memory_space<vmem>>, vector<1x128xf32>
    %c0_1 = arith.constant 0 : index
    %c0_2 = arith.constant 0 : index
    %c0_3 = arith.constant 0 : index
    %c0_4 = arith.constant 0 : index
    %1 = vector.load %arg1[%c0_1, %c0_2, %c0_3, %c0_4] : memref<1x2x2x256xbf16, #tpu.memory_space<vmem>>, vector<1x1x2x256xbf16>
    %2 = vector.shape_cast %1 : vector<1x1x2x256xbf16> to vector<2x256xbf16>
    %c0_5 = arith.constant 0 : index
    %c1 = arith.constant 1 : index
    %c0_6 = arith.constant 0 : index
    %c0_7 = arith.constant 0 : index
    %3 = vector.load %arg1[%c0_5, %c1, %c0_6, %c0_7] : memref<1x2x2x256xbf16, #tpu.memory_space<vmem>>, vector<1x1x2x256xbf16>
    %4 = vector.shape_cast %3 : vector<1x1x2x256xbf16> to vector<2x256xbf16>
    %cst = arith.constant 0.000000e+00 : f32
    %5 = vector.broadcast %cst : f32 to vector<1x128xf32>
    %6 = vector.extract_strided_slice %2 {offsets = [0, 0], sizes = [1, 64], strides = [1, 1]} : vector<2x256xbf16> to vector<1x64xbf16>
    %c0_8 = arith.constant 0 : index
    %c0_9 = arith.constant 0 : index
    %7 = vector.load %arg2[%c0_8, %c0_9] : memref<576x128xbf16, #tpu.memory_space<vmem>>, vector<64x128xbf16>
    %cst_10 = arith.constant dense<0.000000e+00> : vector<1x128xf32>
    %8 = tpu.matmul %6, %7, %cst_10 {dimension_numbers = #tpu.dot_dimension_numbers<[1], [0], [0], [1], [0, 0, 1, 1], [], []>} : vector<1x64xbf16>, vector<64x128xbf16>, vector<1x128xf32> -> vector<1x128xf32>
    %9 = arith.addf %5, %8 : vector<1x128xf32>
    %10 = vector.extract_strided_slice %2 {offsets = [0, 64], sizes = [1, 64], strides = [1, 1]} : vector<2x256xbf16> to vector<1x64xbf16>
    %c64 = arith.constant 64 : index
    %c0_11 = arith.constant 0 : index
    %11 = vector.load %arg2[%c64, %c0_11] : memref<576x128xbf16, #tpu.memory_space<vmem>>, vector<64x128xbf16>
    %cst_12 = arith.constant dense<0.000000e+00> : vector<1x128xf32>
    %12 = tpu.matmul %10, %11, %cst_12 {dimension_numbers = #tpu.dot_dimension_numbers<[1], [0], [0], [1], [0, 0, 1, 1], [], []>} : vector<1x64xbf16>, vector<64x128xbf16>, vector<1x128xf32> -> vector<1x128xf32>
    %13 = arith.addf %9, %12 : vector<1x128xf32>
    %14 = vector.extract_strided_slice %2 {offsets = [1, 0], sizes = [1, 64], strides = [1, 1]} : vector<2x256xbf16> to vector<1x64xbf16>
    %c128 = arith.constant 128 : index
    %c0_13 = arith.constant 0 : index
    %15 = vector.load %arg2[%c128, %c0_13] : memref<576x128xbf16, #tpu.memory_space<vmem>>, vector<64x128xbf16>
    %cst_14 = arith.constant dense<0.000000e+00> : vector<1x128xf32>
    %16 = tpu.matmul %14, %15, %cst_14 {dimension_numbers = #tpu.dot_dimension_numbers<[1], [0], [0], [1], [0, 0, 1, 1], [], []>} : vector<1x64xbf16>, vector<64x128xbf16>, vector<1x128xf32> -> vector<1x128xf32>
    %17 = arith.addf %13, %16 : vector<1x128xf32>
    %18 = vector.extract_strided_slice %2 {offsets = [0, 128], sizes = [1, 64], strides = [1, 1]} : vector<2x256xbf16> to vector<1x64xbf16>
    %c192 = arith.constant 192 : index
    %c0_15 = arith.constant 0 : index
    %19 = vector.load %arg2[%c192, %c0_15] : memref<576x128xbf16, #tpu.memory_space<vmem>>, vector<64x128xbf16>
    %cst_16 = arith.constant dense<0.000000e+00> : vector<1x128xf32>
    %20 = tpu.matmul %18, %19, %cst_16 {dimension_numbers = #tpu.dot_dimension_numbers<[1], [0], [0], [1], [0, 0, 1, 1], [], []>} : vector<1x64xbf16>, vector<64x128xbf16>, vector<1x128xf32> -> vector<1x128xf32>
    %21 = arith.addf %17, %20 : vector<1x128xf32>
    %22 = vector.extract_strided_slice %2 {offsets = [0, 192], sizes = [1, 64], strides = [1, 1]} : vector<2x256xbf16> to vector<1x64xbf16>
    %c256 = arith.constant 256 : index
    %c0_17 = arith.constant 0 : index
    %23 = vector.load %arg2[%c256, %c0_17] : memref<576x128xbf16, #tpu.memory_space<vmem>>, vector<64x128xbf16>
    %cst_18 = arith.constant dense<0.000000e+00> : vector<1x128xf32>
    %24 = tpu.matmul %22, %23, %cst_18 {dimension_numbers = #tpu.dot_dimension_numbers<[1], [0], [0], [1], [0, 0, 1, 1], [], []>} : vector<1x64xbf16>, vector<64x128xbf16>, vector<1x128xf32> -> vector<1x128xf32>
    %25 = arith.addf %21, %24 : vector<1x128xf32>
    %26 = vector.extract_strided_slice %2 {offsets = [1, 128], sizes = [1, 64], strides = [1, 1]} : vector<2x256xbf16> to vector<1x64xbf16>
    %c320 = arith.constant 320 : index
    %c0_19 = arith.constant 0 : index
    %27 = vector.load %arg2[%c320, %c0_19] : memref<576x128xbf16, #tpu.memory_space<vmem>>, vector<64x128xbf16>
    %cst_20 = arith.constant dense<0.000000e+00> : vector<1x128xf32>
    %28 = tpu.matmul %26, %27, %cst_20 {dimension_numbers = #tpu.dot_dimension_numbers<[1], [0], [0], [1], [0, 0, 1, 1], [], []>} : vector<1x64xbf16>, vector<64x128xbf16>, vector<1x128xf32> -> vector<1x128xf32>
    %29 = arith.addf %25, %28 : vector<1x128xf32>
    %30 = vector.extract_strided_slice %4 {offsets = [0, 0], sizes = [1, 64], strides = [1, 1]} : vector<2x256xbf16> to vector<1x64xbf16>
    %c384 = arith.constant 384 : index
    %c0_21 = arith.constant 0 : index
    %31 = vector.load %arg2[%c384, %c0_21] : memref<576x128xbf16, #tpu.memory_space<vmem>>, vector<64x128xbf16>
    %cst_22 = arith.constant dense<0.000000e+00> : vector<1x128xf32>
    %32 = tpu.matmul %30, %31, %cst_22 {dimension_numbers = #tpu.dot_dimension_numbers<[1], [0], [0], [1], [0, 0, 1, 1], [], []>} : vector<1x64xbf16>, vector<64x128xbf16>, vector<1x128xf32> -> vector<1x128xf32>
    %33 = arith.addf %29, %32 : vector<1x128xf32>
    %34 = vector.extract_strided_slice %4 {offsets = [0, 64], sizes = [1, 64], strides = [1, 1]} : vector<2x256xbf16> to vector<1x64xbf16>
    %c448 = arith.constant 448 : index
    %c0_23 = arith.constant 0 : index
    %35 = vector.load %arg2[%c448, %c0_23] : memref<576x128xbf16, #tpu.memory_space<vmem>>, vector<64x128xbf16>
    %cst_24 = arith.constant dense<0.000000e+00> : vector<1x128xf32>
    %36 = tpu.matmul %34, %35, %cst_24 {dimension_numbers = #tpu.dot_dimension_numbers<[1], [0], [0], [1], [0, 0, 1, 1], [], []>} : vector<1x64xbf16>, vector<64x128xbf16>, vector<1x128xf32> -> vector<1x128xf32>
    %37 = arith.addf %33, %36 : vector<1x128xf32>
    %38 = vector.extract_strided_slice %4 {offsets = [1, 0], sizes = [1, 64], strides = [1, 1]} : vector<2x256xbf16> to vector<1x64xbf16>
    %c512 = arith.constant 512 : index
    %c0_25 = arith.constant 0 : index
    %39 = vector.load %arg2[%c512, %c0_25] : memref<576x128xbf16, #tpu.memory_space<vmem>>, vector<64x128xbf16>
    %cst_26 = arith.constant dense<0.000000e+00> : vector<1x128xf32>
    %40 = tpu.matmul %38, %39, %cst_26 {dimension_numbers = #tpu.dot_dimension_numbers<[1], [0], [0], [1], [0, 0, 1, 1], [], []>} : vector<1x64xbf16>, vector<64x128xbf16>, vector<1x128xf32> -> vector<1x128xf32>
    %41 = arith.addf %37, %40 : vector<1x128xf32>
    %42 = arith.addf %41, %0 : vector<1x128xf32>
    %cst_27 = arith.constant 2.500000e-01 : f32
    %43 = vector.broadcast %cst_27 : f32 to vector<1x128xf32>
    %44 = arith.mulf %43, %42 : vector<1x128xf32>
    %45 = arith.maximumf %42, %44 : vector<1x128xf32>
    %c0_28 = arith.constant 0 : index
    %c0_29 = arith.constant 0 : index
    %c0_30 = arith.constant 0 : index
    %c0_31 = arith.constant 0 : index
    %46 = vector.load %arg4[%c0_28, %c0_29, %c0_30, %c0_31] : memref<1x1x1x128xf32, #tpu.memory_space<vmem>>, vector<1x1x1x128xf32>
    %47 = vector.shape_cast %46 : vector<1x1x1x128xf32> to vector<1x128xf32>
    %48 = vector.shape_cast %45 : vector<1x128xf32> to vector<1x1x1x128xf32>
    tpu.vector_store %arg4[%c0_28, %c0_29, %c0_30, %c0_31], %48 {strides = array<i32>} : memref<1x1x1x128xf32, #tpu.memory_space<vmem>>, vector<1x1x1x128xf32>,
    return
  }
  func.func @transform_0(%arg0: i32) -> (i32, i32, i32, i32) {
    %c0_i32 = arith.constant 0 : i32
    %c0_i32_0 = arith.constant 0 : i32
    %c0_i32_1 = arith.constant 0 : i32
    %c0_i32_2 = arith.constant 0 : i32
    return %arg0, %c0_i32, %c0_i32_0, %c0_i32_1 : i32, i32, i32, i32
  }
  func.func @transform_1(%arg0: i32) -> (i32, i32) {
    %c0_i32 = arith.constant 0 : i32
    %c0_i32_0 = arith.constant 0 : i32
    %c0_i32_1 = arith.constant 0 : i32
    return %c0_i32, %c0_i32_0 : i32, i32
  }
  func.func @transform_2(%arg0: i32) -> (i32, i32) {
    %c0_i32 = arith.constant 0 : i32
    %c0_i32_0 = arith.constant 0 : i32
    %c0_i32_1 = arith.constant 0 : i32
    return %c0_i32, %c0_i32_0 : i32, i32
  }
  func.func @transform_3(%arg0: i32) -> (i32, i32, i32, i32) {
    %c0_i32 = arith.constant 0 : i32
    %c0_i32_0 = arith.constant 0 : i32
    %c0_i32_1 = arith.constant 0 : i32
    %c0_i32_2 = arith.constant 0 : i32
    return %arg0, %c0_i32, %c0_i32_0, %c0_i32_1 : i32, i32, i32, i32
  }
}

module attributes {stable_mosaic.version = 11 : i64} {
  func.func @_heads_kernel(%arg0: i32, %arg1: memref<2x128xbf16, #tpu.memory_space<vmem>>, %arg2: memref<128x9xbf16, #tpu.memory_space<vmem>>, %arg3: memref<1x9xf32, #tpu.memory_space<vmem>>, %arg4: memref<2x9xf32, #tpu.memory_space<vmem>>) attributes {dimension_semantics = [#tpu.dimension_semantics<parallel>], iteration_bounds = array<i64: 1>, scalar_prefetch = 0 : i64, scratch_operands = 0 : i64, tpu.core_type = #tpu.core_type<tc>, window_params = [{transform_indices = @transform_0, window_bounds = array<i64: 2, 128>}, {pipeline_mode = #tpu.pipeline_mode<synchronous>, transform_indices = @transform_1, window_bounds = array<i64: 128, 9>}, {pipeline_mode = #tpu.pipeline_mode<synchronous>, transform_indices = @transform_2, window_bounds = array<i64: 1, 9>}, {transform_indices = @transform_3, window_bounds = array<i64: 2, 9>}]} {
    %c0 = arith.constant 0 : index
    %c0_0 = arith.constant 0 : index
    %0 = vector.load %arg1[%c0, %c0_0] : memref<2x128xbf16, #tpu.memory_space<vmem>>, vector<2x128xbf16>
    %c0_1 = arith.constant 0 : index
    %c0_2 = arith.constant 0 : index
    %1 = vector.load %arg2[%c0_1, %c0_2] : memref<128x9xbf16, #tpu.memory_space<vmem>>, vector<128x9xbf16>
    %cst = arith.constant dense<0.000000e+00> : vector<2x9xf32>
    %2 = tpu.matmul %0, %1, %cst {dimension_numbers = #tpu.dot_dimension_numbers<[1], [0], [0], [1], [0, 0, 1, 1], [], []>} : vector<2x128xbf16>, vector<128x9xbf16>, vector<2x9xf32> -> vector<2x9xf32>
    %c0_3 = arith.constant 0 : index
    %c0_4 = arith.constant 0 : index
    %3 = vector.load %arg3[%c0_3, %c0_4] : memref<1x9xf32, #tpu.memory_space<vmem>>, vector<1x9xf32>
    %4 = vector.broadcast %3 : vector<1x9xf32> to vector<2x9xf32>
    %5 = arith.addf %2, %4 : vector<2x9xf32>
    %c0_5 = arith.constant 0 : index
    %c0_6 = arith.constant 0 : index
    %6 = vector.load %arg4[%c0_5, %c0_6] : memref<2x9xf32, #tpu.memory_space<vmem>>, vector<2x9xf32>
    tpu.vector_store %arg4[%c0_5, %c0_6], %5 {strides = array<i32>} : memref<2x9xf32, #tpu.memory_space<vmem>>, vector<2x9xf32>,
    return
  }
  func.func @transform_0(%arg0: i32) -> (i32, i32) {
    %c0_i32 = arith.constant 0 : i32
    %c0_i32_0 = arith.constant 0 : i32
    return %arg0, %c0_i32 : i32, i32
  }
  func.func @transform_1(%arg0: i32) -> (i32, i32) {
    %c0_i32 = arith.constant 0 : i32
    %c0_i32_0 = arith.constant 0 : i32
    %c0_i32_1 = arith.constant 0 : i32
    return %c0_i32, %c0_i32_0 : i32, i32
  }
  func.func @transform_2(%arg0: i32) -> (i32, i32) {
    %c0_i32 = arith.constant 0 : i32
    %c0_i32_0 = arith.constant 0 : i32
    %c0_i32_1 = arith.constant 0 : i32
    return %c0_i32, %c0_i32_0 : i32, i32
  }
  func.func @transform_3(%arg0: i32) -> (i32, i32) {
    %c0_i32 = arith.constant 0 : i32
    %c0_i32_0 = arith.constant 0 : i32
    return %arg0, %c0_i32 : i32, i32
  }
}

</mosaic_0001>

<bundles_post_ra>
// kernel: discriminator_forward.6
= control target key start
LH: loop header
LB: loop body
LE: loop exit
PB: predicated region body
PF: predicated region fallthrough
CT: control target
= control target key end

     0   :  { %s1561_s12 = smov 0   ;;  %s1835_s0 = inlined_call_operand.vmem [shape: bf16[2,5,5,64], index: 0, kind: input, shape index: {}]   ;;  %s1836_s1 = inlined_call_operand.vmem [shape: bf16[144,32], index: 1, kind: input, shape index: {}]   ;;  %s1837_s2 = inlined_call_operand.vmem [shape: f32[1,32], index: 2, kind: input, shape index: {}]   ;;  %s1838_s3 = inlined_call_operand.vmem [shape: bf16[2,4,4,32], index: 3, kind: output, shape index: {}]  }
   0x1 LB: > { %s1280_s13 = sadd.s32 4294967295, %s1536_s12   ;;  %p1284_p0 = scmp.ge.s32.totalorder %s1536_s12, 1  ;;  %s1536_s12 = sphi %s1561_s12, %s13_s12  }
   0x2   : > { %p137_p1 = scmp.lt.s32.totalorder %s1536_s12, 3 }
   0x4   : > { %p138_p2 = pnand %p1284_p0, %p137_p1 }
   0x5   : > { %p161_p3 = scmp.lt.s32.totalorder (!%p138_p2), %s1280_s13, 1  ;;  %s1538_s18 = smov (!%p138_p2), 112  }
   0x6   : > { %141 = sbr.rel (%p138_p2) target bundleno = 414 (0x19e), region = 32  ;;  %s1539_s19 = smov (!%p138_p2), 80  }
   0x7   : > { %s1540_s20 = smov (!%p138_p2), 96  }
   0xb   : > { %s1840_s13 = smov (!%p161_p3, %s1280_s13), 1  ;;  %v1483_v16 = vld [vmem:[%s1836_s1 + $0x10] sm:$0xff]  ;;  %v1482_v17 = vld [vmem:[%s1836_s1 + $0x8] sm:$0xff]  ;;  %v1481_v18 = vld [vmem:[%s1836_s1] sm:$0xff]  ;;  %vm191_vm0 = vcmask 130048   ;;  %vm437_vm1 = vcmask 254976  }
   0xc   : > { %s1517_s14 = smul.u32 20, %s1840_s13  ;;  %255 = vmatpush.bf16.msra.mxu2 %v1483_v16  ;;  %202 = vmatpush.bf16.msra.mxu0 %v1482_v17  ;;  %v1484_v36 = vld [vmem:[%s1836_s1 + $0x18] sm:$0xff]  ;;  %v1487_v37 = vld [vmem:[%s1836_s1 + $0x30] sm:$0xff]  ;;  %v1485_v41 = vld [vmem:[%s1836_s1 + $0x20] sm:$0xff] }
   0xd   : > { %224 = vmatpush.bf16.msra.mxu1 %v1481_v18  ;;  %282 = vmatpush.bf16.msra.mxu3 %v1484_v36  ;;  %v1488_v42 = vld [vmem:[%s1836_s1 + $0x38] sm:$0xff]  ;;  %v1486_v43 = vld [vmem:[%s1836_s1 + $0x28] sm:$0xff]  ;;  %v1490_v49 = vld [vmem:[%s1836_s1] sm:$0xff] }
   0xe   : > { %s1575_s17 = scalar_lea.vmem %s1835_s0, %s1517_s14  ;;  %v1491_v50 = vld [vmem:[%s1836_s1 + $0x8] sm:$0xff]  ;;  %v1489_v51 = vld [vmem:[%s1836_s1 + $0x40] sm:$0xff]  ;;  %v1492_v55 = vld [vmem:[%s1836_s1 + $0x10] sm:$0xff] }
   0xf   : > { %v173_v0 = vld [vmem:[%s1575_s17] sm:$0x7]  ;;  %v1579_v1 = vld [vmem:[%s1575_s17 + $0x4] sm:$0x7]  ;;  %v1604_v19 = vld [vmem:[%s1575_s17 + $0x8] sm:$0x7] }
  0x10   : > { %v181_v2 = vunpack.c.l.b16 %v173_v0  ;;  %v447_v3 = vunpack.c.l.b16 %v1579_v1  ;;  %v1583_v4 = vld [vmem:[%s1575_s17 + $0x4] sm:$0x7]  ;;  %v1609_v21 = vld [vmem:[%s1575_s17 + $0x8] sm:$0x7]  ;;  %v709_v22 = vunpack.c.l.b16 %v1604_v19  ;;  %1298 = vmatmul.msk.bf16.vlgmr.msra.gmra.mxu1 %vm191_vm0, %v173_v0  ;;  %v1628_v30 = vld [vmem:[%s1575_s17 + $0xc] sm:$0x7]  ;;  %361 = vmatpush.bf16.msrb.mxu2 %v1487_v37 }
  0x11   : > { %v371_v6 = vunpack.c.l.b16 %v1583_v4  ;;  %v636_v23 = vunpack.c.l.b16 %v1609_v21  ;;  %v1631_v31 = vld [vmem:[%s1575_s17 + $0xc] sm:$0x7]  ;;  %v898_v32 = vunpack.c.l.b16 %v1628_v30  ;;  %v1655_v38 = vld [vmem:[%s1575_s17 + $0x10] sm:$0x7]  ;;  %309 = vmatpush.bf16.msrb.mxu0 %v1485_v41  ;;  %391 = vmatpush.bf16.msrb.mxu3 %v1488_v42  ;;  %v1494_v57 = vld [vmem:[%s1836_s1 + $0x20] sm:$0xff] }
  0x12   : > { %v182_v5 = vpack.c.b16 %v181_v2, %v181_v2  ;;  %v448_v9 = vpack.c.b16 %v447_v3, %v447_v3  ;;  %v710_v24 = vpack.c.b16 %v709_v22, %v709_v22  ;;  %v971_v33 = vunpack.c.l.b16 %v1631_v31  ;;  %336 = vmatpush.bf16.msrb.mxu1 %v1486_v43  ;;  %v1495_v54 = vld [vmem:[%s1836_s1 + $0x28] sm:$0xff]  ;;  %v1493_v59 = vld [vmem:[%s1836_s1 + $0x18] sm:$0xff]  ;;  %v1496_v2 = vld [vmem:[%s1836_s1 + $0x30] sm:$0xff] }
  0x13   : > { %v1588_v11 = vpack.c.b16 %v371_v6, %v371_v6  ;;  %v1619_v25 = vpack.c.b16 %v636_v23, %v636_v23  ;;  %v1639_v34 = vpack.c.b16 %v898_v32, %v898_v32  ;;  %v1160_v39 = vunpack.c.l.b16 %v1655_v38  ;;  %v1500_v62 = vld [vmem:[%s1836_s1 + $0x8] sm:$0xff]  ;;  %v1502_v16 = vld [vmem:[%s1836_s1 + $0x18] sm:$0xff]  ;;  %v1501_v17 = vld [vmem:[%s1836_s1 + $0x10] sm:$0xff] }
  0x14   : > { %183 = vrot.lane.b32.xlu0 %v182_v5, %s1538_s18  ;;  %291 = vrot.lane.b32.xlu1 %v182_v5, %s1539_s19  ;;  %v233_v7 = vshrl.u32 %v182_v5, 16  ;;  %v235_v8 = vshll.u32 %v182_v5, 16  ;;  %v500_v13 = vshll.u32 %v448_v9, 16  ;;  %v498_v14 = vshrl.u32 %v448_v9, 16  ;;  %v1510_v36 = vld [vmem:[%s1836_s1 + $0x10] sm:$0xff]  ;;  %v1508_v37 = vld [vmem:[%s1836_s1] sm:$0xff] }
  0x15   : > { %v762_v26 = vshll.u32 %v710_v24, 16  ;;  %v760_v27 = vshrl.u32 %v710_v24, 16  ;;  %v972_v35 = vpack.c.b16 %v971_v33, %v971_v33  ;;  %v1667_v45 = vpack.c.b16 %v1160_v39, %v1160_v39  ;;  %v1505_v33 = vld [vmem:[%s1836_s1 + $0x30] sm:$0xff]  ;;  %v1513_v41 = vld [vmem:[%s1836_s1 + $0x28] sm:$0xff] }
  0x16   : > { %v237_v10 = vrot.slane %v235_v8, 1  ;;  %v502_v15 = vrot.slane %v500_v13, 1  ;;  %467 = vmatpush.bf16.msra.mxu1 %v1491_v50  ;;  %v403_v63 = vshll.u32 %v1588_v11, 16  ;;  %v668_v0 = vshll.u32 %v1619_v25, 16  ;;  %v1503_v13 = vld [vmem:[%s1836_s1 + $0x20] sm:$0xff] }
  0x17   : > { %v764_v28 = vrot.slane %v762_v26, 1  ;;  %v1024_v40 = vshll.u32 %v972_v35, 16  ;;  %v1022_v44 = vshrl.u32 %v972_v35, 16  ;;  %v401_v3 = vshrl.u32 %v1588_v11, 16 }
  0x18   : > { %v238_v12 = vor.u32 %v237_v10, %v233_v7  ;;  %v1606_v20 = vor.u32 %v502_v15, %v498_v14  ;;  %v666_v6 = vshrl.u32 %v1619_v25, 16  ;;  %v670_v7 = vrot.slane %v668_v0, 1  ;;  %v1497_v10 = vld [vmem:[%s1836_s1 + $0x38] sm:$0xff]  ;;  %v1499_v14 = vld [vmem:[%s1836_s1] sm:$0xff] }
  0x19   : > { %v1625_v29 = vor.u32 %v764_v28, %v760_v27  ;;  %v1026_v46 = vrot.slane %v1024_v40, 1  ;;  %v930_v23 = vshll.u32 %v1639_v34, 16  ;;  %v1506_v28 = vld [vmem:[%s1836_s1 + $0x38] sm:$0xff]  ;;  %v1512_v40 = vld [vmem:[%s1836_s1 + $0x20] sm:$0xff] }
  0x1a   : > { %318 = vrot.lane.b32.xlu2 %v238_v12, %s1540_s20  ;;  %1303 = vmatmul.msk.bf16.vlgmr.msra.gmra.mxu2 %vm191_vm0, %v238_v12 }
  0x1b   : > { %v1671_v47 = vor.u32 %v1026_v46, %v1022_v44  ;;  %489 = vmatpush.bf16.msra.mxu2 %v1490_v49  ;;  %v932_v26 = vrot.slane %v930_v23, 1 }
  0x1c   : > { %264 = vrot.lane.b32.xlu0 %v182_v5, %s1540_s20  ;;  %373 = vrot.lane.b32.xlu1 %v1588_v11, %s1538_s18  ;;  %v1498_v5 = vld [vmem:[%s1836_s1 + $0x40] sm:$0xff] }
  0x22   : > { %449 = vrot.lane.b32.xlu2 %v448_v9, %s1538_s18 }
  0x24   : > { %583 = vrot.lane.b32.xlu0 %v1606_v20, %s1540_s20  ;;  %529 = vrot.lane.b32.xlu1 %v448_v9, %s1540_s20 }
  0x2a   : > { %556 = vrot.lane.b32.xlu2 %v448_v9, %s1539_s19  ;;  %1323 = vmatmul.msk.bf16.vlgmr.msrb.gmra.mxu2 %vm191_vm0, %v1583_v4  ;;  %v405_v4 = vrot.slane %v403_v63, 1  ;;  %v671_v9 = vor.u32 %v670_v7, %v666_v6 }
  0x2b   : > { %601 = vmatpush.bf16.msrb.mxu2 %v1495_v54 }
  0x2c   : > { %711 = vrot.lane.b32.xlu0 %v710_v24, %s1538_s18  ;;  %638 = vrot.lane.b32.xlu1 %v1619_v25, %s1538_s18  ;;  %v406_v8 = vor.u32 %v405_v4, %v401_v3  ;;  %v928_v25 = vshrl.u32 %v1639_v34, 16 }
  0x2e   : > { %v933_v32 = vor.u32 %v932_v26, %v928_v25 }
  0x32   : > { %818 = vrot.lane.b32.xlu2 %v710_v24, %s1539_s19 }
  0x34   : > { %791 = vrot.lane.b32.xlu1 %v710_v24, %s1540_s20  ;;  %845 = vrot.lane.b32.xlu0 %v1625_v29, %s1540_s20  ;;  %v1504_v24 = vld [vmem:[%s1836_s1 + $0x28] sm:$0xff] }
  0x3a   : > { %973 = vrot.lane.b32.xlu2 %v972_v35, %s1538_s18  ;;  %1345 = vmatmul.msk.bf16.vlgmr.msra.gmra.mxu2 %vm191_vm0, %v1579_v1 }
  0x3b   : > { %729 = vmatpush.bf16.msra.mxu2 %v1500_v62 }
  0x3c   : > { %900 = vrot.lane.b32.xlu0 %v1639_v34, %s1538_s18  ;;  %1053 = vrot.lane.b32.xlu1 %v972_v35, %s1540_s20 }
  0x42   : > { %1080 = vrot.lane.b32.xlu2 %v972_v35, %s1539_s19  ;;  %v1509_v35 = vld [vmem:[%s1836_s1 + $0x8] sm:$0xff] }
  0x44   : > { %1162 = vrot.lane.b32.xlu0 %v1667_v45, %s1538_s18  ;;  %1107 = vrot.lane.b32.xlu1 %v1671_v47, %s1540_s20  ;;  %s1480_s20 = sshll.u32 %s1840_s13, 3 }
  0x45   : > { %s1819_s23 = scalar_lea.vmem %s1838_s3, %s1480_s20 }
  0x74   : > { %v319_v48 = vpop.permute.xlu2 %318 }
  0x75   : > { %1318 = vmatmul.msk.bf16.vlgmr.msrb.gmra.mxu1 %vm191_vm0, %v319_v48 }
  0x76   : > { %574 = vmatpush.bf16.msrb.mxu1 %v1494_v57  ;;  %v1190_v57 = vshrl.u32 %v1667_v45, 16 }
  0x7c   : > { %v450_v53 = vpop.permute.xlu2 %449 }
  0x84   : > { %v557_v61 = vpop.permute.xlu2 %556 }
  0x85   : > { %1340 = vmatmul.msk.bf16.vlgmr.msra.gmra.mxu1 %vm191_vm0, %v450_v53  ;;  %v1192_v53 = vshll.u32 %v1667_v45, 16 }
  0x86   : > { %v184_v52 = vpop.permute.xlu0 %183  ;;  %v292_v58 = vpop.permute.xlu1 %291  ;;  %688 = vmatpush.bf16.msra.mxu1 %v1498_v5 }
  0x87   : > { %1293 = vmatmul.msk.bf16.vlgmr.msra.gmra.mxu0 %vm191_vm0, %v184_v52 }
  0x88   : > { %423 = vmatpush.bf16.msra.mxu0 %v1489_v51 }
  0x8c   : > { %v819_v18 = vpop.permute.xlu2 %818 }
  0x8d   : > { %v226_v42 = vpop.f32.mrf.mxu1 }
  0x8e   : > { %v265_v56 = vpop.permute.xlu0 %264  ;;  %v374_v1 = vpop.permute.xlu1 %373 }
  0x8f   : > { %1308 = vmatmul.msk.bf16.vlgmr.msra.gmra.mxu3 %vm191_vm0, %v265_v56 }
  0x90   : > { %520 = vmatpush.bf16.msra.mxu3 %v1492_v55 }
  0x94   : > { %v974_v46 = vpop.permute.xlu2 %973 }
  0x95   : > { %1360 = vmatmul.msk.bf16.vlgmr.msrb.gmra.mxu1 %vm191_vm0, %v557_v61  ;;  %v228_v48 = vpop.f32.mrf.mxu1 }
  0x96   : > { %v584_v60 = vpop.permute.xlu0 %583  ;;  %v530_v11 = vpop.permute.xlu1 %529  ;;  %809 = vmatpush.bf16.msrb.mxu1 %v1502_v16 }
  0x97   : > { %1313 = vmatmul.msk.bf16.vlgmr.msrb.gmra.mxu0 %vm191_vm0, %v292_v58  ;;  %1365 = vmatmul.msk.bf16.vlgmr.msrb.gmra.mxu2 %vm191_vm0, %v584_v60  ;;  %v1194_v58 = vrot.slane %v1192_v53, 1 }
  0x98   : > { %547 = vmatpush.bf16.msrb.mxu0 %v1493_v59  ;;  %836 = vmatpush.bf16.msrb.mxu2 %v1503_v13 }
  0x99   : > { %v1195_v60 = vor.u32 %v1194_v58, %v1190_v57 }
  0x9c   : > { %v1081_v51 = vpop.permute.xlu2 %1080 }
  0x9d   : > { %v257_v44 = vpop.f32.mrf.mxu2 }
  0x9e   : > { %v712_v12 = vpop.permute.xlu0 %711  ;;  %v639_v15 = vpop.permute.xlu1 %638 }
  0x9f   : > { %1328 = vmatmul.msk.bf16.vlgmr.msrb.gmra.mxu3 %vm191_vm0, %v374_v1 }
  0xa0   : > { %626 = vmatpush.bf16.msrb.mxu3 %v1496_v2 }
  0xa5   : > { %1380 = vmatmul.msk.bf16.vlgmr.msra.gmra.mxu1 %vm191_vm0, %v671_v9  ;;  %v259_v49 = vpop.f32.mrf.mxu2 }
  0xa6   : > { %v792_v22 = vpop.permute.xlu1 %791  ;;  %v846_v27 = vpop.permute.xlu0 %845  ;;  %918 = vmatpush.bf16.msra.mxu1 %v1506_v28 }
  0xa7   : > { %1333 = vmatmul.msk.bf16.vlgmr.msra.gmra.mxu0 %vm191_vm0, %v406_v8  ;;  %1388 = vmatmul.msk.bf16.vlgmr.msra.gmra.mxu2 %vm191_vm0, %v712_v12 }
  0xa8   : > { %656 = vmatpush.bf16.msra.mxu0 %v1497_v10 }
  0xae   : > { %v901_v34 = vpop.permute.xlu0 %900  ;;  %v1054_v39 = vpop.permute.xlu1 %1053 }
  0xaf   : > { %1350 = vmatmul.msk.bf16.vlgmr.msra.gmra.mxu3 %vm191_vm0, %v1606_v20  ;;  %v1507_v20 = vld [vmem:[%s1836_s1 + $0x40] sm:$0xff] }
  0xb0   : > { %751 = vmatpush.bf16.msra.mxu3 %v1499_v14  ;;  %950 = vmatpush.bf16.msra.mxu2 %v1507_v20  ;;  %v1812_v14 = vld [vmem:[%s1837_s2] ss:$0 sm:$0xff] }
  0xb5   : > { %1403 = vmatmul.msk.bf16.vlgmr.msrb.gmra.mxu1 %vm191_vm0, %v792_v22 }
  0xb6   : > { %1044 = vmatpush.bf16.msrb.mxu1 %v1510_v36  ;;  %v1163_v43 = vpop.permute.xlu0 %1162  ;;  %v1108_v55 = vpop.permute.xlu1 %1107 }
  0xb7   : > { %1355 = vmatmul.msk.bf16.vlgmr.msrb.gmra.mxu0 %vm191_vm0, %v530_v11  ;;  %1408 = vmatmul.msk.bf16.vlgmr.msrb.gmra.mxu2 %vm191_vm0, %v819_v18 }
  0xb8   : > { %782 = vmatpush.bf16.msrb.mxu0 %v1501_v17 }
  0xbf   : > { %1370 = vmatmul.msk.bf16.vlgmr.msrb.gmra.mxu3 %vm191_vm0, %v1609_v21  ;;  %v1511_v21 = vld [vmem:[%s1836_s1 + $0x18] sm:$0xff] }
  0xc0   : > { %863 = vmatpush.bf16.msrb.mxu3 %v1504_v24  ;;  %1071 = vmatpush.bf16.msrb.mxu2 %v1511_v21 }
  0xc5   : > { %1423 = vmatmul.msk.bf16.vlgmr.msra.gmra.mxu1 %vm191_vm0, %v901_v34 }
  0xc7   : > { %1375 = vmatmul.msk.bf16.vlgmr.msra.gmra.mxu0 %vm191_vm0, %v639_v15  ;;  %1428 = vmatmul.msk.bf16.vlgmr.msra.gmra.mxu2 %vm191_vm0, %v933_v32 }
  0xc8   : > { %888 = vmatpush.bf16.msra.mxu0 %v1505_v33 }
  0xcf   : > { %1393 = vmatmul.msk.bf16.vlgmr.msra.gmra.mxu3 %vm191_vm0, %v1604_v19  ;;  %v1515_v19 = vld [vmem:[%s1836_s1 + $0x38] sm:$0xff] }
  0xd0   : > { %991 = vmatpush.bf16.msra.mxu3 %v1509_v35  ;;  %1180 = vmatpush.bf16.msra.mxu2 %v1515_v19 }
  0xd5   : > { %1446 = vmatmul.msk.bf16.vlgmr.msrb.gmra.mxu1 %vm191_vm0, %v1671_v47  ;;  %v1516_v47 = vld [vmem:[%s1836_s1 + $0x40] sm:$0xff] }
  0xd7   : > { %1398 = vmatmul.msk.bf16.vlgmr.msrb.gmra.mxu0 %vm191_vm0, %v1625_v29  ;;  %1451 = vmatmul.msk.bf16.vlgmr.msrb.gmra.mxu2 %vm191_vm0, %v1054_v39  ;;  %v1514_v29 = vld [vmem:[%s1836_s1 + $0x30] sm:$0xff] }
  0xd8   : > { %1013 = vmatpush.bf16.msrb.mxu0 %v1508_v37  ;;  %1150 = vmatpush.bf16.msra.mxu1 %v1514_v29 }
  0xdf   : > { %1413 = vmatmul.msk.bf16.vlgmr.msrb.gmra.mxu3 %vm191_vm0, %v846_v27 }
  0xe0   : > { %1098 = vmatpush.bf16.msrb.mxu3 %v1512_v40 }
  0xe5   : > { %1466 = vmatmul.msk.bf16.vlgmr.msra.gmra.mxu1 %vm191_vm0, %v1655_v38 }
  0xe7   : > { %1418 = vmatmul.msk.bf16.vlgmr.msra.gmra.mxu0 %vm191_vm0, %v1628_v30  ;;  %1471 = vmatmul.msk.bf16.vlgmr.msra.gmra.mxu2 %vm191_vm0, %v1163_v43  ;;  %v363_v30 = vpop.f32.mrf.mxu2 }
  0xe8   : > { %1125 = vmatpush.bf16.msra.mxu0 %v1513_v41 }
  0xef   : > { %1436 = vmatmul.msk.bf16.vlgmr.msra.gmra.mxu3 %vm191_vm0, %v974_v46  ;;  %v365_v38 = vpop.f32.mrf.mxu2 }
  0xf0   : > { %1212 = vmatpush.bf16.msra.mxu3 %v1516_v47 }
  0xf2   : > { %v338_v50 = vpop.f32.mrf.mxu1 }
  0xf7   : > { %1441 = vmatmul.msk.bf16.vlgmr.msrb.gmra.mxu0 %vm191_vm0, %v1631_v31  ;;  %v491_v59 = vpop.f32.mrf.mxu2 }
  0xfa   : > { %v340_v52 = vpop.f32.mrf.mxu1 }
  0xff   : > { %1456 = vmatmul.msk.bf16.vlgmr.msrb.gmra.mxu3 %vm191_vm0, %v1081_v51  ;;  %v493_v63 = vpop.f32.mrf.mxu2 }
 0x102   : > { %v469_v56 = vpop.f32.mrf.mxu1 }
 0x103   : > { %v492_v33 = vadd.f32 %v491_v59, %v469_v56 }
 0x104   : > { %v204_v54 = vpop.f32.mrf.mxu0 }
 0x105   : > { %v227_v62 = vadd.f32 %v226_v42, %v204_v54 }
 0x107   : > { %1461 = vmatmul.msk.bf16.vlgmr.msra.gmra.mxu0 %vm191_vm0, %v1108_v55  ;;  %v261_v1 = vadd.f32 %v257_v44, %v227_v62 }
 0x10a   : > { %v471_v31 = vpop.f32.mrf.mxu1 }
 0x10c   : > { %v206_v61 = vpop.f32.mrf.mxu0 }
 0x10f   : > { %1476 = vmatmul.msk.bf16.vlgmr.msra.gmra.mxu3 %vm191_vm0, %v1195_v60 }
 0x112   : > { %v284_v0 = vpop.f32.mrf.mxu3  ;;  %v576_v4 = vpop.f32.mrf.mxu1 }
 0x113   : > { %v288_v3 = vadd.f32 %v284_v0, %v261_v1 }
 0x114   : > { %v311_v2 = vpop.f32.mrf.mxu0 }
 0x115   : > { %v315_v5 = vadd.f32 %v311_v2, %v288_v3 }
 0x117   : > { %v342_v8 = vadd.f32 %v338_v50, %v315_v5 }
 0x119   : > { %v367_v10 = vadd.f32 %v363_v30, %v342_v8 }
 0x11a   : > { %v286_v6 = vpop.f32.mrf.mxu3  ;;  %v603_v45 = vpop.f32.mrf.mxu2 }
 0x11b   : > { %v578_v9 = vpop.f32.mrf.mxu1 }
 0x11c   : > { %v313_v7 = vpop.f32.mrf.mxu0 }
 0x122   : > { %v393_v12 = vpop.f32.mrf.mxu3  ;;  %v605_v11 = vpop.f32.mrf.mxu2 }
 0x123   : > { %v397_v13 = vadd.f32 %v393_v12, %v367_v10  ;;  %v690_v17 = vpop.f32.mrf.mxu1 }
 0x124   : > { %v425_v15 = vpop.f32.mrf.mxu0 }
 0x125   : > { %v429_v16 = vadd.f32 %v425_v15, %v397_v13 }
 0x127   : > { %v433_v18 = vadd.f32 %v1812_v14, %v429_v16 }
 0x129   : > { %v434_v22 = vmul.f32 0.25, %v433_v18 }
 0x12a   : > { %v395_v20 = vpop.f32.mrf.mxu3  ;;  %v731_v23 = vpop.f32.mrf.mxu2 }
 0x12b   : > { %v435_v24 = vmax.f32 %v433_v18, %v434_v22  ;;  %v692_v27 = vpop.f32.mrf.mxu1 }
 0x12c   : > { %v427_v25 = vpop.f32.mrf.mxu0 }
 0x12d   : > { %v436_v26 = vpack.c.bf16 %v435_v24, %v435_v24 }
 0x12f   : > { %438 = vst.msk [vmem:[%s1819_s23] sm:$0x3] %vm437_vm1, %v436_v26 }
 0x132   : > { %v522_v28 = vpop.f32.mrf.mxu3  ;;  %v733_v32 = vpop.f32.mrf.mxu2 }
 0x133   : > { %v526_v21 = vadd.f32 %v522_v28, %v492_v33  ;;  %v811_v35 = vpop.f32.mrf.mxu1 }
 0x134   : > { %v549_v34 = vpop.f32.mrf.mxu0 }
 0x135   : > { %v553_v36 = vadd.f32 %v549_v34, %v526_v21 }
 0x137   : > { %v580_v40 = vadd.f32 %v576_v4, %v553_v36 }
 0x139   : > { %v607_v41 = vadd.f32 %v603_v45, %v580_v40 }
 0x13a   : > { %v524_v37 = vpop.f32.mrf.mxu3  ;;  %v838_v39 = vpop.f32.mrf.mxu2 }
 0x13b   : > { %v813_v29 = vpop.f32.mrf.mxu1 }
 0x13c   : > { %v551_v19 = vpop.f32.mrf.mxu0 }
 0x142   : > { %v628_v42 = vpop.f32.mrf.mxu3  ;;  %v840_v43 = vpop.f32.mrf.mxu2 }
 0x143   : > { %v632_v44 = vadd.f32 %v628_v42, %v607_v41  ;;  %v920_v48 = vpop.f32.mrf.mxu1 }
 0x144   : > { %v658_v46 = vpop.f32.mrf.mxu0 }
 0x145   : > { %v662_v47 = vadd.f32 %v658_v46, %v632_v44 }
 0x147   : > { %v694_v49 = vadd.f32 %v690_v17, %v662_v47 }
 0x149   : > { %v695_v50 = vadd.f32 %v1812_v14, %v694_v49 }
 0x14a   : > { %v630_v30 = vpop.f32.mrf.mxu3  ;;  %v952_v51 = vpop.f32.mrf.mxu2 }
 0x14b   : > { %v696_v52 = vmul.f32 0.25, %v695_v50  ;;  %v922_v54 = vpop.f32.mrf.mxu1 }
 0x14c   : > { %v660_v38 = vpop.f32.mrf.mxu0 }
 0x14d   : > { %v697_v53 = vmax.f32 %v695_v50, %v696_v52 }
 0x14f   : > { %v698_v55 = vpack.c.bf16 %v697_v53, %v697_v53 }
 0x151   : > { %1381 = vst.msk [vmem:[%s1819_s23 + $0x2] sm:$0x3] %vm437_vm1, %v698_v55 }
 0x152   : > { %v753_v56 = vpop.f32.mrf.mxu3  ;;  %v954_v57 = vpop.f32.mrf.mxu2 }
 0x153   : > { %v754_v59 = vadd.f32 %v753_v56, %v731_v23  ;;  %v1046_v60 = vpop.f32.mrf.mxu1 }
 0x154   : > { %v784_v58 = vpop.f32.mrf.mxu0 }
 0x155   : > { %v788_v61 = vadd.f32 %v784_v58, %v754_v59 }
 0x157   : > { %v815_v0 = vadd.f32 %v811_v35, %v788_v61 }
 0x159   : > { %v842_v2 = vadd.f32 %v838_v39, %v815_v0 }
 0x15a   : > { %v755_v31 = vpop.f32.mrf.mxu3  ;;  %v1073_v62 = vpop.f32.mrf.mxu2 }
 0x15b   : > { %v1048_v1 = vpop.f32.mrf.mxu1 }
 0x15c   : > { %v786_v63 = vpop.f32.mrf.mxu0 }
 0x162   : > { %v865_v3 = vpop.f32.mrf.mxu3  ;;  %v1075_v4 = vpop.f32.mrf.mxu2 }
 0x163   : > { %v869_v5 = vadd.f32 %v865_v3, %v842_v2  ;;  %v1152_v7 = vpop.f32.mrf.mxu1 }
 0x164   : > { %v890_v6 = vpop.f32.mrf.mxu0 }
 0x165   : > { %v894_v45 = vadd.f32 %v890_v6, %v869_v5 }
 0x167   : > { %v924_v8 = vadd.f32 %v920_v48, %v894_v45 }
 0x169   : > { %v956_v9 = vadd.f32 %v952_v51, %v924_v8 }
 0x16a   : > { %v867_v10 = vpop.f32.mrf.mxu3  ;;  %v1182_v12 = vpop.f32.mrf.mxu2 }
 0x16b   : > { %v957_v11 = vadd.f32 %v1812_v14, %v956_v9  ;;  %v1154_v16 = vpop.f32.mrf.mxu1 }
 0x16c   : > { %v892_v13 = vpop.f32.mrf.mxu0 }
 0x16d   : > { %v958_v15 = vmul.f32 0.25, %v957_v11 }
 0x16f   : > { %v959_v17 = vmax.f32 %v957_v11, %v958_v15 }
 0x171   : > { %v960_v18 = vpack.c.bf16 %v959_v17, %v959_v17 }
 0x172   : > { %v993_v22 = vpop.f32.mrf.mxu3  ;;  %v1184_v20 = vpop.f32.mrf.mxu2 }
 0x173   : > { %1429 = vst.msk [vmem:[%s1819_s23 + $0x4] sm:$0x3] %vm437_vm1, %v960_v18 }
 0x174   : > { %v1015_v23 = vpop.f32.mrf.mxu0 }
 0x175   : > { %v1016_v25 = vadd.f32 %v1015_v23, %v993_v22 }
 0x177   : > { %v1050_v27 = vadd.f32 %v1046_v60, %v1016_v25 }
 0x179   : > { %v1077_v32 = vadd.f32 %v1073_v62, %v1050_v27 }
 0x17a   : > { %v995_v24 = vpop.f32.mrf.mxu3 }
 0x17c   : > { %v1017_v26 = vpop.f32.mrf.mxu0 }
 0x182   : > { %v1100_v28 = vpop.f32.mrf.mxu3 }
 0x183   : > { %v1104_v34 = vadd.f32 %v1100_v28, %v1077_v32 }
 0x184   : > { %v1127_v33 = vpop.f32.mrf.mxu0 }
 0x185   : > { %v1131_v21 = vadd.f32 %v1127_v33, %v1104_v34 }
 0x187   : > { %v1156_v37 = vadd.f32 %v1152_v7, %v1131_v21 }
 0x189   : > { %v1186_v39 = vadd.f32 %v1182_v12, %v1156_v37 }
 0x18a   : > { %v1102_v35 = vpop.f32.mrf.mxu3 }
 0x18c   : > { %v1129_v36 = vpop.f32.mrf.mxu0 }
 0x192   : > { %v1214_v19 = vpop.f32.mrf.mxu3 }
 0x193   : > { %v1218_v40 = vadd.f32 %v1214_v19, %v1186_v39 }
 0x195   : > { %v1219_v29 = vadd.f32 %v1812_v14, %v1218_v40 }
 0x197   : > { %v1220_v41 = vmul.f32 0.25, %v1219_v29 }
 0x199   : > { %v1221_v42 = vmax.f32 %v1219_v29, %v1220_v41 }
 0x19a   : > { %v1216_v43 = vpop.f32.mrf.mxu3 }
 0x19b   : > { %v1222_v44 = vpack.c.bf16 %v1221_v42, %v1221_v42 }
 0x19d   : > { %1477 = vst.msk [vmem:[%s1819_s23 + $0x6] sm:$0x3] %vm437_vm1, %v1222_v44 }
 0x19e PF: > { %s13_s12 = sadd.s32 1, %s1536_s12  }
 0x19f   : > { %p10_p4 = scmp.ge.s32.totalorder %s13_s12, 4  }
 0x1a1   :  { %12 = sbr.rel (!%p10_p4) target bundleno = 1 (0x1), region = 69 }

// kernel: discriminator_forward.5
= control target key start
LH: loop header
LB: loop body
LE: loop exit
PB: predicated region body
PF: predicated region fallthrough
CT: control target
= control target key end

     0   :  { %s2269_s12 = smov 0   ;;  %s2939_s0 = inlined_call_operand.vmem [shape: bf16[2,9,9,32], index: 0, kind: input, shape index: {}]   ;;  %s2940_s1 = inlined_call_operand.vmem [shape: bf16[72,16], index: 1, kind: input, shape index: {}]   ;;  %s2941_s2 = inlined_call_operand.vmem [shape: f32[1,16], index: 2, kind: input, shape index: {}]   ;;  %s2942_s3 = inlined_call_operand.vmem [shape: bf16[2,8,8,16], index: 3, kind: output, shape index: {}]  }
   0x1 LB: > { %s2105_s13 = sadd.s32 4294967295, %s2244_s12   ;;  %p2109_p0 = scmp.ge.s32.totalorder %s2244_s12, 1  ;;  %s2244_s12 = sphi %s2269_s12, %s13_s12  }
   0x2   : > { %p137_p1 = scmp.lt.s32.totalorder %s2244_s12, 3 }
   0x4   : > { %p138_p2 = pnand %p2109_p0, %p137_p1 }
   0x5   : > { %p161_p3 = scmp.lt.s32.totalorder (!%p138_p2), %s2105_s13, 1  ;;  %s2246_s18 = smov (!%p138_p2), 120  }
   0x6   : > { %141 = sbr.rel (%p138_p2) target bundleno = 558 (0x22e), region = 32  ;;  %s2247_s19 = smov (!%p138_p2), 104  }
   0x7   : > { %s2248_s20 = smov (!%p138_p2), 112  }
   0xb   : > { %s2944_s13 = smov (!%p161_p3, %s2105_s13), 1  ;;  %vm189_vm0 = vcmask 1043456   ;;  %v225_v21 = vld [vmem:[%s2940_s1 + $0x8] sm:$0xf]  ;;  %v179_v24 = vld [vmem:[%s2940_s1 + $0x4] sm:$0xf] }
   0xc   : > { %s2225_s14 = smul.u32 72, %s2944_s13  ;;  %v240_v23 = vsel %vm189_vm0, %v225_v21, 0  ;;  %vm185_vm1 = vcmask 64512   ;;  %v191_v25 = vsel %vm189_vm0, %v179_v24, 0  ;;  %v178_v26 = vld [vmem:[%s2940_s1] sm:$0xf] }
   0xd   : > { %249 = vmatpush.bf16.msra.mxu2 %v240_v23  ;;  %200 = vmatpush.bf16.msra.mxu0 %v191_v25  ;;  %v210_v28 = vsel %vm189_vm0, %v178_v26, 0  ;;  %v256_v48 = vld [vmem:[%s2940_s1 + $0xc] sm:$0xf]  ;;  %v325_v49 = vld [vmem:[%s2940_s1 + $0x18] sm:$0xf]  ;;  %s2224_s10 = sshll.u32 %s2944_s13, 5 }
   0xe   : > { %s2283_s17 = scalar_lea.vmem %s2939_s0, %s2225_s14  ;;  %219 = vmatpush.bf16.msra.mxu1 %v210_v28  ;;  %v263_v50 = vsel %vm189_vm0, %v256_v48, 0  ;;  %v330_v51 = vsel %vm189_vm0, %v325_v49, 0  ;;  %v279_v58 = vld [vmem:[%s2940_s1 + $0x10] sm:$0xf]  ;;  %v346_v59 = vld [vmem:[%s2940_s1 + $0x1c] sm:$0xf]  ;;  %s2766_s21 = scalar_lea.vmem %s2942_s3, %s2224_s10 }
   0xf   : > { %v173_v0 = vld [vmem:[%s2283_s17] sm:$0xf]  ;;  %v174_v2 = vld [vmem:[%s2283_s17 + $0x4] sm:$0x1]  ;;  %v2288_v3 = vld [vmem:[%s2283_s17 + $0x8] sm:$0xf]  ;;  %272 = vmatpush.bf16.msra.mxu3 %v263_v50 }
  0x10   : > { %v181_v1 = vunpack.c.l.b16 %v173_v0  ;;  %v2125_v4 = vld [vmem:[%s2283_s17 + $0xc] sm:$0x1]  ;;  %v2292_v5 = vld [vmem:[%s2283_s17 + $0x8] sm:$0xf]  ;;  %v227_v6 = vunpack.c.l.b16 %v174_v2  ;;  %v420_v7 = vunpack.c.l.b16 %v2288_v3  ;;  %v2139_v22 = vld [vmem:[%s2283_s17 + $0x14] sm:$0x1] }
  0x11   : > { %v464_v8 = vunpack.c.l.b16 %v2125_v4  ;;  %v2298_v11 = vunpack.c.l.b16 %v2292_v5  ;;  %v2318_v27 = vld [vmem:[%s2283_s17 + $0x10] sm:$0xf]  ;;  %v698_v31 = vunpack.c.l.b16 %v2139_v22  ;;  %2116 = vmatmul.msk.bf16.vlgmr.msra.gmra.mxu1 %vm185_vm1, %v173_v0  ;;  %v2344_v42 = vld [vmem:[%s2283_s17 + $0x18] sm:$0xf]  ;;  %339 = vmatpush.bf16.msrb.mxu2 %v330_v51  ;;  %v2153_v52 = vld [vmem:[%s2283_s17 + $0x1c] sm:$0x1] }
  0x12   : > { %v182_v9 = vpack.c.b16 %v181_v1, %v181_v1  ;;  %v228_v10 = vpack.c.b16 %v227_v6, %v181_v1  ;;  %v421_v30 = vpack.c.b16 %v420_v7, %v420_v7  ;;  %v2324_v32 = vld [vmem:[%s2283_s17 + $0x10] sm:$0xf]  ;;  %v654_v33 = vunpack.c.l.b16 %v2318_v27  ;;  %v2347_v43 = vld [vmem:[%s2283_s17 + $0x18] sm:$0xf]  ;;  %v2375_v55 = vld [vmem:[%s2283_s17 + $0x20] sm:$0xf] }
  0x13   : > { %v465_v12 = vpack.c.b16 %v464_v8, %v420_v7  ;;  %v349_v16 = vpack.c.b16 %v2298_v11, %v2298_v11  ;;  %v2334_v34 = vunpack.c.l.b16 %v2324_v32  ;;  %v2354_v44 = vunpack.c.l.b16 %v2344_v42  ;;  %v302_v60 = vld [vmem:[%s2940_s1 + $0x14] sm:$0xf]  ;;  %v417_v6 = vld [vmem:[%s2940_s1] sm:$0xf]  ;;  %v418_v8 = vld [vmem:[%s2940_s1 + $0x4] sm:$0xf] }
  0x14   : > { %183 = vrot.lane.b32.xlu0 %v182_v9, %s2246_s18  ;;  %280 = vrot.lane.b32.xlu1 %v182_v9, %s2247_s19  ;;  %v230_v13 = vshrl.u32 %v228_v10, 16  ;;  %v232_v14 = vshll.u32 %v228_v10, 16  ;;  %v699_v35 = vpack.c.b16 %v698_v31, %v654_v33  ;;  %v655_v36 = vpack.c.b16 %v654_v33, %v654_v33  ;;  %v372_v10 = vld [vmem:[%s2940_s1 + $0x20] sm:$0xf]  ;;  %v516_v25 = vld [vmem:[%s2940_s1 + $0x10] sm:$0xf] }
  0x15   : > { %v469_v17 = vshll.u32 %v465_v12, 16  ;;  %v467_v19 = vshrl.u32 %v465_v12, 16  ;;  %v586_v37 = vpack.c.b16 %v2334_v34, %v2334_v34  ;;  %v888_v45 = vunpack.c.l.b16 %v2347_v43  ;;  %v2114_v26 = vld [vmem:[%s2283_s17 + $0xc] sm:$0x1]  ;;  %v652_v49 = vld [vmem:[%s2940_s1 + $0x4] sm:$0xf] }
  0x16   : > { %v234_v15 = vrot.slane %v232_v14, 1  ;;  %v703_v38 = vshll.u32 %v699_v35, 16  ;;  %v701_v39 = vshrl.u32 %v699_v35, 16  ;;  %v820_v46 = vpack.c.b16 %v2354_v44, %v2354_v44  ;;  %v493_v35 = vld [vmem:[%s2940_s1 + $0xc] sm:$0xf] }
  0x17   : > { %v471_v20 = vrot.slane %v469_v17, 1  ;;  %v889_v47 = vpack.c.b16 %v888_v45, %v888_v45  ;;  %v932_v53 = vunpack.c.l.b16 %v2153_v52  ;;  %v2378_v56 = vunpack.c.l.b16 %v2375_v55 }
  0x18   : > { %v235_v18 = vor.u32 %v234_v15, %v230_v13  ;;  %v705_v40 = vrot.slane %v703_v38, 1  ;;  %v286_v61 = vsel %vm189_vm0, %v279_v58, 0  ;;  %v356_v62 = vsel %vm189_vm0, %v346_v59, 0  ;;  %v2416_v15 = vld [vmem:[%s2283_s17 + $0x20] sm:$0xf] }
  0x19   : > { %v2321_v29 = vor.u32 %v471_v20, %v467_v19  ;;  %v933_v54 = vpack.c.b16 %v932_v53, %v888_v45  ;;  %v309_v63 = vsel %vm189_vm0, %v302_v60, 0  ;;  %v1054_v0 = vpack.c.b16 %v2378_v56, %v2378_v56  ;;  %295 = vmatpush.bf16.msrb.mxu0 %v286_v61  ;;  %365 = vmatpush.bf16.msrb.mxu3 %v356_v62  ;;  %v2167_v20 = vld [vmem:[%s2283_s17 + $0x24] sm:$0x1]  ;;  %v2127_v38 = vld [vmem:[%s2283_s17 + $0x14] sm:$0x1] }
  0x1a   : > { %303 = vrot.lane.b32.xlu2 %v235_v18, %s2248_s20  ;;  %2117 = vmatmul.msk.bf16.vlgmr.msra.gmra.mxu2 %vm185_vm1, %v235_v18  ;;  %v2341_v41 = vor.u32 %v705_v40, %v701_v39  ;;  %v447_v7 = vsel %vm189_vm0, %v417_v6, 0  ;;  %v387_v12 = vsel %vm189_vm0, %v372_v10, 0  ;;  %v462_v18 = vld [vmem:[%s2940_s1 + $0x8] sm:$0xf]  ;;  %v1166_v21 = vunpack.c.l.b16 %v2167_v20  ;;  %v609_v60 = vld [vmem:[%s2940_s1 + $0x20] sm:$0xf] }
  0x1b   : > { %v937_v57 = vshll.u32 %v933_v54, 16  ;;  %v935_v1 = vshrl.u32 %v933_v54, 16  ;;  %318 = vmatpush.bf16.msrb.mxu1 %v309_v63  ;;  %456 = vmatpush.bf16.msra.mxu2 %v447_v7  ;;  %v477_v22 = vsel %vm189_vm0, %v462_v18, 0  ;;  %v523_v28 = vsel %vm189_vm0, %v516_v25, 0  ;;  %v2466_v62 = vld [vmem:[%s2283_s17 + $0x28] sm:$0xf] }
  0x1c   : > { %257 = vrot.lane.b32.xlu0 %v182_v9, %s2248_s20  ;;  %350 = vrot.lane.b32.xlu1 %v349_v16, %s2246_s18  ;;  %v428_v9 = vsel %vm189_vm0, %v418_v8, 0  ;;  %v1122_v16 = vunpack.c.l.b16 %v2416_v15  ;;  %v500_v39 = vsel %vm189_vm0, %v493_v35, 0  ;;  %v662_v50 = vsel %vm189_vm0, %v652_v49, 0  ;;  %v583_v63 = vld [vmem:[%s2940_s1 + $0x1c] sm:$0xf] }
  0x1d   : > { %v939_v2 = vrot.slane %v937_v57, 1  ;;  %v624_v61 = vsel %vm189_vm0, %v609_v60, 0  ;;  %v593_v7 = vsel %vm189_vm0, %v583_v63, 0  ;;  %v750_v10 = vld [vmem:[%s2940_s1 + $0x10] sm:$0xf]  ;;  %vm410_vm2 = vcmask 125952  }
  0x1e   : > { %v1123_v19 = vpack.c.b16 %v1122_v16, %v1122_v16  ;;  %v1167_v24 = vpack.c.b16 %v1166_v21, %v1122_v16  ;;  %v727_v16 = vld [vmem:[%s2940_s1 + $0xc] sm:$0xf]  ;;  %v696_v21 = vld [vmem:[%s2940_s1 + $0x8] sm:$0xf]  ;;  %v886_v60 = vld [vmem:[%s2940_s1 + $0x4] sm:$0xf] }
  0x1f   : > { %v2395_v4 = vor.u32 %v939_v2, %v935_v1  ;;  %437 = vmatpush.bf16.msra.mxu1 %v428_v9  ;;  %v734_v18 = vsel %vm189_vm0, %v727_v16, 0  ;;  %v2560_v63 = vld [vmem:[%s2283_s17 + $0x30] sm:$0xf] }
  0x20   : > { %v1171_v31 = vshll.u32 %v1167_v24, 16 }
  0x22   : > { %422 = vrot.lane.b32.xlu2 %v421_v30, %s2246_s18 }
  0x24   : > { %540 = vrot.lane.b32.xlu0 %v2321_v29, %s2248_s20  ;;  %494 = vrot.lane.b32.xlu1 %v421_v30, %s2248_s20 }
  0x2a   : > { %517 = vrot.lane.b32.xlu2 %v421_v30, %s2247_s19  ;;  %2121 = vmatmul.msk.bf16.vlgmr.msrb.gmra.mxu2 %vm185_vm1, %v2292_v5  ;;  %v1169_v30 = vshrl.u32 %v1167_v24, 16  ;;  %v711_v24 = vsel %vm189_vm0, %v696_v21, 0 }
  0x2c   : > { %656 = vrot.lane.b32.xlu0 %v655_v36, %s2246_s18  ;;  %587 = vrot.lane.b32.xlu1 %v586_v37, %s2246_s18  ;;  %v1173_v37 = vrot.slane %v1171_v31, 1 }
  0x2e   : > { %v2443_v40 = vor.u32 %v1173_v37, %v1169_v30 }
  0x32   : > { %751 = vrot.lane.b32.xlu2 %v655_v36, %s2247_s19 }
  0x34   : > { %728 = vrot.lane.b32.xlu1 %v655_v36, %s2248_s20  ;;  %774 = vrot.lane.b32.xlu0 %v2341_v41, %s2248_s20  ;;  %v374_v36 = vunpack.c.l.b16 %v2114_v26 }
  0x3a   : > { %890 = vrot.lane.b32.xlu2 %v889_v47, %s2246_s18  ;;  %2129 = vmatmul.msk.bf16.vlgmr.msra.gmra.mxu2 %vm185_vm1, %v2288_v3  ;;  %v539_v3 = vld [vmem:[%s2940_s1 + $0x14] sm:$0xf] }
  0x3b   : > { %v546_v17 = vsel %vm189_vm0, %v539_v3, 0 }
  0x3c   : > { %821 = vrot.lane.b32.xlu0 %v820_v46, %s2246_s18  ;;  %962 = vrot.lane.b32.xlu1 %v889_v47, %s2248_s20  ;;  %v375_v46 = vpack.c.b16 %v374_v36, %v2298_v11  ;;  %v562_v11 = vld [vmem:[%s2940_s1 + $0x18] sm:$0xf] }
  0x3d   : > { %555 = vmatpush.bf16.msrb.mxu2 %v546_v17  ;;  %v567_v54 = vsel %vm189_vm0, %v562_v11, 0  ;;  %v2141_v17 = vld [vmem:[%s2283_s17 + $0x1c] sm:$0x1] }
  0x3e   : > { %v379_v51 = vshll.u32 %v375_v46, 16  ;;  %v377_v57 = vshrl.u32 %v375_v46, 16 }
  0x40   : > { %v381_v58 = vrot.slane %v379_v51, 1 }
  0x41   : > { %671 = vmatpush.bf16.msra.mxu2 %v662_v50 }
  0x42   : > { %985 = vrot.lane.b32.xlu2 %v889_v47, %s2247_s19  ;;  %v611_v47 = vunpack.c.l.b16 %v2127_v38  ;;  %v382_v2 = vor.u32 %v381_v58, %v377_v57  ;;  %v817_v38 = vld [vmem:[%s2940_s1 + $0x1c] sm:$0xf]  ;;  %v961_v57 = vld [vmem:[%s2940_s1 + $0xc] sm:$0xf] }
  0x44   : > { %1055 = vrot.lane.b32.xlu0 %v1054_v0, %s2246_s18  ;;  %1008 = vrot.lane.b32.xlu1 %v2395_v4, %s2248_s20  ;;  %v612_v52 = vpack.c.b16 %v611_v47, %v2334_v34  ;;  %v2469_v34 = vunpack.c.l.b16 %v2466_v62  ;;  %v2181_v47 = vld [vmem:[%s2283_s17 + $0x2c] sm:$0x1] }
  0x46   : > { %v616_v59 = vshll.u32 %v612_v52, 16  ;;  %v614_v0 = vshrl.u32 %v612_v52, 16 }
  0x48   : > { %v618_v1 = vrot.slane %v616_v59, 1  ;;  %v968_v59 = vsel %vm189_vm0, %v961_v57, 0 }
  0x4a   : > { %1124 = vrot.lane.b32.xlu2 %v1123_v19, %s2246_s18  ;;  %v619_v9 = vor.u32 %v618_v1, %v614_v0  ;;  %v1590_v0 = vunpack.c.l.b16 %v2560_v63  ;;  %v930_v1 = vld [vmem:[%s2940_s1 + $0x8] sm:$0xf] }
  0x4c   : > { %1196 = vrot.lane.b32.xlu0 %v1123_v19, %s2248_s20  ;;  %1219 = vrot.lane.b32.xlu1 %v1123_v19, %s2247_s19  ;;  %v2499_v19 = vld [vmem:[%s2283_s17 + $0x28] sm:$0xf] }
  0x4d   : > { %v2502_v20 = vunpack.c.l.b16 %v2499_v19 }
  0x54   : > { %1242 = vrot.lane.b32.xlu0 %v2443_v40, %s2248_s20 }
  0x74   : > { %v304_v5 = vpop.permute.xlu2 %303 }
  0x75   : > { %2120 = vmatmul.msk.bf16.vlgmr.msrb.gmra.mxu1 %vm185_vm1, %v304_v5  ;;  %v1357_v5 = vpack.c.b16 %v2469_v34, %v2469_v34 }
  0x76   : > { %532 = vmatpush.bf16.msrb.mxu1 %v523_v28  ;;  %v843_v28 = vld [vmem:[%s2940_s1 + $0x20] sm:$0xf] }
  0x77   : > { %1358 = vrot.lane.b32.xlu1 %v1357_v5, %s2246_s18  ;;  %1430 = vrot.lane.b32.xlu0 %v1357_v5, %s2248_s20  ;;  %v858_v30 = vsel %vm189_vm0, %v843_v28, 0 }
  0x7c   : > { %v423_v14 = vpop.permute.xlu2 %422 }
  0x7f   : > { %1453 = vrot.lane.b32.xlu1 %v1357_v5, %s2247_s19  ;;  %v1591_v5 = vpack.c.b16 %v1590_v0, %v1590_v0 }
  0x84   : > { %v518_v48 = vpop.permute.xlu2 %517 }
  0x85   : > { %2128 = vmatmul.msk.bf16.vlgmr.msra.gmra.mxu1 %vm185_vm1, %v423_v14 }
  0x86   : > { %v184_v13 = vpop.permute.xlu0 %183  ;;  %v281_v33 = vpop.permute.xlu1 %280  ;;  %633 = vmatpush.bf16.msra.mxu1 %v624_v61 }
  0x87   : > { %2115 = vmatmul.msk.bf16.vlgmr.msra.gmra.mxu0 %vm185_vm1, %v184_v13  ;;  %v651_v13 = vld [vmem:[%s2940_s1] sm:$0xf]  ;;  %1687 = vrot.lane.b32.xlu1 %v1591_v5, %s2247_s19 }
  0x88   : > { %396 = vmatpush.bf16.msra.mxu0 %v387_v12  ;;  %v757_v12 = vsel %vm189_vm0, %v750_v10, 0  ;;  %v681_v14 = vsel %vm189_vm0, %v651_v13, 0  ;;  %v984_v10 = vld [vmem:[%s2940_s1 + $0x10] sm:$0xf] }
  0x8e   : > { %v258_v23 = vpop.permute.xlu0 %257  ;;  %v351_v53 = vpop.permute.xlu1 %350 }
  0x8f   : > { %2118 = vmatmul.msk.bf16.vlgmr.msra.gmra.mxu3 %vm185_vm1, %v258_v23  ;;  %v752_v23 = vpop.permute.xlu2 %751 }
  0x90   : > { %486 = vmatpush.bf16.msra.mxu3 %v477_v22  ;;  %v1288_v22 = vpack.c.b16 %v2502_v20, %v2502_v20 }
  0x92   : > { %1289 = vrot.lane.b32.xlu2 %v1288_v22, %s2246_s18  ;;  %v1077_v22 = vld [vmem:[%s2940_s1 + $0x20] sm:$0xf] }
  0x95   : > { %2132 = vmatmul.msk.bf16.vlgmr.msrb.gmra.mxu1 %vm185_vm1, %v518_v48  ;;  %v796_v48 = vld [vmem:[%s2940_s1 + $0x18] sm:$0xf] }
  0x96   : > { %v541_v45 = vpop.permute.xlu0 %540  ;;  %v495_v8 = vpop.permute.xlu1 %494  ;;  %743 = vmatpush.bf16.msrb.mxu1 %v734_v18  ;;  %v801_v51 = vsel %vm189_vm0, %v796_v48, 0  ;;  %v2606_v18 = vld [vmem:[%s2283_s17 + $0x38] sm:$0xf] }
  0x97   : > { %2119 = vmatmul.msk.bf16.vlgmr.msrb.gmra.mxu0 %vm185_vm1, %v281_v33  ;;  %2133 = vmatmul.msk.bf16.vlgmr.msrb.gmra.mxu2 %vm185_vm1, %v541_v45  ;;  %v2530_v45 = vld [vmem:[%s2283_s17 + $0x30] sm:$0xf]  ;;  %v1824_v21 = vunpack.c.l.b16 %v2606_v18 }
  0x98   : > { %509 = vmatpush.bf16.msrb.mxu0 %v500_v39  ;;  %766 = vmatpush.bf16.msrb.mxu2 %v757_v12  ;;  %v827_v39 = vsel %vm189_vm0, %v817_v38, 0  ;;  %v2533_v46 = vunpack.c.l.b16 %v2530_v45  ;;  %v1030_v12 = vld [vmem:[%s2940_s1 + $0x18] sm:$0xf]  ;;  %v1120_v38 = vld [vmem:[%s2940_s1 + $0x4] sm:$0xf] }
  0x99   : > { %v1035_v13 = vsel %vm189_vm0, %v1030_v12, 0 }
  0x9a   : > { %v1522_v49 = vpack.c.b16 %v2533_v46, %v2533_v46 }
  0x9c   : > { %1523 = vrot.lane.b32.xlu0 %v1522_v49, %s2246_s18  ;;  %v2155_v49 = vld [vmem:[%s2283_s17 + $0x24] sm:$0x1] }
  0x9e   : > { %v657_v6 = vpop.permute.xlu0 %656  ;;  %v588_v3 = vpop.permute.xlu1 %587 }
  0x9f   : > { %2122 = vmatmul.msk.bf16.vlgmr.msrb.gmra.mxu3 %vm185_vm1, %v351_v53 }
  0xa0   : > { %576 = vmatpush.bf16.msrb.mxu3 %v567_v54 }
  0xa4   : > { %1664 = vrot.lane.b32.xlu0 %v1591_v5, %s2248_s20 }
  0xa5   : > { %2136 = vmatmul.msk.bf16.vlgmr.msra.gmra.mxu1 %vm185_vm1, %v619_v9 }
  0xa6   : > { %v729_v26 = vpop.permute.xlu1 %728  ;;  %v775_v37 = vpop.permute.xlu0 %774  ;;  %836 = vmatpush.bf16.msra.mxu1 %v827_v39 }
  0xa7   : > { %2123 = vmatmul.msk.bf16.vlgmr.msra.gmra.mxu0 %vm185_vm1, %v382_v2  ;;  %2142 = vmatmul.msk.bf16.vlgmr.msra.gmra.mxu2 %vm185_vm1, %v657_v6  ;;  %v945_v2 = vsel %vm189_vm0, %v930_v1, 0  ;;  %v885_v6 = vld [vmem:[%s2940_s1] sm:$0xf] }
  0xa8   : > { %602 = vmatpush.bf16.msra.mxu0 %v593_v7  ;;  %867 = vmatpush.bf16.msra.mxu2 %v858_v30 }
  0xae   : > { %v822_v54 = vpop.permute.xlu0 %821  ;;  %v963_v7 = vpop.permute.xlu1 %962 }
  0xaf   : > { %2130 = vmatmul.msk.bf16.vlgmr.msra.gmra.mxu3 %vm185_vm1, %v2321_v29  ;;  %v845_v29 = vunpack.c.l.b16 %v2141_v17  ;;  %v2600_v17 = vpop.f32.mrf.mxu2 }
  0xb0   : > { %690 = vmatpush.bf16.msra.mxu3 %v681_v14  ;;  %v2597_v14 = vpop.f32.mrf.mxu1 }
  0xb1   : > { %v846_v25 = vpack.c.b16 %v845_v29, %v2354_v44  ;;  %v773_v44 = vld [vmem:[%s2940_s1 + $0x14] sm:$0xf] }
  0xb2   : > { %v780_v33 = vsel %vm189_vm0, %v773_v44, 0  ;;  %v2195_v29 = vld [vmem:[%s2283_s17 + $0x34] sm:$0x1] }
  0xb3   : > { %v850_v31 = vshll.u32 %v846_v25, 16  ;;  %v848_v35 = vshrl.u32 %v846_v25, 16  ;;  %v891_v25 = vpop.permute.xlu2 %890 }
  0xb5   : > { %2145 = vmatmul.msk.bf16.vlgmr.msrb.gmra.mxu1 %vm185_vm1, %v729_v26  ;;  %v852_v36 = vrot.slane %v850_v31, 1 }
  0xb6   : > { %954 = vmatpush.bf16.msrb.mxu1 %v945_v2  ;;  %v1241_v2 = vld [vmem:[%s2940_s1 + $0x14] sm:$0xf] }
  0xb7   : > { %2131 = vmatmul.msk.bf16.vlgmr.msrb.gmra.mxu0 %vm185_vm1, %v495_v8  ;;  %2146 = vmatmul.msk.bf16.vlgmr.msrb.gmra.mxu2 %vm185_vm1, %v752_v23  ;;  %v853_v50 = vor.u32 %v852_v36, %v848_v35  ;;  %v1051_v8 = vld [vmem:[%s2940_s1 + $0x1c] sm:$0xf]  ;;  %v1825_v23 = vpack.c.b16 %v1824_v21, %v1824_v21  ;;  %v253_v44 = vpop.f32.mrf.mxu2 }
  0xb8   : > { %720 = vmatpush.bf16.msrb.mxu0 %v711_v24  ;;  %977 = vmatpush.bf16.msrb.mxu2 %v968_v59  ;;  %v1061_v9 = vsel %vm189_vm0, %v1051_v8, 0  ;;  %v1634_v24 = vunpack.c.l.b16 %v2195_v29  ;;  %v223_v26 = vpop.f32.mrf.mxu1  ;;  %v1218_v8 = vld [vmem:[%s2940_s1 + $0x10] sm:$0xf] }
  0xb9   : > { %1826 = vrot.lane.b32.xlu1 %v1825_v23, %s2246_s18  ;;  %1898 = vrot.lane.b32.xlu0 %v1825_v23, %s2248_s20  ;;  %v1225_v12 = vsel %vm189_vm0, %v1218_v8, 0 }
  0xba   : > { %v1635_v28 = vpack.c.b16 %v1634_v24, %v1590_v0 }
  0xbc   : > { %v1639_v31 = vshll.u32 %v1635_v28, 16  ;;  %v1637_v36 = vshrl.u32 %v1635_v28, 16 }
  0xbf   : > { %2134 = vmatmul.msk.bf16.vlgmr.msrb.gmra.mxu3 %vm185_vm1, %v2324_v32  ;;  %v1400_v32 = vunpack.c.l.b16 %v2181_v47  ;;  %v1130_v47 = vsel %vm189_vm0, %v1120_v38, 0 }
  0xc0   : > { %789 = vmatpush.bf16.msrb.mxu3 %v780_v33  ;;  %v1119_v33 = vld [vmem:[%s2940_s1] sm:$0xf] }
  0xc1   : > { %v1401_v11 = vpack.c.b16 %v1400_v32, %v2469_v34  ;;  %v896_v34 = vsel %vm189_vm0, %v886_v60, 0  ;;  %v1149_v35 = vsel %vm189_vm0, %v1119_v33, 0  ;;  %1921 = vrot.lane.b32.xlu1 %v1825_v23, %s2247_s19  ;;  %v2642_v32 = vpop.f32.mrf.mxu2 }
  0xc3   : > { %v1403_v52 = vshrl.u32 %v1401_v11, 16  ;;  %v1405_v53 = vshll.u32 %v1401_v11, 16  ;;  %v2209_v11 = vld [vmem:[%s2283_s17 + $0x3c] sm:$0x1] }
  0xc5   : > { %v1407_v58 = vrot.slane %v1405_v53, 1  ;;  %2149 = vmatmul.msk.bf16.vlgmr.msra.gmra.mxu1 %vm185_vm1, %v822_v54  ;;  %v1079_v53 = vunpack.c.l.b16 %v2155_v49  ;;  %v1264_v54 = vld [vmem:[%s2940_s1 + $0x18] sm:$0xf] }
  0xc6   : > { %1044 = vmatpush.bf16.msra.mxu1 %v1035_v13  ;;  %v1269_v59 = vsel %vm189_vm0, %v1264_v54, 0 }
  0xc7   : > { %2135 = vmatmul.msk.bf16.vlgmr.msra.gmra.mxu0 %vm185_vm1, %v588_v3  ;;  %2150 = vmatmul.msk.bf16.vlgmr.msra.gmra.mxu2 %vm185_vm1, %v853_v50  ;;  %v2554_v61 = vor.u32 %v1407_v58, %v1403_v52  ;;  %v1056_v3 = vpop.permute.xlu0 %1055  ;;  %v2648_v50 = vld [vmem:[%s2283_s17 + $0x38] sm:$0xf]  ;;  %v1080_v0 = vpack.c.b16 %v1079_v53, %v2378_v56 }
  0xc8   : > { %810 = vmatpush.bf16.msra.mxu0 %v801_v51  ;;  %1070 = vmatpush.bf16.msra.mxu2 %v1061_v9  ;;  %v1195_v51 = vld [vmem:[%s2940_s1 + $0xc] sm:$0xf]  ;;  %v2655_v52 = vunpack.c.l.b16 %v2648_v50 }
  0xc9   : > { %1476 = vrot.lane.b32.xlu2 %v2554_v61, %s2248_s20  ;;  %v1202_v58 = vsel %vm189_vm0, %v1195_v51, 0  ;;  %v343_v1 = vpop.f32.mrf.mxu2  ;;  %v1084_v9 = vshll.u32 %v1080_v0, 16 }
  0xca   : > { %v2169_v1 = vld [vmem:[%s2283_s17 + $0x2c] sm:$0x1] }
  0xcb   : > { %v1313_v8 = vunpack.c.l.b16 %v2169_v1 }
  0xcf   : > { %2143 = vmatmul.msk.bf16.vlgmr.msra.gmra.mxu3 %vm185_vm1, %v2318_v27  ;;  %v915_v27 = vsel %vm189_vm0, %v885_v6, 0 }
  0xd0   : > { %905 = vmatpush.bf16.msra.mxu3 %v896_v34 }
  0xd1   : > { %1592 = vrot.lane.b32.xlu2 %v1591_v5, %s2246_s18  ;;  %v1248_v5 = vsel %vm189_vm0, %v1241_v2, 0 }
  0xd5   : > { %2158 = vmatmul.msk.bf16.vlgmr.msrb.gmra.mxu1 %vm185_vm1, %v2395_v4  ;;  %v1007_v4 = vld [vmem:[%s2940_s1 + $0x14] sm:$0xf] }
  0xd6   : > { %v1014_v16 = vsel %vm189_vm0, %v1007_v4, 0  ;;  %1158 = vmatpush.bf16.msrb.mxu1 %v1149_v35  ;;  %v1082_v4 = vshrl.u32 %v1080_v0, 16  ;;  %v1452_v0 = vld [vmem:[%s2940_s1 + $0x10] sm:$0xf] }
  0xd7   : > { %2144 = vmatmul.msk.bf16.vlgmr.msrb.gmra.mxu0 %vm185_vm1, %v2341_v41  ;;  %2159 = vmatmul.msk.bf16.vlgmr.msrb.gmra.mxu2 %vm185_vm1, %v963_v7  ;;  %v991_v41 = vsel %vm189_vm0, %v984_v10, 0  ;;  %v1459_v2 = vsel %vm189_vm0, %v1452_v0, 0 }
  0xd8   : > { %924 = vmatpush.bf16.msrb.mxu0 %v915_v27  ;;  %v1197_v27 = vpop.permute.xlu0 %1196 }
  0xdf   : > { %2147 = vmatmul.msk.bf16.vlgmr.msrb.gmra.mxu3 %vm185_vm1, %v775_v37  ;;  %v1641_v37 = vrot.slane %v1639_v31, 1  ;;  %v1311_v31 = vld [vmem:[%s2940_s1 + $0x20] sm:$0xf] }
  0xe0   : > { %1000 = vmatpush.bf16.msrb.mxu3 %v991_v41  ;;  %v1009_v41 = vpop.permute.xlu1 %1008  ;;  %v1243_v29 = vpop.permute.xlu0 %1242  ;;  %v1326_v38 = vsel %vm189_vm0, %v1311_v31, 0 }
  0xe1   : > { %v2630_v39 = vor.u32 %v1641_v37, %v1637_v36 }
  0xe3   : > { %1710 = vrot.lane.b32.xlu2 %v2630_v39, %s2248_s20 }
  0xe5   : > { %2162 = vmatmul.msk.bf16.vlgmr.msra.gmra.mxu1 %vm185_vm1, %v2375_v55  ;;  %v1092_v55 = vsel %vm189_vm0, %v1077_v22, 0 }
  0xe6   : > { %1257 = vmatpush.bf16.msra.mxu1 %v1248_v5 }
  0xe7   : > { %2148 = vmatmul.msk.bf16.vlgmr.msra.gmra.mxu0 %vm185_vm1, %v2344_v42  ;;  %2163 = vmatmul.msk.bf16.vlgmr.msra.gmra.mxu2 %vm185_vm1, %v1056_v3  ;;  %v1164_v42 = vld [vmem:[%s2940_s1 + $0x8] sm:$0xf]  ;;  %v1086_v3 = vrot.slane %v1084_v9, 1  ;;  %v2745_v9 = vld [vmem:[%s2941_s2] ss:$0 sm:$0xff] }
  0xe8   : > { %1023 = vmatpush.bf16.msra.mxu0 %v1014_v16  ;;  %v1179_v30 = vsel %vm189_vm0, %v1164_v42, 0  ;;  %v2684_v16 = vpop.f32.mrf.mxu2  ;;  %v1220_v26 = vpop.permute.xlu1 %1219 }
  0xe9   : > { %1188 = vmatpush.bf16.msrb.mxu2 %v1179_v30  ;;  %v1087_v22 = vor.u32 %v1086_v3, %v1082_v4  ;;  %v1354_v30 = vld [vmem:[%s2940_s1 + $0x4] sm:$0xf]  ;;  %v1431_v1 = vpop.permute.xlu0 %1430 }
  0xea   : > { %v1364_v44 = vsel %vm189_vm0, %v1354_v30, 0 }
  0xed   : > { %1278 = vmatpush.bf16.msra.mxu2 %v1269_v59 }
  0xef   : > { %2156 = vmatmul.msk.bf16.vlgmr.msra.gmra.mxu3 %vm185_vm1, %v891_v25 }
  0xf0   : > { %1101 = vmatpush.bf16.msra.mxu3 %v1092_v55  ;;  %v460_v55 = vpop.f32.mrf.mxu2  ;;  %v1359_v51 = vpop.permute.xlu1 %1358 }
  0xf2   : > { %v2636_v48 = vpop.f32.mrf.mxu1 }
  0xf5   : > { %2171 = vmatmul.msk.bf16.vlgmr.msrb.gmra.mxu1 %vm185_vm1, %v2416_v15  ;;  %v1756_v15 = vpack.c.b16 %v2655_v52, %v2655_v52 }
  0xf6   : > { %1373 = vmatpush.bf16.msrb.mxu1 %v1364_v44 }
  0xf7   : > { %2157 = vmatmul.msk.bf16.vlgmr.msrb.gmra.mxu0 %vm185_vm1, %v2347_v43  ;;  %2172 = vmatmul.msk.bf16.vlgmr.msrb.gmra.mxu2 %vm185_vm1, %v2443_v40  ;;  %v1868_v43 = vunpack.c.l.b16 %v2209_v11  ;;  %v986_v40 = vpop.permute.xlu2 %985 }
  0xf8   : > { %1139 = vmatpush.bf16.msrb.mxu0 %v1130_v47  ;;  %1757 = vrot.lane.b32.xlu2 %v1756_v15, %s2246_s18  ;;  %v2707_v47 = vld [vmem:[%s2283_s17 + $0x40] sm:$0xf] }
  0xf9   : > { %v1869_v57 = vpack.c.b16 %v1868_v43, %v1824_v21  ;;  %v1285_v21 = vld [vmem:[%s2940_s1 + $0x1c] sm:$0xf]  ;;  %v2712_v11 = vunpack.c.l.b16 %v2707_v47 }
  0xfa   : > { %v322_v60 = vpop.f32.mrf.mxu1  ;;  %v1295_v24 = vsel %vm189_vm0, %v1285_v21, 0  ;;  %v1314_v21 = vpack.c.b16 %v1313_v8, %v2502_v20 }
  0xfb   : > { %v1873_v34 = vshll.u32 %v1869_v57, 16  ;;  %v1871_v6 = vshrl.u32 %v1869_v57, 16 }
  0xfc   : > { %v1316_v31 = vshrl.u32 %v1314_v21, 16 }
  0xfd   : > { %v1875_v7 = vrot.slane %v1873_v34, 1 }
  0xff   : > { %2160 = vmatmul.msk.bf16.vlgmr.msrb.gmra.mxu3 %vm185_vm1, %v986_v40  ;;  %v2674_v56 = vor.u32 %v1875_v7, %v1871_v6  ;;  %v1125_v36 = vpop.permute.xlu2 %1124  ;;  %v1398_v40 = vld [vmem:[%s2940_s1 + $0x8] sm:$0xf]  ;;  %v1429_v6 = vld [vmem:[%s2940_s1 + $0xc] sm:$0xf] }
 0x100   : > { %1211 = vmatpush.bf16.msrb.mxu3 %v1202_v58  ;;  %v1413_v58 = vsel %vm189_vm0, %v1398_v40, 0 }
 0x101   : > { %1944 = vrot.lane.b32.xlu0 %v2674_v56, %s2248_s20 }
 0x102   : > { %v2679_v13 = vpop.f32.mrf.mxu1 }
 0x103   : > { %v459_v40 = vadd.f32 %v2684_v16, %v2679_v13 }
 0x104   : > { %v202_v10 = vpop.f32.mrf.mxu0 }
 0x105   : > { %2175 = vmatmul.msk.bf16.vlgmr.msra.gmra.mxu1 %vm185_vm1, %v1243_v29  ;;  %v222_v42 = vadd.f32 %v2597_v14, %v202_v10  ;;  %v2183_v10 = vld [vmem:[%s2283_s17 + $0x34] sm:$0x1] }
 0x106   : > { %1468 = vmatpush.bf16.msra.mxu1 %v1459_v2  ;;  %v1547_v29 = vunpack.c.l.b16 %v2183_v10  ;;  %v1587_v2 = vld [vmem:[%s2940_s1] sm:$0xf] }
 0x107   : > { %2161 = vmatmul.msk.bf16.vlgmr.msra.gmra.mxu0 %vm185_vm1, %v1009_v41  ;;  %2176 = vmatmul.msk.bf16.vlgmr.msra.gmra.mxu2 %vm185_vm1, %v2499_v19  ;;  %v1353_v19 = vld [vmem:[%s2940_s1] sm:$0xf]  ;;  %v255_v33 = vadd.f32 %v2600_v17, %v222_v42  ;;  %v1990_v17 = vpack.c.b16 %v2712_v11, %v2712_v11  ;;  %v1290_v60 = vpop.permute.xlu2 %1289  ;;  %v1498_v42 = vld [vmem:[%s2940_s1 + $0x18] sm:$0xf]  ;;  %v1617_v8 = vsel %vm189_vm0, %v1587_v2, 0 }
 0x108   : > { %1234 = vmatpush.bf16.msra.mxu0 %v1225_v12  ;;  %v1383_v28 = vsel %vm189_vm0, %v1353_v19, 0  ;;  %v1548_v20 = vpack.c.b16 %v1547_v29, %v2533_v46  ;;  %v1503_v44 = vsel %vm189_vm0, %v1498_v42, 0  ;;  %v1588_v46 = vld [vmem:[%s2940_s1 + $0x4] sm:$0xf]  ;;  %v1632_v29 = vld [vmem:[%s2940_s1 + $0x8] sm:$0xf] }
 0x109   : > { %1392 = vmatpush.bf16.msrb.mxu2 %v1383_v28  ;;  %1991 = vrot.lane.b32.xlu2 %v1990_v17, %s2246_s18  ;;  %v1318_v28 = vshll.u32 %v1314_v21, 16 }
 0x10a   : > { %v441_v25 = vpop.f32.mrf.mxu1 }
 0x10c   : > { %v204_v23 = vpop.f32.mrf.mxu0 }
 0x10d   : > { %v1454_v23 = vpop.permute.xlu1 %1453 }
 0x10f   : > { %2164 = vmatmul.msk.bf16.vlgmr.msra.gmra.mxu3 %vm185_vm1, %v1087_v22 }
 0x110   : > { %1304 = vmatpush.bf16.msra.mxu3 %v1295_v24 }
 0x112   : > { %v274_v14 = vpop.f32.mrf.mxu3  ;;  %v2709_v49 = vpop.f32.mrf.mxu1 }
 0x113   : > { %v278_v37 = vadd.f32 %v274_v14, %v255_v33  ;;  %v1320_v33 = vrot.slane %v1318_v28, 1  ;;  %v1647_v28 = vsel %vm189_vm0, %v1632_v29, 0 }
 0x114   : > { %v297_v35 = vpop.f32.mrf.mxu0 }
 0x115   : > { %v301_v43 = vadd.f32 %v297_v35, %v278_v37  ;;  %2184 = vmatmul.msk.bf16.vlgmr.msrb.gmra.mxu1 %vm185_vm1, %v1359_v51  ;;  %v1552_v35 = vshll.u32 %v1548_v20, 16  ;;  %v1550_v37 = vshrl.u32 %v1548_v20, 16  ;;  %v1519_v51 = vld [vmem:[%s2940_s1 + $0x1c] sm:$0xf] }
 0x117   : > { %2170 = vmatmul.msk.bf16.vlgmr.msrb.gmra.mxu0 %vm185_vm1, %v1125_v36  ;;  %2185 = vmatmul.msk.bf16.vlgmr.msrb.gmra.mxu2 %vm185_vm1, %v2466_v62  ;;  %v1475_v62 = vld [vmem:[%s2940_s1 + $0x14] sm:$0xf]  ;;  %v324_v57 = vadd.f32 %v2636_v48, %v301_v43  ;;  %v1598_v36 = vsel %vm189_vm0, %v1588_v46, 0  ;;  %v1545_v43 = vld [vmem:[%s2940_s1 + $0x20] sm:$0xf] }
 0x118   : > { %1335 = vmatpush.bf16.msrb.mxu0 %v1326_v38  ;;  %v1482_v59 = vsel %vm189_vm0, %v1475_v62, 0  ;;  %v1560_v62 = vsel %vm189_vm0, %v1545_v43, 0 }
 0x119   : > { %1491 = vmatpush.bf16.msra.mxu2 %v1482_v59  ;;  %v345_v48 = vadd.f32 %v2642_v32, %v324_v57  ;;  %v1436_v32 = vsel %vm189_vm0, %v1429_v6, 0  ;;  %1569 = vmatpush.bf16.msrb.mxu1 %v1560_v62  ;;  %v1686_v6 = vld [vmem:[%s2940_s1 + $0x10] sm:$0xf] }
 0x11a   : > { %v276_v53 = vpop.f32.mrf.mxu3  ;;  %v2722_v54 = vpop.f32.mrf.mxu2 }
 0x11b   : > { %v536_v34 = vpop.f32.mrf.mxu1  ;;  %v1554_v53 = vrot.slane %v1552_v35, 1 }
 0x11c   : > { %v299_v15 = vpop.f32.mrf.mxu0 }
 0x11d   : > { %1607 = vmatpush.bf16.msrb.mxu2 %v1598_v36  ;;  %v1321_v15 = vor.u32 %v1320_v33, %v1316_v31  ;;  %v1555_v0 = vor.u32 %v1554_v53, %v1550_v37 }
 0x11f   : > { %2173 = vmatmul.msk.bf16.vlgmr.msrb.gmra.mxu3 %vm185_vm1, %v1197_v27 }
 0x120   : > { %1422 = vmatpush.bf16.msrb.mxu3 %v1413_v58 }
 0x122   : > { %v367_v5 = vpop.f32.mrf.mxu3  ;;  %v559_v7 = vpop.f32.mrf.mxu2 }
 0x123   : > { %v371_v27 = vadd.f32 %v367_v5, %v345_v48  ;;  %v1477_v4 = vpop.permute.xlu2 %1476  ;;  %v2749_v3 = vpop.f32.mrf.mxu1 }
 0x124   : > { %v398_v41 = vpop.f32.mrf.mxu0 }
 0x125   : > { %v402_v12 = vadd.f32 %v398_v41, %v371_v27  ;;  %2188 = vmatmul.msk.bf16.vlgmr.msra.gmra.mxu1 %vm185_vm1, %v1454_v23  ;;  %v1693_v27 = vsel %vm189_vm0, %v1686_v6, 0  ;;  %v1663_v41 = vld [vmem:[%s2940_s1 + $0xc] sm:$0xf] }
 0x127   : > { %v406_v22 = vadd.f32 %v2745_v9, %v402_v12  ;;  %2174 = vmatmul.msk.bf16.vlgmr.msra.gmra.mxu0 %vm185_vm1, %v1220_v26  ;;  %2189 = vmatmul.msk.bf16.vlgmr.msra.gmra.mxu2 %vm185_vm1, %v1477_v4  ;;  %v2197_v12 = vld [vmem:[%s2283_s17 + $0x3c] sm:$0x1]  ;;  %v1670_v4 = vsel %vm189_vm0, %v1663_v41, 0 }
 0x128   : > { %1445 = vmatpush.bf16.msra.mxu0 %v1436_v32  ;;  %1702 = vmatpush.bf16.msra.mxu2 %v1693_v27  ;;  %v1524_v32 = vpop.permute.xlu0 %1523  ;;  %v1781_v23 = vunpack.c.l.b16 %v2197_v12  ;;  %v1866_v12 = vld [vmem:[%s2940_s1 + $0x8] sm:$0xf] }
 0x129   : > { %v407_v24 = vmul.f32 0.25, %v406_v22  ;;  %1679 = vmatpush.bf16.msra.mxu1 %v1670_v4 }
 0x12a   : > { %v369_v25 = vpop.f32.mrf.mxu3  ;;  %v2759_v19 = vpop.f32.mrf.mxu2 }
 0x12b   : > { %v408_v55 = vmax.f32 %v406_v22, %v407_v24  ;;  %v637_v14 = vpop.f32.mrf.mxu1  ;;  %v1593_v58 = vpop.permute.xlu2 %1592 }
 0x12c   : > { %v400_v26 = vpop.f32.mrf.mxu0  ;;  %v1688_v25 = vpop.permute.xlu1 %1687  ;;  %v1709_v14 = vld [vmem:[%s2940_s1 + $0x14] sm:$0xf] }
 0x12d   : > { %v409_v30 = vpack.c.bf16 %v408_v55, %v408_v55  ;;  %v1782_v55 = vpack.c.b16 %v1781_v23, %v2655_v52  ;;  %v1716_v46 = vsel %vm189_vm0, %v1709_v14, 0 }
 0x12f   : > { %411 = vst.msk [vmem:[%s2766_s21] sm:$0xf] %vm410_vm2, %v409_v30  ;;  %2177 = vmatmul.msk.bf16.vlgmr.msra.gmra.mxu3 %vm185_vm1, %v1290_v60  ;;  %v1529_v60 = vsel %vm189_vm0, %v1519_v51, 0  ;;  %v1786_v33 = vshll.u32 %v1782_v55, 16  ;;  %v1784_v37 = vshrl.u32 %v1782_v55, 16 }
 0x130   : > { %1512 = vmatpush.bf16.msra.mxu3 %v1503_v44  ;;  %v1665_v26 = vpop.permute.xlu0 %1664 }
 0x132   : > { %v488_v38 = vpop.f32.mrf.mxu3  ;;  %v675_v17 = vpop.f32.mrf.mxu2 }
 0x133   : > { %v492_v59 = vadd.f32 %v488_v38, %v459_v40  ;;  %v2786_v34 = vpop.f32.mrf.mxu1  ;;  %v1788_v38 = vrot.slane %v1786_v33, 1  ;;  %v1779_v17 = vld [vmem:[%s2940_s1 + $0x20] sm:$0xf] }
 0x134   : > { %v511_v57 = vpop.f32.mrf.mxu0  ;;  %v1794_v53 = vsel %vm189_vm0, %v1779_v17, 0 }
 0x135   : > { %v515_v13 = vadd.f32 %v511_v57, %v492_v59  ;;  %2192 = vmatmul.msk.bf16.vlgmr.msrb.gmra.mxu1 %vm185_vm1, %v1555_v0  ;;  %v1789_v57 = vor.u32 %v1788_v38, %v1784_v37 }
 0x137   : > { %2178 = vmatmul.msk.bf16.vlgmr.msrb.gmra.mxu0 %vm185_vm1, %v1321_v15  ;;  %2198 = vmatmul.msk.bf16.vlgmr.msrb.gmra.mxu2 %vm185_vm1, %v1593_v58  ;;  %v538_v7 = vadd.f32 %v2709_v49, %v515_v13  ;;  %v1732_v15 = vld [vmem:[%s2940_s1 + $0x18] sm:$0xf] }
 0x138   : > { %1538 = vmatpush.bf16.msrb.mxu0 %v1529_v60  ;;  %1803 = vmatpush.bf16.msrb.mxu2 %v1794_v53  ;;  %v1737_v0 = vsel %vm189_vm0, %v1732_v15, 0  ;;  %v1899_v23 = vpop.permute.xlu0 %1898 }
 0x139   : > { %v561_v49 = vadd.f32 %v2722_v54, %v538_v7  ;;  %v1897_v7 = vld [vmem:[%s2940_s1 + $0xc] sm:$0xf] }
 0x13a   : > { %v490_v16 = vpop.f32.mrf.mxu3  ;;  %v2793_v48 = vpop.f32.mrf.mxu2 }
 0x13b   : > { %v747_v10 = vpop.f32.mrf.mxu1 }
 0x13c   : > { %v513_v5 = vpop.f32.mrf.mxu0  ;;  %v1904_v10 = vsel %vm189_vm0, %v1897_v7, 0 }
 0x13d   : > { %v2833_v43 = vpop.permute.xlu2 %1710  ;;  %v1822_v5 = vld [vmem:[%s2940_s1 + $0x4] sm:$0xf] }
 0x13e   : > { %v1832_v27 = vsel %vm189_vm0, %v1822_v5, 0 }
 0x13f   : > { %2186 = vmatmul.msk.bf16.vlgmr.msrb.gmra.mxu3 %vm185_vm1, %v2554_v61 }
 0x140   : > { %1626 = vmatpush.bf16.msrb.mxu3 %v1617_v8 }
 0x142   : > { %v578_v21 = vpop.f32.mrf.mxu3  ;;  %v770_v22 = vpop.f32.mrf.mxu2 }
 0x143   : > { %v582_v61 = vadd.f32 %v578_v21, %v561_v49  ;;  %v2814_v20 = vpop.f32.mrf.mxu1  ;;  %v1821_v49 = vld [vmem:[%s2940_s1] sm:$0xf] }
 0x144   : > { %v604_v24 = vpop.f32.mrf.mxu0 }
 0x145   : > { %v608_v42 = vadd.f32 %v604_v24, %v582_v61  ;;  %2201 = vmatmul.msk.bf16.vlgmr.msra.gmra.mxu1 %vm185_vm1, %v1665_v26  ;;  %v1851_v61 = vsel %vm189_vm0, %v1821_v49, 0 }
 0x147   : > { %v639_v54 = vadd.f32 %v2749_v3, %v608_v42  ;;  %2187 = vmatmul.msk.bf16.vlgmr.msra.gmra.mxu0 %vm185_vm1, %v1431_v1  ;;  %2202 = vmatmul.msk.bf16.vlgmr.msra.gmra.mxu2 %vm185_vm1, %v1688_v25 }
 0x148   : > { %1656 = vmatpush.bf16.msra.mxu0 %v1647_v28  ;;  %1913 = vmatpush.bf16.msra.mxu2 %v1904_v10  ;;  %v1920_v28 = vld [vmem:[%s2940_s1 + $0x10] sm:$0xf] }
 0x149   : > { %v640_v30 = vadd.f32 %v2745_v9, %v639_v54 }
 0x14a   : > { %v580_v44 = vpop.f32.mrf.mxu3  ;;  %v2824_v31 = vpop.f32.mrf.mxu2 }
 0x14b   : > { %v641_v52 = vmul.f32 0.25, %v640_v30  ;;  %v840_v36 = vpop.f32.mrf.mxu1 }
 0x14c   : > { %v606_v3 = vpop.f32.mrf.mxu0 }
 0x14d   : > { %v642_v35 = vmax.f32 %v640_v30, %v641_v52  ;;  %v1927_v30 = vsel %vm189_vm0, %v1920_v28, 0 }
 0x14f   : > { %v643_v51 = vpack.c.bf16 %v642_v35, %v642_v35  ;;  %2190 = vmatmul.msk.bf16.vlgmr.msra.gmra.mxu3 %vm185_vm1, %v2530_v45  ;;  %v1753_v45 = vld [vmem:[%s2940_s1 + $0x1c] sm:$0xf]  ;;  %v1943_v35 = vld [vmem:[%s2940_s1 + $0x14] sm:$0xf] }
 0x150   : > { %1725 = vmatpush.bf16.msra.mxu3 %v1716_v46  ;;  %v1763_v59 = vsel %vm189_vm0, %v1753_v45, 0  ;;  %v1950_v38 = vsel %vm189_vm0, %v1943_v35, 0 }
 0x151   : > { %2137 = vst.msk [vmem:[%s2766_s21 + $0x4] sm:$0xf] %vm410_vm2, %v643_v51  ;;  %1772 = vmatpush.bf16.msrb.mxu1 %v1763_v59 }
 0x152   : > { %v692_v40 = vpop.f32.mrf.mxu3  ;;  %v871_v62 = vpop.f32.mrf.mxu2 }
 0x153   : > { %v693_v60 = vadd.f32 %v692_v40, %v2759_v19  ;;  %v2847_v1 = vpop.f32.mrf.mxu1  ;;  %v1758_v13 = vpop.permute.xlu2 %1757 }
 0x154   : > { %v722_v58 = vpop.f32.mrf.mxu0  ;;  %v1827_v62 = vpop.permute.xlu1 %1826 }
 0x155   : > { %v726_v16 = vadd.f32 %v722_v58, %v693_v60  ;;  %2205 = vmatmul.msk.bf16.vlgmr.msrb.gmra.mxu1 %vm185_vm1, %v1758_v13 }
 0x157   : > { %2191 = vmatmul.msk.bf16.vlgmr.msrb.gmra.mxu0 %vm185_vm1, %v1524_v32  ;;  %2206 = vmatmul.msk.bf16.vlgmr.msrb.gmra.mxu2 %vm185_vm1, %v1789_v57  ;;  %v749_v8 = vadd.f32 %v2786_v34, %v726_v16  ;;  %v1881_v32 = vsel %vm189_vm0, %v1866_v12, 0 }
 0x158   : > { %1746 = vmatpush.bf16.msrb.mxu0 %v1737_v0  ;;  %1890 = vmatpush.bf16.msra.mxu1 %v1881_v32 }
 0x159   : > { %v772_v4 = vadd.f32 %v2793_v48, %v749_v8 }
 0x15a   : > { %v694_v2 = vpop.f32.mrf.mxu3  ;;  %v2854_v6 = vpop.f32.mrf.mxu2 }
 0x15b   : > { %v958_v41 = vpop.f32.mrf.mxu1 }
 0x15c   : > { %v724_v19 = vpop.f32.mrf.mxu0 }
 0x15f   : > { %2199 = vmatmul.msk.bf16.vlgmr.msrb.gmra.mxu3 %vm185_vm1, %v2560_v63 }
 0x160   : > { %1841 = vmatpush.bf16.msrb.mxu3 %v1832_v27 }
 0x162   : > { %v791_v34 = vpop.f32.mrf.mxu3  ;;  %v981_v21 = vpop.f32.mrf.mxu2 }
 0x163   : > { %v795_v29 = vadd.f32 %v791_v34, %v772_v4  ;;  %v1046_v24 = vpop.f32.mrf.mxu1  ;;  %v1992_v37 = vpop.permute.xlu2 %1991 }
 0x164   : > { %v812_v22 = vpop.f32.mrf.mxu0 }
 0x165   : > { %v816_v63 = vadd.f32 %v812_v22, %v795_v29  ;;  %2214 = vmatmul.msk.bf16.vlgmr.msra.gmra.mxu1 %vm185_vm1, %v2674_v56  ;;  %v1966_v56 = vld [vmem:[%s2940_s1 + $0x18] sm:$0xf] }
 0x166   : > { %v1971_v33 = vsel %vm189_vm0, %v1966_v56, 0 }
 0x167   : > { %v842_v25 = vadd.f32 %v2814_v20, %v816_v63  ;;  %2200 = vmatmul.msk.bf16.vlgmr.msra.gmra.mxu0 %vm185_vm1, %v2630_v39  ;;  %2215 = vmatmul.msk.bf16.vlgmr.msra.gmra.mxu2 %vm185_vm1, %v1899_v23  ;;  %v1987_v39 = vld [vmem:[%s2940_s1 + $0x1c] sm:$0xf] }
 0x168   : > { %1860 = vmatpush.bf16.msra.mxu0 %v1851_v61  ;;  %v1997_v44 = vsel %vm189_vm0, %v1987_v39, 0  ;;  %1980 = vmatpush.bf16.msrb.mxu1 %v1971_v33 }
 0x169   : > { %v873_v48 = vadd.f32 %v2824_v31, %v842_v25  ;;  %2006 = vmatpush.bf16.msrb.mxu2 %v1997_v44 }
 0x16a   : > { %v793_v42 = vpop.f32.mrf.mxu3  ;;  %v1072_v55 = vpop.f32.mrf.mxu2 }
 0x16b   : > { %v874_v54 = vadd.f32 %v2745_v9, %v873_v48  ;;  %v1048_v14 = vpop.f32.mrf.mxu1 }
 0x16c   : > { %v814_v20 = vpop.f32.mrf.mxu0 }
 0x16d   : > { %v875_v26 = vmul.f32 0.25, %v874_v54 }
 0x16f   : > { %v876_v31 = vmax.f32 %v874_v54, %v875_v26  ;;  %2203 = vmatmul.msk.bf16.vlgmr.msra.gmra.mxu3 %vm185_vm1, %v2833_v43  ;;  %v2013_v43 = vld [vmem:[%s2940_s1 + $0x20] sm:$0xf] }
 0x170   : > { %1936 = vmatpush.bf16.msra.mxu3 %v1927_v30  ;;  %v2028_v57 = vsel %vm189_vm0, %v2013_v43, 0 }
 0x171   : > { %v877_v52 = vpack.c.bf16 %v876_v31, %v876_v31 }
 0x172   : > { %v907_v3 = vpop.f32.mrf.mxu3  ;;  %v1074_v46 = vpop.f32.mrf.mxu2 }
 0x173   : > { %2151 = vst.msk [vmem:[%s2766_s21 + $0x8] sm:$0xf] %vm410_vm2, %v877_v52  ;;  %v1160_v51 = vpop.f32.mrf.mxu1  ;;  %v1945_v49 = vpop.permute.xlu0 %1944 }
 0x174   : > { %v926_v36 = vpop.f32.mrf.mxu0 }
 0x175   : > { %v927_v40 = vadd.f32 %v926_v36, %v907_v3  ;;  %2218 = vmatmul.msk.bf16.vlgmr.msrb.gmra.mxu1 %vm185_vm1, %v2707_v47  ;;  %v2211_v47 = vld [vmem:[%s2283_s17 + $0x44] sm:$0x1] }
 0x176   : > { %v2015_v7 = vunpack.c.l.b16 %v2211_v47 }
 0x177   : > { %2204 = vmatmul.msk.bf16.vlgmr.msrb.gmra.mxu0 %vm185_vm1, %v2648_v50  ;;  %2219 = vmatmul.msk.bf16.vlgmr.msrb.gmra.mxu2 %vm185_vm1, %v1992_v37  ;;  %v960_v50 = vadd.f32 %v2847_v1, %v927_v40  ;;  %v1922_v1 = vpop.permute.xlu1 %1921 }
 0x178   : > { %1959 = vmatpush.bf16.msrb.mxu0 %v1950_v38  ;;  %v2016_v10 = vpack.c.b16 %v2015_v7, %v2712_v11 }
 0x179   : > { %v983_v60 = vadd.f32 %v2854_v6, %v960_v50 }
 0x17a   : > { %v909_v17 = vpop.f32.mrf.mxu3  ;;  %v1190_v53 = vpop.f32.mrf.mxu2  ;;  %v2020_v4 = vshll.u32 %v2016_v10, 16  ;;  %v2018_v29 = vshrl.u32 %v2016_v10, 16 }
 0x17b   : > { %v1162_v45 = vpop.f32.mrf.mxu1 }
 0x17c   : > { %v928_v15 = vpop.f32.mrf.mxu0  ;;  %v2022_v22 = vrot.slane %v2020_v4, 1 }
 0x17e   : > { %v2023_v25 = vor.u32 %v2022_v22, %v2018_v29 }
 0x17f   : > { %2212 = vmatmul.msk.bf16.vlgmr.msrb.gmra.mxu3 %vm185_vm1, %v1827_v62 }
 0x180   : > { %2037 = vmatpush.bf16.msrb.mxu3 %v2028_v57 }
 0x182   : > { %v1002_v58 = vpop.f32.mrf.mxu3  ;;  %v1192_v59 = vpop.f32.mrf.mxu2 }
 0x183   : > { %v1006_v13 = vadd.f32 %v1002_v58, %v983_v60  ;;  %v1259_v16 = vpop.f32.mrf.mxu1 }
 0x184   : > { %v1025_v0 = vpop.f32.mrf.mxu0 }
 0x185   : > { %v1029_v2 = vadd.f32 %v1025_v0, %v1006_v13 }
 0x187   : > { %2213 = vmatmul.msk.bf16.vlgmr.msra.gmra.mxu0 %vm185_vm1, %v2606_v18  ;;  %v1050_v27 = vadd.f32 %v1046_v24, %v1029_v2 }
 0x189   : > { %v1076_v6 = vadd.f32 %v1072_v55, %v1050_v27 }
 0x18a   : > { %v1004_v5 = vpop.f32.mrf.mxu3  ;;  %v1280_v19 = vpop.f32.mrf.mxu2 }
 0x18b   : > { %v1261_v41 = vpop.f32.mrf.mxu1 }
 0x18c   : > { %v1027_v8 = vpop.f32.mrf.mxu0 }
 0x18f   : > { %2216 = vmatmul.msk.bf16.vlgmr.msra.gmra.mxu3 %vm185_vm1, %v1922_v1 }
 0x192   : > { %v1103_v12 = vpop.f32.mrf.mxu3  ;;  %v1282_v32 = vpop.f32.mrf.mxu2 }
 0x193   : > { %v1107_v18 = vadd.f32 %v1103_v12, %v1076_v6  ;;  %v1375_v63 = vpop.f32.mrf.mxu1 }
 0x194   : > { %v1141_v34 = vpop.f32.mrf.mxu0 }
 0x195   : > { %v1108_v21 = vadd.f32 %v2745_v9, %v1107_v18  ;;  %v1161_v28 = vadd.f32 %v1160_v51, %v1141_v34 }
 0x197   : > { %v1109_v23 = vmul.f32 0.25, %v1108_v21  ;;  %2217 = vmatmul.msk.bf16.vlgmr.msrb.gmra.mxu0 %vm185_vm1, %v1945_v49  ;;  %v1194_v39 = vadd.f32 %v1190_v53, %v1161_v28 }
 0x199   : > { %v1110_v11 = vmax.f32 %v1108_v21, %v1109_v23 }
 0x19a   : > { %v1105_v61 = vpop.f32.mrf.mxu3  ;;  %v1394_v24 = vpop.f32.mrf.mxu2 }
 0x19b   : > { %v1111_v48 = vpack.c.bf16 %v1110_v11, %v1110_v11  ;;  %v1377_v55 = vpop.f32.mrf.mxu1  ;;  %v1395_v60 = vadd.f32 %v1394_v24, %v1375_v63 }
 0x19c   : > { %v1143_v42 = vpop.f32.mrf.mxu0 }
 0x19d   : > { %2165 = vst.msk [vmem:[%s2766_s21 + $0xc] sm:$0xf] %vm410_vm2, %v1111_v48 }
 0x19f   : > { %2220 = vmatmul.msk.bf16.vlgmr.msrb.gmra.mxu3 %vm185_vm1, %v2023_v25 }
 0x1a2   : > { %v1213_v54 = vpop.f32.mrf.mxu3  ;;  %v1396_v20 = vpop.f32.mrf.mxu2 }
 0x1a3   : > { %v1217_v30 = vadd.f32 %v1213_v54, %v1194_v39  ;;  %v1470_v44 = vpop.f32.mrf.mxu1 }
 0x1a4   : > { %v1236_v26 = vpop.f32.mrf.mxu0 }
 0x1a5   : > { %v1240_v14 = vadd.f32 %v1236_v26, %v1217_v30 }
 0x1a7   : > { %v1263_v52 = vadd.f32 %v1259_v16, %v1240_v14 }
 0x1a9   : > { %v1284_v35 = vadd.f32 %v1280_v19, %v1263_v52 }
 0x1aa   : > { %v1215_v31 = vpop.f32.mrf.mxu3  ;;  %v1493_v56 = vpop.f32.mrf.mxu2 }
 0x1ab   : > { %v1472_v3 = vpop.f32.mrf.mxu1 }
 0x1ac   : > { %v1238_v33 = vpop.f32.mrf.mxu0 }
 0x1b2   : > { %v1306_v46 = vpop.f32.mrf.mxu3  ;;  %v1495_v36 = vpop.f32.mrf.mxu2 }
 0x1b3   : > { %v1310_v37 = vadd.f32 %v1306_v46, %v1284_v35  ;;  %v1571_v43 = vpop.f32.mrf.mxu1 }
 0x1b4   : > { %v1337_v38 = vpop.f32.mrf.mxu0 }
 0x1b5   : > { %v1341_v51 = vadd.f32 %v1337_v38, %v1310_v37 }
 0x1b7   : > { %v1342_v17 = vadd.f32 %v2745_v9, %v1341_v51 }
 0x1b9   : > { %v1343_v53 = vmul.f32 0.25, %v1342_v17 }
 0x1ba   : > { %v1308_v40 = vpop.f32.mrf.mxu3  ;;  %v1609_v15 = vpop.f32.mrf.mxu2 }
 0x1bb   : > { %v1344_v62 = vmax.f32 %v1342_v17, %v1343_v53  ;;  %v1573_v50 = vpop.f32.mrf.mxu1 }
 0x1bc   : > { %v1339_v57 = vpop.f32.mrf.mxu0 }
 0x1bd   : > { %v1345_v45 = vpack.c.bf16 %v1344_v62, %v1344_v62 }
 0x1bf   : > { %2179 = vst.msk [vmem:[%s2766_s21 + $0x10] sm:$0xf] %vm410_vm2, %v1345_v45 }
 0x1c2   : > { %v1424_v58 = vpop.f32.mrf.mxu3  ;;  %v1611_v59 = vpop.f32.mrf.mxu2 }
 0x1c3   : > { %v1428_v13 = vadd.f32 %v1424_v58, %v1395_v60  ;;  %v1681_v47 = vpop.f32.mrf.mxu1 }
 0x1c4   : > { %v1447_v0 = vpop.f32.mrf.mxu0 }
 0x1c5   : > { %v1451_v16 = vadd.f32 %v1447_v0, %v1428_v13 }
 0x1c7   : > { %v1474_v7 = vadd.f32 %v1470_v44, %v1451_v16 }
 0x1c9   : > { %v1497_v1 = vadd.f32 %v1493_v56, %v1474_v7 }
 0x1ca   : > { %v1426_v2 = vpop.f32.mrf.mxu3  ;;  %v1704_v5 = vpop.f32.mrf.mxu2 }
 0x1cb   : > { %v1683_v8 = vpop.f32.mrf.mxu1 }
 0x1cc   : > { %v1449_v19 = vpop.f32.mrf.mxu0 }
 0x1d2   : > { %v1514_v27 = vpop.f32.mrf.mxu3  ;;  %v1706_v10 = vpop.f32.mrf.mxu2 }
 0x1d3   : > { %v1518_v41 = vadd.f32 %v1514_v27, %v1497_v1  ;;  %v1774_v4 = vpop.f32.mrf.mxu1 }
 0x1d4   : > { %v1540_v6 = vpop.f32.mrf.mxu0 }
 0x1d5   : > { %v1544_v12 = vadd.f32 %v1540_v6, %v1518_v41 }
 0x1d7   : > { %v1575_v32 = vadd.f32 %v1571_v43, %v1544_v12 }
 0x1d9   : > { %v1576_v18 = vadd.f32 %v2745_v9, %v1575_v32 }
 0x1da   : > { %v1516_v34 = vpop.f32.mrf.mxu3  ;;  %v1805_v49 = vpop.f32.mrf.mxu2 }
 0x1db   : > { %v1577_v21 = vmul.f32 0.25, %v1576_v18  ;;  %v1776_v63 = vpop.f32.mrf.mxu1 }
 0x1dc   : > { %v1542_v29 = vpop.f32.mrf.mxu0 }
 0x1dd   : > { %v1578_v22 = vmax.f32 %v1576_v18, %v1577_v21 }
 0x1df   : > { %v1579_v23 = vpack.c.bf16 %v1578_v22, %v1578_v22 }
 0x1e1   : > { %2193 = vst.msk [vmem:[%s2766_s21 + $0x14] sm:$0xf] %vm410_vm2, %v1579_v23 }
 0x1e2   : > { %v1628_v11 = vpop.f32.mrf.mxu3  ;;  %v1807_v61 = vpop.f32.mrf.mxu2 }
 0x1e3   : > { %v1629_v25 = vadd.f32 %v1628_v11, %v1609_v15  ;;  %v1892_v48 = vpop.f32.mrf.mxu1 }
 0x1e4   : > { %v1658_v24 = vpop.f32.mrf.mxu0 }
 0x1e5   : > { %v1662_v42 = vadd.f32 %v1658_v24, %v1629_v25 }
 0x1e7   : > { %v1685_v20 = vadd.f32 %v1681_v47, %v1662_v42 }
 0x1e9   : > { %v1708_v26 = vadd.f32 %v1704_v5, %v1685_v20 }
 0x1ea   : > { %v1630_v28 = vpop.f32.mrf.mxu3  ;;  %v1915_v55 = vpop.f32.mrf.mxu2 }
 0x1eb   : > { %v1894_v39 = vpop.f32.mrf.mxu1 }
 0x1ec   : > { %v1660_v54 = vpop.f32.mrf.mxu0 }
 0x1f2   : > { %v1727_v30 = vpop.f32.mrf.mxu3  ;;  %v1917_v44 = vpop.f32.mrf.mxu2 }
 0x1f3   : > { %v1731_v14 = vadd.f32 %v1727_v30, %v1708_v26  ;;  %v1982_v52 = vpop.f32.mrf.mxu1 }
 0x1f4   : > { %v1748_v31 = vpop.f32.mrf.mxu0 }
 0x1f5   : > { %v1752_v56 = vadd.f32 %v1748_v31, %v1731_v14 }
 0x1f7   : > { %v1778_v33 = vadd.f32 %v1774_v4, %v1752_v56 }
 0x1f9   : > { %v1809_v3 = vadd.f32 %v1805_v49, %v1778_v33 }
 0x1fa   : > { %v1729_v35 = vpop.f32.mrf.mxu3  ;;  %v2008_v46 = vpop.f32.mrf.mxu2 }
 0x1fb   : > { %v1810_v36 = vadd.f32 %v2745_v9, %v1809_v3  ;;  %v1984_v17 = vpop.f32.mrf.mxu1 }
 0x1fc   : > { %v1750_v37 = vpop.f32.mrf.mxu0 }
 0x1fd   : > { %v1811_v38 = vmul.f32 0.25, %v1810_v36 }
 0x1ff   : > { %v1812_v51 = vmax.f32 %v1810_v36, %v1811_v38 }
 0x201   : > { %v1813_v43 = vpack.c.bf16 %v1812_v51, %v1812_v51 }
 0x202   : > { %v1843_v53 = vpop.f32.mrf.mxu3  ;;  %v2010_v40 = vpop.f32.mrf.mxu2 }
 0x203   : > { %2207 = vst.msk [vmem:[%s2766_s21 + $0x18] sm:$0xf] %vm410_vm2, %v1813_v43 }
 0x204   : > { %v1862_v15 = vpop.f32.mrf.mxu0 }
 0x205   : > { %v1863_v57 = vadd.f32 %v1862_v15, %v1843_v53 }
 0x207   : > { %v1896_v50 = vadd.f32 %v1892_v48, %v1863_v57 }
 0x209   : > { %v1919_v59 = vadd.f32 %v1915_v55, %v1896_v50 }
 0x20a   : > { %v1845_v62 = vpop.f32.mrf.mxu3 }
 0x20c   : > { %v1864_v45 = vpop.f32.mrf.mxu0 }
 0x212   : > { %v1938_v58 = vpop.f32.mrf.mxu3 }
 0x213   : > { %v1942_v0 = vadd.f32 %v1938_v58, %v1919_v59 }
 0x214   : > { %v1961_v60 = vpop.f32.mrf.mxu0 }
 0x215   : > { %v1965_v13 = vadd.f32 %v1961_v60, %v1942_v0 }
 0x217   : > { %v1986_v2 = vadd.f32 %v1982_v52, %v1965_v13 }
 0x219   : > { %v2012_v5 = vadd.f32 %v2008_v46, %v1986_v2 }
 0x21a   : > { %v1940_v47 = vpop.f32.mrf.mxu3 }
 0x21c   : > { %v1963_v16 = vpop.f32.mrf.mxu0 }
 0x222   : > { %v2039_v19 = vpop.f32.mrf.mxu3 }
 0x223   : > { %v2043_v7 = vadd.f32 %v2039_v19, %v2012_v5 }
 0x225   : > { %v2044_v8 = vadd.f32 %v2745_v9, %v2043_v7 }
 0x227   : > { %v2045_v1 = vmul.f32 0.25, %v2044_v8 }
 0x229   : > { %v2046_v27 = vmax.f32 %v2044_v8, %v2045_v1 }
 0x22a   : > { %v2041_v10 = vpop.f32.mrf.mxu3 }
 0x22b   : > { %v2047_v41 = vpack.c.bf16 %v2046_v27, %v2046_v27 }
 0x22d   : > { %2221 = vst.msk [vmem:[%s2766_s21 + $0x1c] sm:$0xf] %vm410_vm2, %v2047_v41 }
 0x22e PF: > { %s13_s12 = sadd.s32 1, %s2244_s12  }
 0x22f   : > { %p10_p4 = scmp.ge.s32.totalorder %s13_s12, 4  }
 0x231   :  { %12 = sbr.rel (!%p10_p4) target bundleno = 1 (0x1), region = 77 }

// kernel: discriminator_forward.7
= control target key start
LH: loop header
LB: loop body
LE: loop exit
PB: predicated region body
PF: predicated region fallthrough
CT: control target
= control target key end

     0   :  { %s1183_s12 = smov 0   ;;  %s1389_s0 = inlined_call_operand.vmem [shape: bf16[2,3,3,128], index: 0, kind: input, shape index: {}]   ;;  %s1390_s1 = inlined_call_operand.vmem [shape: bf16[288,64], index: 1, kind: input, shape index: {}]   ;;  %s1391_s2 = inlined_call_operand.vmem [shape: f32[1,64], index: 2, kind: input, shape index: {}]   ;;  %s1392_s3 = inlined_call_operand.vmem [shape: bf16[2,2,2,64], index: 3, kind: output, shape index: {}]  }
   0x1 LB: > { %s928_s13 = sadd.s32 4294967295, %s1158_s12   ;;  %p932_p0 = scmp.ge.s32.totalorder %s1158_s12, 1  ;;  %s1158_s12 = sphi %s1183_s12, %s13_s12  }
   0x2   : > { %p137_p1 = scmp.lt.s32.totalorder %s1158_s12, 3 }
   0x4   : > { %p138_p2 = pnand %p932_p0, %p137_p1 }
   0x5   : > { %p160_p3 = scmp.lt.s32.totalorder (!%p138_p2), %s928_s13, 1  ;;  %s1160_s18 = smov (!%p138_p2), 96  }
   0x6   : > { %141 = sbr.rel (%p138_p2) target bundleno = 374 (0x176), region = 32  ;;  %s1161_s19 = smov (!%p138_p2), 64  }
   0x7   : > { %s1162_s20 = smov (!%p138_p2), 32  }
   0xb   : > { %s1394_s13 = smov (!%p160_p3, %s928_s13), 1  ;;  %v1106_v16 = vld [vmem:[%s1390_s1 + $0x18] sm:$0xff]  ;;  %v1108_v17 = vld [vmem:[%s1390_s1 + $0x28] sm:$0xff]  ;;  %v1105_v18 = vld [vmem:[%s1390_s1 + $0x10] sm:$0xff]  ;;  %vm200_vm0 = vcmask 261120   ;;  %vm523_vm1 = vcmask 516096  }
   0xc   : > { %s1139_s14 = smul.u32 6, %s1394_s13  ;;  %210 = vmatpush.bf16.msra.mxu0 %v1106_v16  ;;  %277 = vmatpush.bf16.msra.mxu2 %v1108_v17  ;;  %v1110_v21 = vld [vmem:[%s1390_s1 + $0x38] sm:$0xff]  ;;  %v1104_v22 = vld [vmem:[%s1390_s1 + $0x8] sm:$0xff]  ;;  %v1107_v23 = vld [vmem:[%s1390_s1 + $0x20] sm:$0xff] }
   0xd   : > { %315 = vmatpush.bf16.msra.mxu3 %v1110_v21  ;;  %237 = vmatpush.bf16.msra.mxu1 %v1104_v22  ;;  %v1109_v27 = vld [vmem:[%s1390_s1 + $0x30] sm:$0xff]  ;;  %v1103_v29 = vld [vmem:[%s1390_s1] sm:$0xff]  ;;  %v1112_v37 = vld [vmem:[%s1390_s1 + $0x48] sm:$0xff] }
   0xe   : > { %s1197_s17 = scalar_lea.vmem %s1389_s0, %s1139_s14  ;;  %v1116_v38 = vld [vmem:[%s1390_s1 + $0x68] sm:$0xff]  ;;  %v1111_v39 = vld [vmem:[%s1390_s1 + $0x40] sm:$0xff]  ;;  %v1118_v40 = vld [vmem:[%s1390_s1 + $0x78] sm:$0xff] }
   0xf   : > { %v1200_v0 = vld [vmem:[%s1197_s17] sm:$0x3]  ;;  %v1211_v5 = vld [vmem:[%s1197_s17 + $0x2] sm:$0x3]  ;;  %v1251_v26 = vld [vmem:[%s1197_s17 + $0x4] sm:$0x3] }
  0x10   : > { %183 = vst [vmem:[#allocation1] ss:$4 sm:$0xff] %v1200_v0  ;;  %v1218_v12 = vld [vmem:[%s1197_s17 + $0x2] sm:$0x3]  ;;  %211 = vmatpush.bf16.msra.mxu0 %v1105_v18  ;;  %278 = vmatpush.bf16.msra.mxu2 %v1107_v23  ;;  %v1114_v41 = vld [vmem:[%s1390_s1 + $0x58] sm:$0xff]  ;;  %v1117_v43 = vld [vmem:[%s1390_s1 + $0x70] sm:$0xff] }
  0x11   : > { %316 = vmatpush.bf16.msra.mxu3 %v1109_v27  ;;  %238 = vmatpush.bf16.msra.mxu1 %v1103_v29  ;;  %v1115_v42 = vld [vmem:[%s1390_s1 + $0x60] sm:$0xff]  ;;  %v1113_v44 = vld [vmem:[%s1390_s1 + $0x50] sm:$0xff]  ;;  %v1120_v46 = vld [vmem:[%s1390_s1 + $0x88] sm:$0xff] }
  0x12   : > { %v1119_v47 = vld [vmem:[%s1390_s1 + $0x80] sm:$0xff]  ;;  %v1124_v48 = vld [vmem:[%s1390_s1 + $0x18] sm:$0xff]  ;;  %v1122_v49 = vld [vmem:[%s1390_s1 + $0x8] sm:$0xff] }
  0x13   : > { %v1123_v50 = vld [vmem:[%s1390_s1 + $0x10] sm:$0xff]  ;;  %v1121_v51 = vld [vmem:[%s1390_s1] sm:$0xff]  ;;  %v1126_v52 = vld [vmem:[%s1390_s1 + $0x28] sm:$0xff] }
  0x14   : > { %953 = vmatmul.msk.bf16.vlgmr.msra.gmra.mxu1 %vm200_vm0, %v1200_v0  ;;  %353 = vmatpush.bf16.msrb.mxu0 %v1112_v37  ;;  %v1125_v54 = vld [vmem:[%s1390_s1 + $0x20] sm:$0xff]  ;;  %v1128_v55 = vld [vmem:[%s1390_s1 + $0x38] sm:$0xff]  ;;  %v1127_v58 = vld [vmem:[%s1390_s1 + $0x30] sm:$0xff] }
  0x15   : > { %429 = vmatpush.bf16.msrb.mxu2 %v1116_v38  ;;  %467 = vmatpush.bf16.msrb.mxu3 %v1118_v40  ;;  %v1132_v57 = vld [vmem:[%s1390_s1 + $0x58] sm:$0xff]  ;;  %v1134_v61 = vld [vmem:[%s1390_s1 + $0x68] sm:$0xff] }
  0x16   : > { %396 = vmatpush.bf16.msrb.mxu1 %v1114_v41 }
  0x17   : > { %v184_v1 = vld.sshfl [vmem:[#allocation1] sm:$0xff pattern:$0x73625140] }
  0x18   : > { %186 = vrot.lane.b32.xlu0 %v184_v1, %s1160_s18  ;;  %248 = vst [vmem:[#allocation1] ss:$4 sm:$0xff] %v1200_v0  ;;  %354 = vmatpush.bf16.msrb.mxu0 %v1111_v39 }
  0x19   : > { %430 = vmatpush.bf16.msrb.mxu2 %v1115_v42  ;;  %468 = vmatpush.bf16.msrb.mxu3 %v1117_v43 }
  0x1a   : > { %397 = vmatpush.bf16.msrb.mxu1 %v1113_v44 }
  0x1e   : > { %563 = vmatpush.bf16.msra.mxu1 %v1124_v48  ;;  %v1151_v48 = vld [vmem:[%s1391_s2] ss:$0 sm:$0xff] }
  0x1f   : > { %v249_v2 = vld.sshfl [vmem:[#allocation1] sm:$0xff pattern:$0x73625140] }
  0x20   : > { %289 = vst [vmem:[#allocation1] ss:$4 sm:$0xff] %v1200_v0  ;;  %v250_v24 = vshrl.u32 %v249_v2, 16  ;;  %v252_v25 = vshll.u32 %v249_v2, 16 }
  0x22   : > { %v254_v28 = vrot.slane %v252_v25, 1  ;;  %564 = vmatpush.bf16.msra.mxu1 %v1123_v50 }
  0x24   : > { %v255_v31 = vor.u32 %v254_v28, %v250_v24 }
  0x26   : > { %962 = vmatmul.msk.bf16.vlgmr.msra.gmra.mxu2 %vm200_vm0, %v255_v31 }
  0x27   : > { %v290_v3 = vld.sshfl [vmem:[#allocation1] sm:$0xff pattern:$0x73625140]  ;;  %590 = vmatpush.bf16.msra.mxu2 %v1122_v49 }
  0x28   : > { %292 = vrot.lane.b32.xlu0 %v290_v3, %s1161_s19  ;;  %327 = vst [vmem:[#allocation1] ss:$4 sm:$0xff] %v1200_v0 }
  0x2b   : > { %591 = vmatpush.bf16.msra.mxu2 %v1121_v51 }
  0x2f   : > { %v328_v4 = vld.sshfl [vmem:[#allocation1] sm:$0xff pattern:$0x73625140] }
  0x30   : > { %330 = vrot.lane.b32.xlu1 %v328_v4, %s1162_s20  ;;  %365 = vst [vmem:[#allocation1] ss:$4 sm:$0xff] %v1200_v0  ;;  %v1130_v0 = vld [vmem:[%s1390_s1 + $0x48] sm:$0xff]  ;;  %v1131_v4 = vld [vmem:[%s1390_s1 + $0x50] sm:$0xff] }
  0x36   : > { %998 = vmatmul.msk.bf16.vlgmr.msrb.gmra.mxu2 %vm200_vm0, %v1211_v5 }
  0x37   : > { %v366_v6 = vld.sshfl [vmem:[#allocation1] sm:$0xff pattern:$0x73625140]  ;;  %749 = vmatpush.bf16.msrb.mxu2 %v1132_v57 }
  0x38   : > { %v367_v7 = vshrl.u32 %v366_v6, 16  ;;  %v369_v8 = vshll.u32 %v366_v6, 16  ;;  %441 = vst [vmem:[#allocation1] ss:$4 sm:$0xff] %v1211_v5 }
  0x3a   : > { %v371_v9 = vrot.slane %v369_v8, 1  ;;  %v1133_v8 = vld [vmem:[%s1390_s1 + $0x60] sm:$0xff] }
  0x3b   : > { %750 = vmatpush.bf16.msrb.mxu2 %v1131_v4 }
  0x3c   : > { %v372_v10 = vor.u32 %v371_v9, %v367_v7  ;;  %v1129_v7 = vld [vmem:[%s1390_s1 + $0x40] sm:$0xff] }
  0x3e   : > { %373 = vrot.lane.b32.xlu1 %v372_v10, %s1161_s19  ;;  %v1136_v10 = vld [vmem:[%s1390_s1 + $0x78] sm:$0xff] }
  0x3f   : > { %v442_v11 = vld.sshfl [vmem:[#allocation1] sm:$0xff pattern:$0x73625140] }
  0x40   : > { %444 = vrot.lane.b32.xlu2 %v442_v11, %s1160_s18  ;;  %479 = vst [vmem:[#allocation1] ss:$4 sm:$0xff] %v1211_v5  ;;  %v1135_v11 = vld [vmem:[%s1390_s1 + $0x70] sm:$0xff] }
  0x46   : > { %1036 = vmatmul.msk.bf16.vlgmr.msra.gmra.mxu2 %vm200_vm0, %v1218_v12 }
  0x47   : > { %v1220_v13 = vld.sshfl [vmem:[#allocation1] sm:$0xff pattern:$0x73625140] }
  0x48   : > { %537 = vst [vmem:[#allocation1] ss:$4 sm:$0xff] %v1218_v12  ;;  %v483_v59 = vshll.u32 %v1220_v13, 16  ;;  %v481_v62 = vshrl.u32 %v1220_v13, 16  ;;  %v1138_v13 = vld [vmem:[%s1390_s1 + $0x88] sm:$0xff] }
  0x4a   : > { %v485_v63 = vrot.slane %v483_v59, 1 }
  0x4c   : > { %v486_v1 = vor.u32 %v485_v63, %v481_v62 }
  0x4f   : > { %v538_v14 = vld.sshfl [vmem:[#allocation1] sm:$0xff pattern:$0x73625140] }
  0x50   : > { %601 = vst [vmem:[#allocation1] ss:$4 sm:$0xff] %v1218_v12  ;;  %540 = vrot.lane.b32.xlu2 %v538_v14, %s1160_s18  ;;  %v1137_v14 = vld [vmem:[%s1390_s1 + $0x80] sm:$0xff] }
  0x57   : > { %v1225_v15 = vld.sshfl [vmem:[#allocation1] sm:$0xff pattern:$0x73625140] }
  0x58   : > { %642 = vst [vmem:[#allocation1] ss:$4 sm:$0xff] %v1218_v12  ;;  %v605_v2 = vshll.u32 %v1225_v15, 16  ;;  %v603_v5 = vshrl.u32 %v1225_v15, 16 }
  0x5a   : > { %v607_v6 = vrot.slane %v605_v2, 1 }
  0x5c   : > { %v608_v9 = vor.u32 %v607_v6, %v603_v5 }
  0x5f   : > { %v643_v19 = vld.sshfl [vmem:[#allocation1] sm:$0xff pattern:$0x73625140] }
  0x60   : > { %645 = vrot.lane.b32.xlu0 %v643_v19, %s1161_s19  ;;  %680 = vst [vmem:[#allocation1] ss:$4 sm:$0xff] %v1218_v12 }
  0x67   : > { %v681_v20 = vld.sshfl [vmem:[#allocation1] sm:$0xff pattern:$0x73625140] }
  0x68   : > { %718 = vst [vmem:[#allocation1] ss:$4 sm:$0xff] %v1218_v12  ;;  %683 = vrot.lane.b32.xlu1 %v681_v20, %s1162_s20 }
  0x6f   : > { %v719_v30 = vld.sshfl [vmem:[#allocation1] sm:$0xff pattern:$0x73625140] }
  0x70   : > { %794 = vst [vmem:[#allocation1] ss:$4 sm:$0xff] %v1251_v26  ;;  %v720_v32 = vshrl.u32 %v719_v30, 16  ;;  %v722_v33 = vshll.u32 %v719_v30, 16 }
  0x72   : > { %v724_v34 = vrot.slane %v722_v33, 1 }
  0x74   : > { %v725_v35 = vor.u32 %v724_v34, %v720_v32 }
  0x76   : > { %726 = vrot.lane.b32.xlu2 %v725_v35, %s1161_s19 }
  0x77   : > { %v795_v36 = vld.sshfl [vmem:[#allocation1] sm:$0xff pattern:$0x73625140] }
  0x78   : > { %797 = vrot.lane.b32.xlu0 %v795_v36, %s1160_s18  ;;  %832 = vst [vmem:[#allocation1] ss:$4 sm:$0xff] %v1251_v26  ;;  %s934_s18 = sshll.u32 %s1394_s13, 1 }
  0x79   : > { %s1380_s23 = scalar_lea.vmem %s1392_s3, %s934_s18 }
  0x7f   : > { %v833_v18 = vld.sshfl [vmem:[#allocation1] sm:$0xff pattern:$0x73625140] }
  0x80   : > { %v836_v19 = vshll.u32 %v833_v18, 16  ;;  %v834_v20 = vshrl.u32 %v833_v18, 16 }
  0x82   : > { %v838_v21 = vrot.slane %v836_v19, 1 }
  0x84   : > { %v839_v22 = vor.u32 %v838_v21, %v834_v20 }
  0x8a   : > { %v187_v45 = vpop.permute.xlu0 %186 }
  0x8b   : > { %944 = vmatmul.msk.bf16.vlgmr.msra.gmra.mxu0 %vm200_vm0, %v187_v45 }
  0x8c   : > { %508 = vmatpush.bf16.msra.mxu0 %v1120_v46 }
  0x90   : > { %509 = vmatpush.bf16.msra.mxu0 %v1119_v47 }
  0x91   : > { %v240_v24 = vpop.f32.mrf.mxu1 }
  0x9a   : > { %v293_v53 = vpop.permute.xlu0 %292  ;;  %v445_v60 = vpop.permute.xlu2 %444 }
  0x9b   : > { %971 = vmatmul.msk.bf16.vlgmr.msra.gmra.mxu3 %vm200_vm0, %v293_v53 }
  0x9c   : > { %630 = vmatpush.bf16.msra.mxu3 %v1126_v52 }
  0xa0   : > { %631 = vmatpush.bf16.msra.mxu3 %v1125_v54 }
  0xa2   : > { %v331_v56 = vpop.permute.xlu1 %330 }
  0xa3   : > { %980 = vmatmul.msk.bf16.vlgmr.msrb.gmra.mxu0 %vm200_vm0, %v331_v56 }
  0xa4   : > { %668 = vmatpush.bf16.msrb.mxu0 %v1128_v55 }
  0xa8   : > { %669 = vmatpush.bf16.msrb.mxu0 %v1127_v58 }
  0xa9   : > { %v280_v25 = vpop.f32.mrf.mxu2 }
  0xaa   : > { %v541_v12 = vpop.permute.xlu2 %540 }
  0xab   : > { %1007 = vmatmul.msk.bf16.vlgmr.msrb.gmra.mxu3 %vm200_vm0, %v445_v60 }
  0xac   : > { %782 = vmatpush.bf16.msrb.mxu3 %v1134_v61 }
  0xb0   : > { %v374_v3 = vpop.permute.xlu1 %373  ;;  %783 = vmatpush.bf16.msrb.mxu3 %v1133_v8 }
  0xb1   : > { %989 = vmatmul.msk.bf16.vlgmr.msrb.gmra.mxu1 %vm200_vm0, %v374_v3  ;;  %v282_v27 = vpop.f32.mrf.mxu2 }
  0xb2   : > { %706 = vmatpush.bf16.msrb.mxu1 %v1130_v0 }
  0xb3   : > { %1016 = vmatmul.msk.bf16.vlgmr.msra.gmra.mxu0 %vm200_vm0, %v486_v1 }
  0xb4   : > { %820 = vmatpush.bf16.msra.mxu0 %v1136_v10 }
  0xb6   : > { %707 = vmatpush.bf16.msrb.mxu1 %v1129_v7 }
  0xb8   : > { %821 = vmatpush.bf16.msra.mxu0 %v1135_v11 }
  0xb9   : > { %v432_v29 = vpop.f32.mrf.mxu2 }
  0xbb   : > { %1045 = vmatmul.msk.bf16.vlgmr.msra.gmra.mxu3 %vm200_vm0, %v608_v9 }
  0xc1   : > { %1027 = vmatmul.msk.bf16.vlgmr.msra.gmra.mxu1 %vm200_vm0, %v541_v12  ;;  %v434_v31 = vpop.f32.mrf.mxu2 }
  0xc2   : > { %861 = vmatpush.bf16.msra.mxu1 %v1138_v13 }
  0xc6   : > { %862 = vmatpush.bf16.msra.mxu1 %v1137_v14 }
  0xc9   : > { %v593_v37 = vpop.f32.mrf.mxu2 }
  0xcb   : > { %1081 = vmatmul.msk.bf16.vlgmr.msrb.gmra.mxu3 %vm200_vm0, %v1251_v26  ;;  %v242_v26 = vpop.f32.mrf.mxu1 }
  0xd0   : > { %v727_v15 = vpop.permute.xlu2 %726 }
  0xd1   : > { %1072 = vmatmul.msk.bf16.vlgmr.msrb.gmra.mxu2 %vm200_vm0, %v727_v15  ;;  %v595_v44 = vpop.f32.mrf.mxu2 }
  0xd2   : > { %v646_v16 = vpop.permute.xlu0 %645 }
  0xd3   : > { %1054 = vmatmul.msk.bf16.vlgmr.msrb.gmra.mxu0 %vm200_vm0, %v646_v16 }
  0xda   : > { %v684_v17 = vpop.permute.xlu1 %683 }
  0xdb   : > { %1063 = vmatmul.msk.bf16.vlgmr.msrb.gmra.mxu1 %vm200_vm0, %v684_v17 }
  0xea   : > { %v798_v23 = vpop.permute.xlu0 %797 }
  0xeb   : > { %1090 = vmatmul.msk.bf16.vlgmr.msra.gmra.mxu0 %vm200_vm0, %v798_v23  ;;  %1099 = vmatmul.msk.bf16.vlgmr.msra.gmra.mxu1 %vm200_vm0, %v839_v22 }
 0x108   : > { %v213_v28 = vpop.f32.mrf.mxu0 }
 0x109   : > { %v241_v33 = vadd.f32 %v240_v24, %v213_v28 }
 0x10b   : > { %v284_v35 = vadd.f32 %v280_v25, %v241_v33 }
 0x110   : > { %v215_v30 = vpop.f32.mrf.mxu0 }
 0x11e   : > { %v318_v32 = vpop.f32.mrf.mxu3 }
 0x11f   : > { %v322_v38 = vadd.f32 %v318_v32, %v284_v35 }
 0x120   : > { %v356_v34 = vpop.f32.mrf.mxu0 }
 0x121   : > { %v360_v40 = vadd.f32 %v356_v34, %v322_v38 }
 0x126   : > { %v320_v36 = vpop.f32.mrf.mxu3 }
 0x128   : > { %v358_v39 = vpop.f32.mrf.mxu0 }
 0x12e   : > { %v399_v41 = vpop.f32.mrf.mxu1  ;;  %v470_v42 = vpop.f32.mrf.mxu3 }
 0x12f   : > { %v403_v43 = vadd.f32 %v399_v41, %v360_v40 }
 0x130   : > { %v511_v45 = vpop.f32.mrf.mxu0 }
 0x131   : > { %v436_v46 = vadd.f32 %v432_v29, %v403_v43 }
 0x133   : > { %v474_v47 = vadd.f32 %v470_v42, %v436_v46 }
 0x135   : > { %v515_v49 = vadd.f32 %v511_v45, %v474_v47 }
 0x136   : > { %v401_v50 = vpop.f32.mrf.mxu1  ;;  %v472_v51 = vpop.f32.mrf.mxu3 }
 0x137   : > { %v519_v52 = vadd.f32 %v1151_v48, %v515_v49 }
 0x138   : > { %v513_v53 = vpop.f32.mrf.mxu0 }
 0x139   : > { %v520_v54 = vmul.f32 0.25, %v519_v52 }
 0x13b   : > { %v521_v55 = vmax.f32 %v519_v52, %v520_v54 }
 0x13d   : > { %v522_v56 = vpack.c.bf16 %v521_v55, %v521_v55 }
 0x13e   : > { %v566_v57 = vpop.f32.mrf.mxu1  ;;  %v633_v58 = vpop.f32.mrf.mxu3 }
 0x13f   : > { %524 = vst.msk [vmem:[%s1380_s23] sm:$0x1] %vm523_vm1, %v522_v56  ;;  %v594_v1 = vadd.f32 %v593_v37, %v566_v57 }
 0x141   : > { %v637_v4 = vadd.f32 %v633_v58, %v594_v1 }
 0x146   : > { %v568_v59 = vpop.f32.mrf.mxu1  ;;  %v635_v60 = vpop.f32.mrf.mxu3 }
 0x14e   : > { %v785_v61 = vpop.f32.mrf.mxu3 }
 0x150   : > { %v671_v62 = vpop.f32.mrf.mxu0 }
 0x151   : > { %v675_v6 = vadd.f32 %v671_v62, %v637_v4 }
 0x154   : > { %v752_v63 = vpop.f32.mrf.mxu2 }
 0x156   : > { %v787_v0 = vpop.f32.mrf.mxu3 }
 0x158   : > { %v673_v2 = vpop.f32.mrf.mxu0  ;;  %v709_v3 = vpop.f32.mrf.mxu1 }
 0x159   : > { %v713_v7 = vadd.f32 %v709_v3, %v675_v6 }
 0x15b   : > { %v756_v9 = vadd.f32 %v752_v63, %v713_v7 }
 0x15c   : > { %v754_v5 = vpop.f32.mrf.mxu2 }
 0x15d   : > { %v789_v10 = vadd.f32 %v785_v61, %v756_v9 }
 0x160   : > { %v711_v8 = vpop.f32.mrf.mxu1 }
 0x168   : > { %v823_v11 = vpop.f32.mrf.mxu0  ;;  %v864_v12 = vpop.f32.mrf.mxu1 }
 0x169   : > { %v827_v13 = vadd.f32 %v823_v11, %v789_v10 }
 0x16b   : > { %v868_v14 = vadd.f32 %v864_v12, %v827_v13 }
 0x16d   : > { %v869_v15 = vadd.f32 %v1151_v48, %v868_v14 }
 0x16f   : > { %v870_v16 = vmul.f32 0.25, %v869_v15 }
 0x170   : > { %v825_v17 = vpop.f32.mrf.mxu0  ;;  %v866_v18 = vpop.f32.mrf.mxu1 }
 0x171   : > { %v871_v19 = vmax.f32 %v869_v15, %v870_v16 }
 0x173   : > { %v872_v20 = vpack.c.bf16 %v871_v19, %v871_v19 }
 0x175   : > { %1100 = vst.msk [vmem:[%s1380_s23 + $0x1] sm:$0x1] %vm523_vm1, %v872_v20 }
 0x176 PF: > { %s13_s12 = sadd.s32 1, %s1158_s12  }
 0x177   : > { %p10_p4 = scmp.ge.s32.totalorder %s13_s12, 4  }
 0x179   :  { %12 = sbr.rel (!%p10_p4) target bundleno = 1 (0x1), region = 65 }

// kernel: discriminator_forward.8
= control target key start
LH: loop header
LB: loop body
LE: loop exit
PB: predicated region body
PF: predicated region fallthrough
CT: control target
= control target key end

     0   :  { %s924_s12 = smov 0   ;;  %s1072_s0 = inlined_call_operand.vmem [shape: bf16[2,2,2,256], index: 0, kind: input, shape index: {}]   ;;  %s1073_s1 = inlined_call_operand.vmem [shape: bf16[576,128], index: 1, kind: input, shape index: {}]   ;;  %s1074_s2 = inlined_call_operand.vmem [shape: f32[1,128], index: 2, kind: input, shape index: {}]   ;;  %s1075_s3 = inlined_call_operand.vmem [shape: f32[2,1,1,128], index: 3, kind: output, shape index: {}]  }
   0x1 LB: > { %s688_s13 = sadd.s32 4294967295, %s901_s12   ;;  %p692_p0 = scmp.ge.s32.totalorder %s901_s12, 1  ;;  %s901_s12 = sphi %s924_s12, %s13_s12  }
   0x2   : > { %p136_p1 = scmp.lt.s32.totalorder %s901_s12, 3 }
   0x4   : > { %p137_p2 = pnand %p692_p0, %p136_p1 }
   0x5   : > { %p157_p3 = scmp.lt.s32.totalorder (!%p137_p2), %s688_s13, 1  ;;  %s903_s18 = smov (!%p137_p2), 64  }
   0x6   : > { %140 = sbr.rel (%p137_p2) target bundleno = 321 (0x141), region = 32 }
   0xb   : > { %s1077_s13 = smov (!%p157_p3, %s688_s13), 1  ;;  %v861_v3 = vld [vmem:[%s1073_s1 + $0x58] sm:$0xff]  ;;  %v860_v6 = vld [vmem:[%s1073_s1 + $0x50] sm:$0xff]  ;;  %v859_v11 = vld [vmem:[%s1073_s1 + $0x48] sm:$0xff]  ;;  %vm215_vm0 = vcmask 523264  }
   0xc   : > { %s693_s14 = sshll.u32 %s1077_s13, 2  ;;  %v857_v4 = vld [vmem:[%s1073_s1 + $0x38] sm:$0xff]  ;;  %314 = vmatpush.bf16.msra.mxu2 %v861_v3  ;;  %v856_v7 = vld [vmem:[%s1073_s1 + $0x30] sm:$0xff]  ;;  %v855_v12 = vld [vmem:[%s1073_s1 + $0x28] sm:$0xff]  ;;  %s163_s22 = scalar_lea.vmem %s1075_s3, %s1077_s13 }
   0xd   : > { %s938_s17 = scalar_lea.vmem %s1072_s0, %s693_s14  ;;  %v853_v5 = vld [vmem:[%s1073_s1 + $0x18] sm:$0xff]  ;;  %223 = vmatpush.bf16.msra.mxu0 %v857_v4  ;;  %v852_v9 = vld [vmem:[%s1073_s1 + $0x10] sm:$0xff]  ;;  %v851_v14 = vld [vmem:[%s1073_s1 + $0x8] sm:$0xff] }
   0xe   : > { %v166_v0 = vld [vmem:[%s938_s17] sm:$0x3]  ;;  %v865_v8 = vld [vmem:[%s1073_s1 + $0x78] sm:$0xff]  ;;  %262 = vmatpush.bf16.msra.mxu1 %v853_v5  ;;  %v864_v10 = vld [vmem:[%s1073_s1 + $0x70] sm:$0xff] }
   0xf   : > { %186 = vst [vmem:[#allocation1] ss:$9 sm:$0xff] %v166_v0  ;;  %364 = vmatpush.bf16.msra.mxu3 %v865_v8  ;;  %v863_v15 = vld [vmem:[%s1073_s1 + $0x68] sm:$0xff]  ;;  %v858_v16 = vld [vmem:[%s1073_s1 + $0x40] sm:$0xff]  ;;  %v877_v19 = vld [vmem:[%s1073_s1 + $0xd8] sm:$0xff] }
  0x10   : > { %315 = vmatpush.bf16.msra.mxu2 %v860_v6  ;;  %v854_v17 = vld [vmem:[%s1073_s1 + $0x20] sm:$0xff]  ;;  %v869_v25 = vld [vmem:[%s1073_s1 + $0x98] sm:$0xff]  ;;  %v876_v28 = vld [vmem:[%s1073_s1 + $0xd0] sm:$0xff] }
  0x11   : > { %224 = vmatpush.bf16.msra.mxu0 %v856_v7  ;;  %v850_v18 = vld [vmem:[%s1073_s1] sm:$0xff]  ;;  %v873_v27 = vld [vmem:[%s1073_s1 + $0xb8] sm:$0xff]  ;;  %v868_v29 = vld [vmem:[%s1073_s1 + $0x90] sm:$0xff] }
  0x12   : > { %263 = vmatpush.bf16.msra.mxu1 %v852_v9  ;;  %v694_v22 = vld [vmem:[%s938_s17 + $0x2] sm:$0x3]  ;;  %v872_v30 = vld [vmem:[%s1073_s1 + $0xb0] sm:$0xff]  ;;  %v875_v31 = vld [vmem:[%s1073_s1 + $0xc8] sm:$0xff] }
  0x13   : > { %365 = vmatpush.bf16.msra.mxu3 %v864_v10  ;;  %v862_v26 = vld [vmem:[%s1073_s1 + $0x60] sm:$0xff]  ;;  %v867_v32 = vld [vmem:[%s1073_s1 + $0x88] sm:$0xff]  ;;  %v881_v37 = vld [vmem:[%s1073_s1 + $0xf8] sm:$0xff] }
  0x14   : > { %316 = vmatpush.bf16.msra.mxu2 %v859_v11  ;;  %v871_v33 = vld [vmem:[%s1073_s1 + $0xa8] sm:$0xff]  ;;  %v874_v34 = vld [vmem:[%s1073_s1 + $0xc0] sm:$0xff]  ;;  %v880_v39 = vld [vmem:[%s1073_s1 + $0xf0] sm:$0xff] }
  0x15   : > { %225 = vmatpush.bf16.msra.mxu0 %v855_v12  ;;  %v866_v35 = vld [vmem:[%s1073_s1 + $0x80] sm:$0xff]  ;;  %v885_v40 = vld [vmem:[%s1073_s1 + $0x118] sm:$0xff]  ;;  %v879_v41 = vld [vmem:[%s1073_s1 + $0xe8] sm:$0xff] }
  0x16   : > { %v187_v1 = vld [vmem:[#allocation1] sm:$0xff]  ;;  %264 = vmatpush.bf16.msra.mxu1 %v851_v14  ;;  %v884_v43 = vld [vmem:[%s1073_s1 + $0x110] sm:$0xff]  ;;  %v883_v45 = vld [vmem:[%s1073_s1 + $0x108] sm:$0xff] }
  0x17   : > { %189 = vrot.lane.b32.xlu0 %v187_v1, %s903_s18  ;;  %279 = vst [vmem:[#allocation1] ss:$9 sm:$0xff] %v166_v0  ;;  %366 = vmatpush.bf16.msra.mxu3 %v863_v15  ;;  %v870_v36 = vld [vmem:[%s1073_s1 + $0xa0] sm:$0xff] }
  0x18   : > { %317 = vmatpush.bf16.msra.mxu2 %v858_v16  ;;  %v878_v44 = vld [vmem:[%s1073_s1 + $0xe0] sm:$0xff] }
  0x19   : > { %226 = vmatpush.bf16.msra.mxu0 %v854_v17  ;;  %v882_v46 = vld [vmem:[%s1073_s1 + $0x100] sm:$0xff] }
  0x1a   : > { %265 = vmatpush.bf16.msra.mxu1 %v850_v18  ;;  %v165_v10 = vld [vmem:[%s1074_s2] sm:$0x1] }
  0x1b   : > { %367 = vmatpush.bf16.msra.mxu3 %v862_v26 }
  0x1c   : > { %520 = vmatpush.bf16.msrb.mxu2 %v877_v19 }
  0x1d   : > { %728 = vmatmul.msk.bf16.vlgmr.msra.gmra.mxu1 %vm215_vm0, %v166_v0  ;;  %418 = vmatpush.bf16.msrb.mxu0 %v869_v25 }
  0x1e   : > { %v280_v2 = vld [vmem:[#allocation1] sm:$0xff]  ;;  %471 = vmatpush.bf16.msrb.mxu1 %v873_v27 }
  0x1f   : > { %332 = vst [vmem:[#allocation1] ss:$9 sm:$0xff] %v166_v0  ;;  %v281_v20 = vshrl.u32 %v280_v2, 16  ;;  %574 = vmatpush.bf16.msrb.mxu3 %v881_v37 }
  0x20   : > { %521 = vmatpush.bf16.msrb.mxu2 %v876_v28 }
  0x21   : > { %745 = vmatmul.msk.bf16.vlgmr.msra.gmra.mxu2 %vm215_vm0, %v281_v20  ;;  %419 = vmatpush.bf16.msrb.mxu0 %v868_v29 }
  0x22   : > { %472 = vmatpush.bf16.msrb.mxu1 %v872_v30 }
  0x23   : > { %575 = vmatpush.bf16.msrb.mxu3 %v880_v39 }
  0x24   : > { %522 = vmatpush.bf16.msrb.mxu2 %v875_v31 }
  0x25   : > { %420 = vmatpush.bf16.msrb.mxu0 %v867_v32 }
  0x26   : > { %v333_v13 = vld [vmem:[#allocation1 + $0x9] sm:$0xff]  ;;  %473 = vmatpush.bf16.msrb.mxu1 %v871_v33 }
  0x27   : > { %382 = vst [vmem:[#allocation1] ss:$9 sm:$0xff] %v166_v0  ;;  %762 = vmatmul.msk.bf16.vlgmr.msra.gmra.mxu3 %vm215_vm0, %v333_v13 }
  0x28   : > { %523 = vmatpush.bf16.msrb.mxu2 %v874_v34  ;;  %576 = vmatpush.bf16.msrb.mxu3 %v879_v41 }
  0x29   : > { %421 = vmatpush.bf16.msrb.mxu0 %v866_v35 }
  0x2a   : > { %474 = vmatpush.bf16.msrb.mxu1 %v870_v36 }
  0x2c   : > { %577 = vmatpush.bf16.msrb.mxu3 %v878_v44 }
  0x2e   : > { %v383_v21 = vld [vmem:[#allocation1 + $0x9] sm:$0xff] }
  0x2f   : > { %385 = vrot.lane.b32.xlu0 %v383_v21, %s903_s18  ;;  %436 = vst [vmem:[#allocation1] ss:$9 sm:$0xff] %v166_v0 }
  0x31   : > { %813 = vmatmul.msk.bf16.vlgmr.msrb.gmra.mxu2 %vm215_vm0, %v694_v22 }
  0x36   : > { %v437_v23 = vld [vmem:[#allocation1 + $0x9] sm:$0xff] }
  0x37   : > { %538 = vst [vmem:[#allocation1] ss:$9 sm:$0xff] %v694_v22  ;;  %v438_v38 = vshrl.u32 %v437_v23, 16 }
  0x39   : > { %796 = vmatmul.msk.bf16.vlgmr.msrb.gmra.mxu1 %vm215_vm0, %v438_v38 }
  0x3e   : > { %v539_v24 = vld [vmem:[#allocation1] sm:$0xff] }
  0x3f   : > { %541 = vrot.lane.b32.xlu1 %v539_v24, %s903_s18  ;;  %592 = vst [vmem:[#allocation1] ss:$9 sm:$0xff] %v694_v22 }
  0x46   : > { %v593_v48 = vld [vmem:[#allocation1] sm:$0xff] }
  0x47   : > { %v594_v49 = vshrl.u32 %v593_v48, 16 }
  0x89   : > { %v190_v42 = vpop.permute.xlu0 %189 }
  0x8a   : > { %711 = vmatmul.msk.bf16.vlgmr.msra.gmra.mxu0 %vm215_vm0, %v190_v42 }
  0x8b   : > { %627 = vmatpush.bf16.msra.mxu0 %v885_v40 }
  0x8f   : > { %628 = vmatpush.bf16.msra.mxu0 %v884_v43 }
  0x93   : > { %629 = vmatpush.bf16.msra.mxu0 %v883_v45 }
  0x97   : > { %630 = vmatpush.bf16.msra.mxu0 %v882_v46 }
  0x9a   : > { %v267_v51 = vpop.f32.mrf.mxu1 }
  0xa1   : > { %v386_v47 = vpop.permute.xlu0 %385 }
  0xa2   : > { %779 = vmatmul.msk.bf16.vlgmr.msrb.gmra.mxu0 %vm215_vm0, %v386_v47  ;;  %v269_v53 = vpop.f32.mrf.mxu1 }
  0xa4   : > { %v319_v52 = vpop.f32.mrf.mxu2 }
  0xaa   : > { %v369_v55 = vpop.f32.mrf.mxu3 }
  0xac   : > { %v321_v54 = vpop.f32.mrf.mxu2 }
  0xb1   : > { %v542_v50 = vpop.permute.xlu1 %541 }
  0xb2   : > { %830 = vmatmul.msk.bf16.vlgmr.msrb.gmra.mxu3 %vm215_vm0, %v542_v50  ;;  %847 = vmatmul.msk.bf16.vlgmr.msra.gmra.mxu0 %vm215_vm0, %v594_v49  ;;  %v371_v56 = vpop.f32.mrf.mxu3 }
  0xb4   : > { %v525_v58 = vpop.f32.mrf.mxu2 }
  0xb6   : > { %v476_v57 = vpop.f32.mrf.mxu1 }
  0xbc   : > { %v527_v63 = vpop.f32.mrf.mxu2 }
  0xbe   : > { %v478_v61 = vpop.f32.mrf.mxu1 }
 0x107   : > { %v228_v59 = vpop.f32.mrf.mxu0 }
 0x108   : > { %v268_v60 = vadd.f32 %v267_v51, %v228_v59 }
 0x10a   : > { %v323_v62 = vadd.f32 %v319_v52, %v268_v60 }
 0x10c   : > { %v373_v3 = vadd.f32 %v369_v55, %v323_v62 }
 0x10f   : > { %v230_v0 = vpop.f32.mrf.mxu0 }
 0x11f   : > { %v423_v1 = vpop.f32.mrf.mxu0 }
 0x120   : > { %v427_v4 = vadd.f32 %v423_v1, %v373_v3 }
 0x122   : > { %v480_v6 = vadd.f32 %v476_v57, %v427_v4 }
 0x124   : > { %v529_v7 = vadd.f32 %v525_v58, %v480_v6 }
 0x127   : > { %v425_v2 = vpop.f32.mrf.mxu0 }
 0x12f   : > { %v632_v5 = vpop.f32.mrf.mxu0 }
 0x135   : > { %v579_v8 = vpop.f32.mrf.mxu3 }
 0x136   : > { %v583_v9 = vadd.f32 %v579_v8, %v529_v7 }
 0x137   : > { %v634_v11 = vpop.f32.mrf.mxu0 }
 0x138   : > { %v636_v12 = vadd.f32 %v632_v5, %v583_v9 }
 0x13a   : > { %v637_v13 = vadd.f32 %v636_v12, %v165_v10 }
 0x13c   : > { %v638_v14 = vmul.f32 0.25, %v637_v13 }
 0x13d   : > { %v581_v15 = vpop.f32.mrf.mxu3 }
 0x13e   : > { %v639_v16 = vmax.f32 %v637_v13, %v638_v14 }
 0x140   : > { %640 = vst [vmem:[%s163_s22] sm:$0x1] %v639_v16 }
 0x141 PF: > { %s13_s12 = sadd.s32 1, %s901_s12  }
 0x142   : > { %p10_p4 = scmp.ge.s32.totalorder %s13_s12, 4  }
 0x144   :  { %12 = sbr.rel (!%p10_p4) target bundleno = 1 (0x1), region = 63 }

// kernel: discriminator_forward.9
= control target key start
LH: loop header
LB: loop body
LE: loop exit
PB: predicated region body
PF: predicated region fallthrough
CT: control target
= control target key end

     0   :  { %vm96_vm0 = vcmask 66560   ;;  %s196_s1 = inlined_call_operand.vmem [shape: bf16[128,9], index: 1, kind: input, shape index: {}]   ;;  %s197_s2 = inlined_call_operand.vmem [shape: f32[1,9], index: 2, kind: input, shape index: {}]   ;;  %s198_s0 = inlined_call_operand.vmem [shape: bf16[2,128], index: 0, kind: input, shape index: {}]   ;;  %s199_s3 = inlined_call_operand.vmem [shape: f32[2,9], index: 3, kind: output, shape index: {}]  }
   0x1   :  { %v141_v0 = vld [vmem:[%s196_s1 + $0x38] sm:$0xff]  ;;  %v140_v1 = vld [vmem:[%s196_s1 + $0x30] sm:$0xff]  ;;  %v139_v2 = vld [vmem:[%s196_s1 + $0x28] sm:$0xff] }
   0x2   :  { %83 = vmatpush.bf16.msra.mxu0 %v141_v0  ;;  %v138_v3 = vld [vmem:[%s196_s1 + $0x20] sm:$0xff]  ;;  %v137_v4 = vld [vmem:[%s196_s1 + $0x18] sm:$0xff]  ;;  %v136_v5 = vld [vmem:[%s196_s1 + $0x10] sm:$0xff] }
   0x3   :  { %v135_v6 = vld [vmem:[%s196_s1 + $0x8] sm:$0xff]  ;;  %v134_v7 = vld [vmem:[%s196_s1] sm:$0xff] }
   0x4   :  { %v14_v8 = vld [vmem:[%s198_s0] sm:$0x1] }
   0x5   :  { %v142_v9 = vld [vmem:[%s197_s2] ss:$0 sm:$0xff] }
   0x6   :  { %84 = vmatpush.bf16.msra.mxu0 %v140_v1 }
   0xa   :  { %85 = vmatpush.bf16.msra.mxu0 %v139_v2 }
   0xe   :  { %86 = vmatpush.bf16.msra.mxu0 %v138_v3 }
  0x12   :  { %87 = vmatpush.bf16.msra.mxu0 %v137_v4 }
  0x16   :  { %88 = vmatpush.bf16.msra.mxu0 %v136_v5 }
  0x1a   :  { %89 = vmatpush.bf16.msra.mxu0 %v135_v6 }
  0x1e   :  { %90 = vmatpush.bf16.msra.mxu0 %v134_v7 }
  0x21   :  { %91 = vmatmul.bf16.vlgmr.msra.gmra.mxu0 %v14_v8 }
  0x9e   :  { %v92_v10 = vpop.f32.mrf.mxu0 }
  0x9f   :  { %v93_v11 = vadd.f32 %v142_v9, %v92_v10 }
  0xa1   :  { %97 = vst.msk [vmem:[%s199_s3] sm:$0x3] %vm96_vm0, %v93_v11 }
  0xa6   :  { %v94_v12 = vpop.f32.mrf.mxu0 }

</bundles_post_ra>
